<compile_context>
chip_gen: v7x
topology: tpu7x:2x2x1
jax: 0.10.0
libtpu: 0.0.40
codegen_flags: <defaults>
</compile_context>

<pallas_src>
import functools
import sys

import jax
import jax.numpy as jnp
from jax import lax
from jax.experimental import pallas as pl
from jax.experimental.pallas import tpu as pltpu

_BN_EPS = 1e-5

# ---------------------------------------------------------------------------
# Capability probes (module-level cache, run once per dtype, loud fallback).
# ---------------------------------------------------------------------------
_PROBE_CACHE = {}


def _run_probe(key, fn):
    if key not in _PROBE_CACHE:
        try:
            jax.block_until_ready(fn())
            _PROBE_CACHE[key] = True
        except Exception as e:  # any lowering/runtime failure -> safe fallback
            print(f"[basic_block_pallas] probe {key} failed "
                  f"({type(e).__name__}); using fallback path", file=sys.stderr)
            _PROBE_CACHE[key] = False
    return _PROBE_CACHE[key]


def _inkernel_pad_supported(dtype):
    """Can we build the 1-pixel zero halo with in-VMEM concatenation?"""
    dtype = jnp.dtype(dtype)

    def fn():
        def k(a_ref, o_ref):
            x = a_ref[...]
            zr = jnp.zeros((1, 1, x.shape[2], x.shape[3]), x.dtype)
            x = jnp.concatenate([zr, x, zr], axis=1)
            zc = jnp.zeros((1, x.shape[1], 1, x.shape[3]), x.dtype)
            o_ref[...] = jnp.concatenate([zc, x, zc], axis=2)

        a = jnp.ones((1, 6, 6, 4), dtype)
        return pl.pallas_call(
            k, out_shape=jax.ShapeDtypeStruct((1, 8, 8, 4), dtype))(a)

    return _run_probe(("inkernel_pad", str(dtype)), fn)


def _patch_scratch_store_supported(dtype):
    """Can we store taps at unaligned lane offsets into a VMEM scratch?"""
    dtype = jnp.dtype(dtype)

    def fn():
        def k(a_ref, o_ref, s_ref):
            for t in range(3):
                s_ref[:, t * 4:(t + 1) * 4] = a_ref[...]
            o_ref[...] = s_ref[...]

        a = jnp.ones((8, 4), dtype)
        return pl.pallas_call(
            k, out_shape=jax.ShapeDtypeStruct((8, 12), dtype),
            scratch_shapes=[pltpu.VMEM((8, 12), dtype)])(a)

    return _run_probe(("patch_scratch_store", str(dtype)), fn)


# ---------------------------------------------------------------------------
# Kernel 1: 3x3 conv (+ fused input-BN+ReLU, + fused 1x1 shortcut) + BN stats.
#   grid = (Cout tiles, N); batch axis (last, "arbitrary") accumulates stats.
# ---------------------------------------------------------------------------
def _conv_bn_stats_kernel(*refs, stride, h_out, w_out, cin, apply_in_affine,
                          fuse_shortcut, fuse_k, pad_in_kernel, compute_dtype):
    it = iter(refs)
    x_ref = next(it)
    w_ref = next(it)
    isc_ref = next(it) if apply_in_affine else None
    ish_ref = next(it) if apply_in_affine else None
    wsc_ref = next(it) if fuse_shortcut else None
    y_ref = next(it)
    sum_ref = next(it)
    ssq_ref = next(it)
    if fuse_shortcut:
        ysc_ref = next(it)
        sum_sc_ref = next(it)
        ssq_sc_ref = next(it)
    patches_ref = next(it) if fuse_k else None

    b = pl.program_id(1)
    rows = h_out * w_out

    xv = x_ref[...]                       # (1, H[+2], W[+2], Cin)

    if apply_in_affine:
        # Fused folded-BN of the previous conv + ReLU on the input (f32 math).
        xv = (xv.astype(jnp.float32) * isc_ref[...].reshape(1, 1, 1, cin)
              + ish_ref[...].reshape(1, 1, 1, cin))
        xv = jnp.maximum(xv, 0.0)
        if not pad_in_kernel:
            # Host pre-padded input: the halo must stay exactly zero after the
            # affine (shift/ReLU would otherwise leak into the conv).
            hh = lax.broadcasted_iota(jnp.int32, xv.shape, 1)
            ww = lax.broadcasted_iota(jnp.int32, xv.shape, 2)
            interior = ((hh >= 1) & (hh <= xv.shape[1] - 2)
                        & (ww >= 1) & (ww <= xv.shape[2] - 2))
            xv = jnp.where(interior, xv, 0.0)
    xv = xv.astype(compute_dtype)

    if pad_in_kernel:
        # Build the 1-pixel zero halo in VMEM (no extra HBM pass).
        zr = jnp.zeros((1, 1, xv.shape[2], cin), compute_dtype)
        xv = jnp.concatenate([zr, xv, zr], axis=1)
        zc = jnp.zeros((1, xv.shape[1], 1, cin), compute_dtype)
        xv = jnp.concatenate([zc, xv, zc], axis=2)
    # xv is now the zero-padded (1, H+2, W+2, Cin) conv input.

    def tap(di, dj):
        return lax.slice(
            xv, (0, di, dj, 0),
            (1, di + (h_out - 1) * stride + 1,
             dj + (w_out - 1) * stride + 1, cin),
            (1, stride, stride, 1)).reshape(rows, cin)

    wv = w_ref[...]                       # (9*Cin, Ct)
    taps_idx = [(di, dj) for di in range(3) for dj in range(3)]
    xc = None                             # centre tap (shortcut operand)

    if fuse_k:
        # Fill the im2col scratch one tap at a time (only one tap live),
        # then a single MXU matmul with K = 9*Cin keeps the array full.
        for t, (di, dj) in enumerate(taps_idx):
            tp = tap(di, dj)
            patches_ref[:, t * cin:(t + 1) * cin] = tp
            if fuse_shortcut and t == 4:
                xc = tp
        acc = jnp.dot(patches_ref[...], wv, preferred_element_type=jnp.float32)
    else:
        # Fallback: 9 accumulated narrow-K matmuls.
        # TODO(synk): group taps in pairs/quads so K fills the MXU depth.
        acc = jnp.zeros((rows, wv.shape[-1]), jnp.float32)
        for t, (di, dj) in enumerate(taps_idx):
            tp = tap(di, dj)
            acc += jnp.dot(tp, wv[t * cin:(t + 1) * cin, :],
                           preferred_element_type=jnp.float32)
            if fuse_shortcut and t == 4:
                xc = tp

    # Single-pass BN statistics (f32), accumulated across the batch grid axis.
    @pl.when(b == 0)
    def _():
        sum_ref[...] = jnp.zeros_like(sum_ref)
        ssq_ref[...] = jnp.zeros_like(ssq_ref)

    sum_ref[...] += jnp.sum(acc, axis=0, keepdims=True)
    ssq_ref[...] += jnp.sum(acc * acc, axis=0, keepdims=True)
    y_ref[...] = acc.reshape(1, h_out, w_out, -1).astype(y_ref.dtype)

    if fuse_shortcut:
        # Centre tap == unpadded, stride-subsampled raw input -> 1x1 projection.
        acc_sc = jnp.dot(xc, wsc_ref[...], preferred_element_type=jnp.float32)

        @pl.when(b == 0)
        def _():
            sum_sc_ref[...] = jnp.zeros_like(sum_sc_ref)
            ssq_sc_ref[...] = jnp.zeros_like(ssq_sc_ref)

        sum_sc_ref[...] += jnp.sum(acc_sc, axis=0, keepdims=True)
        ssq_sc_ref[...] += jnp.sum(acc_sc * acc_sc, axis=0, keepdims=True)
        ysc_ref[...] = acc_sc.reshape(1, h_out, w_out, -1).astype(ysc_ref.dtype)


# ---------------------------------------------------------------------------
# Kernel 2: folded BN + optional residual (with its own folded BN) + ReLU.
#   Purely element-wise on a lane-dense (1, H, W*C) view; per-channel
#   scale/shift are pre-tiled to width W*C on the host.
# ---------------------------------------------------------------------------
def _affine_act_kernel(y_ref, scale_ref, shift_ref, *rest, relu, has_res):
    if has_res:
        res_ref, rscale_ref, rshift_ref, out_ref = rest
    else:
        (out_ref,) = rest

    out = y_ref[...].astype(jnp.float32) * scale_ref[...] + shift_ref[...]
    if has_res:
        out = out + (res_ref[...].astype(jnp.float32) * rscale_ref[...]
                     + rshift_ref[...])
    if relu:
        out = jnp.maximum(out, 0.0)
    out_ref[...] = out.astype(out_ref.dtype)


# ---------------------------------------------------------------------------
# Wrappers
# ---------------------------------------------------------------------------
def _cout_tile(cout, cin, itemsize):
    # Keep all Cout resident when the (9*Cin, Cout) weight tile comfortably
    # fits VMEM: the activation is then DMA'd once per batch element and the
    # MXU sees the full output width.  Otherwise fall back to 256/128 tiles.
    if cout <= 256 or 9 * cin * cout * itemsize <= (6 << 20):
        return cout
    for ct in (256, 128):
        if cout % ct == 0:
            return ct
    return cout


def conv3x3_stats(x_nhwc, w_hwio, *, stride=1, shortcut_w=None, in_scale=None,
                  in_shift=None, compute_dtype=None, raw_dtype=None):
    """Raw 3x3 conv (pad=1) + per-channel (sum, sumsq) BN statistics.

    Optionally (a) fuses a folded BN (scale/shift) + ReLU onto the input and
    (b) fuses the 1x1 projection-shortcut conv (same stride) of the *raw*
    input.  Returns (y, sum, ssq[, y_sc, sum_sc, ssq_sc]); stats are f32.
    """
    assert (in_scale is None) == (in_shift is None)
    assert not (shortcut_w is not None and in_scale is not None)

    n, h, w, cin = x_nhwc.shape
    cout = w_hwio.shape[-1]
    h_out = (h - 1) // stride + 1
    w_out = (w - 1) // stride + 1
    rows = h_out * w_out
    cdt = jnp.dtype(compute_dtype) if compute_dtype is not None else x_nhwc.dtype
    rdt = jnp.dtype(raw_dtype) if raw_dtype is not None else cdt

    apply_in = in_scale is not None
    fuse = shortcut_w is not None
    pad_in_kernel = _inkernel_pad_supported(cdt)
    fuse_k = (cin % 128 == 0) or _patch_scratch_store_supported(cdt)

    if pad_in_kernel:
        x_in = x_nhwc
        x_block = (1, h, w, cin)
    else:
        x_in = jnp.pad(x_nhwc, ((0, 0), (1, 1), (1, 1), (0, 0)))
        x_block = (1, h + 2, w + 2, cin)

    w2d = w_hwio.reshape(9 * cin, cout).astype(cdt)      # (di, dj, ci) -> rows

    ct = _cout_tile(cout, cin, cdt.itemsize)
    assert cout % ct == 0
    grid = (cout // ct, n)

    in_specs = [
        pl.BlockSpec(x_block, lambda c, b: (b, 0, 0, 0)),
        pl.BlockSpec((9 * cin, ct), lambda c, b: (0, c)),
    ]
    inputs = [x_in, w2d]
    if apply_in:
        in_specs.append(pl.BlockSpec((1, cin), lambda c, b: (0, 0)))
        in_specs.append(pl.BlockSpec((1, cin), lambda c, b: (0, 0)))
        inputs.append(in_scale.reshape(1, cin).astype(jnp.float32))
        inputs.append(in_shift.reshape(1, cin).astype(jnp.float32))
    if fuse:
        in_specs.append(pl.BlockSpec((cin, ct), lambda c, b: (0, c)))
        inputs.append(shortcut_w.astype(cdt))

    y_block = pl.BlockSpec((1, h_out, w_out, ct), lambda c, b: (b, 0, 0, c))
    st_block = pl.BlockSpec((1, ct), lambda c, b: (0, c))
    out_shapes = [
        jax.ShapeDtypeStruct((n, h_out, w_out, cout), rdt),
        jax.ShapeDtypeStruct((1, cout), jnp.float32),
        jax.ShapeDtypeStruct((1, cout), jnp.float32),
    ]
    out_specs = [y_block, st_block, st_block]
    if fuse:
        out_shapes += [
            jax.ShapeDtypeStruct((n, h_out, w_out, cout), rdt),
            jax.ShapeDtypeStruct((1, cout), jnp.float32),
            jax.ShapeDtypeStruct((1, cout), jnp.float32),
        ]
        out_specs += [y_block, st_block, st_block]

    scratch = [pltpu.VMEM((rows, 9 * cin), cdt)] if fuse_k else []

    kernel = functools.partial(
        _conv_bn_stats_kernel, stride=stride, h_out=h_out, w_out=w_out,
        cin=cin, apply_in_affine=apply_in, fuse_shortcut=fuse, fuse_k=fuse_k,
        pad_in_kernel=pad_in_kernel, compute_dtype=cdt)

    return pl.pallas_call(
        kernel,
        grid=grid,
        in_specs=in_specs,
        out_specs=tuple(out_specs),
        out_shape=tuple(out_shapes),
        scratch_shapes=scratch,
        compiler_params=pltpu.CompilerParams(
            dimension_semantics=("parallel", "arbitrary")),
    )(*inputs)


def bn_scale_shift(s, q, count, gamma, beta, eps=_BN_EPS):
    """Fold training-mode BN (batch stats, biased variance) into scale/shift."""
    mean = s[0] / count
    var = jnp.maximum(q[0] / count - mean * mean, 0.0)
    scale = gamma * lax.rsqrt(var + eps)
    shift = beta - mean * scale
    return scale, shift


def affine_act(y, scale, shift, *, residual=None, res_scale=None,
               res_shift=None, relu=True, out_dtype=None):
    """Element-wise folded BN (+ residual with its own folded BN) (+ ReLU)."""
    n, h, w, c = y.shape
    wc = w * c
    has_res = residual is not None
    out_dtype = out_dtype if out_dtype is not None else y.dtype

    def tile_c(v):   # per-channel (c,) -> lane-dense (1, w*c), host-side (tiny)
        return jnp.tile(v.astype(jnp.float32).reshape(1, c), (1, w))

    inputs = [y.reshape(n, h, wc), tile_c(scale), tile_c(shift)]
    in_specs = [
        pl.BlockSpec((1, h, wc), lambda b: (b, 0, 0)),
        pl.BlockSpec((1, wc), lambda b: (0, 0)),
        pl.BlockSpec((1, wc), lambda b: (0, 0)),
    ]
    if has_res:
        inputs += [residual.reshape(n, h, wc), tile_c(res_scale),
                   tile_c(res_shift)]
        in_specs += [
            pl.BlockSpec((1, h, wc), lambda b: (b, 0, 0)),
            pl.BlockSpec((1, wc), lambda b: (0, 0)),
            pl.BlockSpec((1, wc), lambda b: (0, 0)),
        ]

    kernel = functools.partial(_affine_act_kernel, relu=relu, has_res=has_res)
    out = pl.pallas_call(
        kernel,
        grid=(n,),
        in_specs=in_specs,
        out_specs=pl.BlockSpec((1, h, wc), lambda b: (b, 0, 0)),
        out_shape=jax.ShapeDtypeStruct((n, h, wc), out_dtype),
        compiler_params=pltpu.CompilerParams(
            dimension_semantics=("parallel",)),
    )(*inputs)
    return out.reshape(n, h, w, c)


# ---------------------------------------------------------------------------
# BasicBlock (expansion = 1)
# ---------------------------------------------------------------------------
class BasicBlockPallas:
    expansion = 1

    def __init__(self, in_planes, planes, stride=1, *, key,
                 compute_dtype=jnp.float32):
        k1, k2, k3, k4, k5, k6, k7 = jax.random.split(key, 7)
        self.w1 = jax.random.normal(k1, (3, 3, in_planes, planes), jnp.float32) \
            * (2.0 / (in_planes * 9)) ** 0.5
        self.g1 = 1.0 + 0.1 * jax.random.normal(k2, (planes,), jnp.float32)
        self.b1 = 0.1 * jax.random.normal(k3, (planes,), jnp.float32)
        self.w2 = jax.random.normal(k4, (3, 3, planes, planes), jnp.float32) \
            * (2.0 / (planes * 9)) ** 0.5
        self.g2 = 1.0 + 0.1 * jax.random.normal(k5, (planes,), jnp.float32)
        self.b2 = 0.1 * jax.random.normal(k6, (planes,), jnp.float32)
        self.stride = stride
        self.compute_dtype = jnp.dtype(compute_dtype)
        self.has_shortcut = (stride != 1) or (in_planes != self.expansion * planes)
        if self.has_shortcut:
            ks1, ks2, ks3 = jax.random.split(k7, 3)
            self.ws = jax.random.normal(ks1, (in_planes, planes), jnp.float32) \
                * (2.0 / in_planes) ** 0.5
            self.gs = 1.0 + 0.1 * jax.random.normal(ks2, (planes,), jnp.float32)
            self.bs = 0.1 * jax.random.normal(ks3, (planes,), jnp.float32)

    def forward_nhwc(self, x, *, out_dtype=None):
        """NHWC in / NHWC out — use this when chaining blocks (no transposes)."""
        n = x.shape[0]
        cdt = self.compute_dtype
        out_dtype = out_dtype if out_dtype is not None else x.dtype
        if cdt != x.dtype:
            x = x.astype(cdt)                     # single host-side cast

        # Stage 1: conv1 (+ fused 1x1 projection shortcut) with BN statistics.
        if self.has_shortcut:
            y1, s1, q1, ysc, ssc, qsc = conv3x3_stats(
                x, self.w1, stride=self.stride, shortcut_w=self.ws,
                compute_dtype=cdt)
        else:
            y1, s1, q1 = conv3x3_stats(
                x, self.w1, stride=self.stride, compute_dtype=cdt)
        count = n * y1.shape[1] * y1.shape[2]
        sc1, sh1 = bn_scale_shift(s1, q1, count, self.g1, self.b1)

        # Stage 2: conv2 with BN1+ReLU fused onto its input, + BN statistics.
        y2, s2, q2 = conv3x3_stats(
            y1, self.w2, stride=1, in_scale=sc1, in_shift=sh1,
            compute_dtype=cdt)
        sc2, sh2 = bn_scale_shift(s2, q2, count, self.g2, self.b2)

        # Stage 3: folded BN2 + (folded-BN shortcut | identity) + ReLU.
        if self.has_shortcut:
            scs, shs = bn_scale_shift(ssc, qsc, count, self.gs, self.bs)
            res = ysc
        else:
            planes = y2.shape[3]
            scs = jnp.ones((planes,), jnp.float32)
            shs = jnp.zeros((planes,), jnp.float32)
            res = x
        return affine_act(y2, sc2, sh2, residual=res, res_scale=scs,
                          res_shift=shs, relu=True, out_dtype=out_dtype)

    def __call__(self, x_nchw):
        # NCHW boundary kept for parity with the PyTorch module; stacked blocks
        # should call forward_nhwc directly to avoid per-block transposes.
        x = jnp.transpose(x_nchw, (0, 2, 3, 1))
        out = self.forward_nhwc(x, out_dtype=x_nchw.dtype)
        return jnp.transpose(out, (0, 3, 1, 2))


# ---------------------------------------------------------------------------
# Pure-JAX reference (correctness check)
# ---------------------------------------------------------------------------
def _ref_block(x_nchw, blk):
    x = jnp.transpose(x_nchw, (0, 2, 3, 1))

    def conv(inp, w, stride, pad):
        return lax.conv_general_dilated(
            inp, w, (stride, stride), pad,
            dimension_numbers=("NHWC", "HWIO", "NHWC"),
            precision=lax.Precision.HIGHEST)

    def bn(y, g, b):
        mean = jnp.mean(y, axis=(0, 1, 2), keepdims=True)
        var = jnp.mean((y - mean) ** 2, axis=(0, 1, 2), keepdims=True)
        return (y - mean) * lax.rsqrt(var + _BN_EPS) * g + b

    out = jax.nn.relu(bn(conv(x, blk.w1, blk.stride, ((1, 1), (1, 1))),
                         blk.g1, blk.b1))
    out = bn(conv(out, blk.w2, 1, ((1, 1), (1, 1))), blk.g2, blk.b2)
    if blk.has_shortcut:
        res = bn(conv(x, blk.ws.reshape(1, 1, *blk.ws.shape), blk.stride,
                      ((0, 0), (0, 0))), blk.gs, blk.bs)
    else:
        res = x
    out = jax.nn.relu(out + res)
    return jnp.transpose(out, (0, 3, 1, 2))


if __name__ == "__main__":
    key = jax.random.PRNGKey(0)
    kx, kp, kx2, kp2, kp3 = jax.random.split(key, 5)

    # 1) Projection-shortcut block (in_planes != planes), stride 1.
    x = jax.random.normal(kx, (2, 4, 16, 16), jnp.float32)       # NCHW
    blk = BasicBlockPallas(in_planes=4, planes=8, stride=1, key=kp)
    out = jax.block_until_ready(blk(x))
    assert out.shape == (2, 8, 16, 16), out.shape
    ref = _ref_block(x, blk)
    assert jnp.allclose(out, ref, atol=2e-2, rtol=2e-2), \
        float(jnp.max(jnp.abs(out - ref)))

    # 2) Strided block with projection shortcut (stride = 2).
    x2 = jax.random.normal(kx2, (2, 8, 16, 16), jnp.float32)
    blk2 = BasicBlockPallas(in_planes=8, planes=8, stride=2, key=kp2)
    out2 = jax.block_until_ready(blk2(x2))
    assert out2.shape == (2, 8, 8, 8), out2.shape
    ref2 = _ref_block(x2, blk2)
    assert jnp.allclose(out2, ref2, atol=2e-2, rtol=2e-2), \
        float(jnp.max(jnp.abs(out2 - ref2)))

    # 3) Identity-shortcut block (in_planes == planes, stride 1).
    blk3 = BasicBlockPallas(in_planes=8, planes=8, stride=1, key=kp3)
    out3 = jax.block_until_ready(blk3(x2))
    assert out3.shape == (2, 8, 16, 16), out3.shape
    ref3 = _ref_block(x2, blk3)
    assert jnp.allclose(out3, ref3, atol=2e-2, rtol=2e-2), \
        float(jnp.max(jnp.abs(out3 - ref3)))

    # 4) bf16 MXU-feeding path (f32 stats / accumulation): tolerance check
    #    against the f32 reference (same parameters as block 1).
    blk_bf16 = BasicBlockPallas(in_planes=4, planes=8, stride=1, key=kp,
                                compute_dtype=jnp.bfloat16)
    out_bf16 = jax.block_until_ready(blk_bf16(x))
    assert out_bf16.shape == (2, 8, 16, 16)
    assert bool(jnp.all(jnp.isfinite(out_bf16)))
    max_err = float(jnp.max(jnp.abs(out_bf16.astype(jnp.float32) - ref)))
    assert max_err < 0.3, max_err

    print("KERNEL_OK")
</pallas_src>

<mosaic_0001>
module attributes {stable_mosaic.version = 11 : i64} {
  func.func @k(%arg0: memref<1x6x6x4xf32, #tpu.memory_space<vmem>>, %arg1: memref<1x8x8x4xf32, #tpu.memory_space<vmem>>) attributes {dimension_semantics = [], scalar_prefetch = 0 : i64, scratch_operands = 0 : i64, tpu.core_type = #tpu.core_type<tc>} {
    %c0 = arith.constant 0 : index
    %c0_0 = arith.constant 0 : index
    %c0_1 = arith.constant 0 : index
    %c0_2 = arith.constant 0 : index
    %0 = vector.load %arg0[%c0, %c0_0, %c0_1, %c0_2] : memref<1x6x6x4xf32, #tpu.memory_space<vmem>>, vector<1x6x6x4xf32>
    %cst = arith.constant 0.000000e+00 : f32
    %1 = vector.broadcast %cst : f32 to vector<1x1x6x4xf32>
    %2 = tpu.concatenate %1, %0, %1 in 1 : vector<1x1x6x4xf32>, vector<1x6x6x4xf32>, vector<1x1x6x4xf32> -> vector<1x8x6x4xf32>
    %cst_3 = arith.constant 0.000000e+00 : f32
    %3 = vector.broadcast %cst_3 : f32 to vector<1x8x1x4xf32>
    %4 = tpu.concatenate %3, %2, %3 in 2 : vector<1x8x1x4xf32>, vector<1x8x6x4xf32>, vector<1x8x1x4xf32> -> vector<1x8x8x4xf32>
    %c0_4 = arith.constant 0 : index
    %c0_5 = arith.constant 0 : index
    %c0_6 = arith.constant 0 : index
    %c0_7 = arith.constant 0 : index
    %5 = vector.load %arg1[%c0_4, %c0_5, %c0_6, %c0_7] : memref<1x8x8x4xf32, #tpu.memory_space<vmem>>, vector<1x8x8x4xf32>
    tpu.vector_store %arg1[%c0_4, %c0_5, %c0_6, %c0_7], %4 {strides = array<i32>} : memref<1x8x8x4xf32, #tpu.memory_space<vmem>>, vector<1x8x8x4xf32>,
    return
  }
}

module attributes {stable_mosaic.version = 11 : i64} {
  func.func @k(%arg0: memref<8x4xf32, #tpu.memory_space<vmem>>, %arg1: memref<8x12xf32, #tpu.memory_space<vmem>>, %arg2: memref<8x12xf32, #tpu.memory_space<vmem>>) attributes {dimension_semantics = [], scalar_prefetch = 0 : i64, scratch_operands = 1 : i64, tpu.core_type = #tpu.core_type<tc>} {
    %c0 = arith.constant 0 : index
    %c0_0 = arith.constant 0 : index
    %0 = vector.load %arg0[%c0, %c0_0] : memref<8x4xf32, #tpu.memory_space<vmem>>, vector<8x4xf32>
    %c0_1 = arith.constant 0 : index
    %c0_2 = arith.constant 0 : index
    %1 = vector.load %arg2[%c0_1, %c0_2] : memref<8x12xf32, #tpu.memory_space<vmem>>, vector<8x4xf32>
    tpu.vector_store %arg2[%c0_1, %c0_2], %0 {strides = array<i32>} : memref<8x12xf32, #tpu.memory_space<vmem>>, vector<8x4xf32>,
    %c0_3 = arith.constant 0 : index
    %c0_4 = arith.constant 0 : index
    %2 = vector.load %arg0[%c0_3, %c0_4] : memref<8x4xf32, #tpu.memory_space<vmem>>, vector<8x4xf32>
    %c0_5 = arith.constant 0 : index
    %c4 = arith.constant 4 : index
    %3 = vector.load %arg2[%c0_5, %c4] : memref<8x12xf32, #tpu.memory_space<vmem>>, vector<8x4xf32>
    tpu.vector_store %arg2[%c0_5, %c4], %2 {strides = array<i32>} : memref<8x12xf32, #tpu.memory_space<vmem>>, vector<8x4xf32>,
    %c0_6 = arith.constant 0 : index
    %c0_7 = arith.constant 0 : index
    %4 = vector.load %arg0[%c0_6, %c0_7] : memref<8x4xf32, #tpu.memory_space<vmem>>, vector<8x4xf32>
    %c0_8 = arith.constant 0 : index
    %c8 = arith.constant 8 : index
    %5 = vector.load %arg2[%c0_8, %c8] : memref<8x12xf32, #tpu.memory_space<vmem>>, vector<8x4xf32>
    tpu.vector_store %arg2[%c0_8, %c8], %4 {strides = array<i32>} : memref<8x12xf32, #tpu.memory_space<vmem>>, vector<8x4xf32>,
    %c0_9 = arith.constant 0 : index
    %c0_10 = arith.constant 0 : index
    %6 = vector.load %arg2[%c0_9, %c0_10] : memref<8x12xf32, #tpu.memory_space<vmem>>, vector<8x12xf32>
    %c0_11 = arith.constant 0 : index
    %c0_12 = arith.constant 0 : index
    %7 = vector.load %arg1[%c0_11, %c0_12] : memref<8x12xf32, #tpu.memory_space<vmem>>, vector<8x12xf32>
    tpu.vector_store %arg1[%c0_11, %c0_12], %6 {strides = array<i32>} : memref<8x12xf32, #tpu.memory_space<vmem>>, vector<8x12xf32>,
    return
  }
}

module attributes {stable_mosaic.version = 11 : i64} {
  func.func @_conv_bn_stats_kernel(%arg0: i32, %arg1: i32, %arg2: memref<1x18x18x4xf32, #tpu.memory_space<vmem>>, %arg3: memref<36x8xf32, #tpu.memory_space<vmem>>, %arg4: memref<4x8xf32, #tpu.memory_space<vmem>>, %arg5: memref<1x16x16x8xf32, #tpu.memory_space<vmem>>, %arg6: memref<1x8xf32, #tpu.memory_space<vmem>>, %arg7: memref<1x8xf32, #tpu.memory_space<vmem>>, %arg8: memref<1x16x16x8xf32, #tpu.memory_space<vmem>>, %arg9: memref<1x8xf32, #tpu.memory_space<vmem>>, %arg10: memref<1x8xf32, #tpu.memory_space<vmem>>) attributes {dimension_semantics = [#tpu.dimension_semantics<parallel>, #tpu.dimension_semantics<arbitrary>], iteration_bounds = array<i64: 1, 2>, scalar_prefetch = 0 : i64, scratch_operands = 0 : i64, tpu.core_type = #tpu.core_type<tc>, window_params = [{transform_indices = @transform_0, window_bounds = array<i64: 1, 18, 18, 4>}, {transform_indices = @transform_1, window_bounds = array<i64: 36, 8>}, {transform_indices = @transform_2, window_bounds = array<i64: 4, 8>}, {transform_indices = @transform_3, window_bounds = array<i64: 1, 16, 16, 8>}, {transform_indices = @transform_4, window_bounds = array<i64: 1, 8>}, {transform_indices = @transform_5, window_bounds = array<i64: 1, 8>}, {transform_indices = @transform_6, window_bounds = array<i64: 1, 16, 16, 8>}, {transform_indices = @transform_7, window_bounds = array<i64: 1, 8>}, {transform_indices = @transform_8, window_bounds = array<i64: 1, 8>}]} {
    %c0 = arith.constant 0 : index
    %c0_0 = arith.constant 0 : index
    %c0_1 = arith.constant 0 : index
    %c0_2 = arith.constant 0 : index
    %0 = vector.load %arg2[%c0, %c0_0, %c0_1, %c0_2] : memref<1x18x18x4xf32, #tpu.memory_space<vmem>>, vector<1x18x18x4xf32>
    %c0_3 = arith.constant 0 : index
    %c0_4 = arith.constant 0 : index
    %1 = vector.load %arg3[%c0_3, %c0_4] : memref<36x8xf32, #tpu.memory_space<vmem>>, vector<36x8xf32>
    %cst = arith.constant 0.000000e+00 : f32
    %2 = vector.broadcast %cst : f32 to vector<256x8xf32>
    %3 = vector.extract_strided_slice %0 {offsets = [0, 0, 0, 0], sizes = [1, 16, 16, 4], strides = [1, 1, 1, 1]} : vector<1x18x18x4xf32> to vector<1x16x16x4xf32>
    %4 = vector.shape_cast %3 : vector<1x16x16x4xf32> to vector<256x4xf32>
    %5 = vector.extract_strided_slice %1 {offsets = [0, 0], sizes = [4, 8], strides = [1, 1]} : vector<36x8xf32> to vector<4x8xf32>
    %cst_5 = arith.constant dense<0.000000e+00> : vector<256x8xf32>
    %6 = tpu.matmul %4, %5, %cst_5 {dimension_numbers = #tpu.dot_dimension_numbers<[1], [0], [0], [1], [0, 0, 1, 1], [], []>} : vector<256x4xf32>, vector<4x8xf32>, vector<256x8xf32> -> vector<256x8xf32>
    %7 = arith.addf %2, %6 : vector<256x8xf32>
    %8 = vector.extract_strided_slice %0 {offsets = [0, 0, 1, 0], sizes = [1, 16, 16, 4], strides = [1, 1, 1, 1]} : vector<1x18x18x4xf32> to vector<1x16x16x4xf32>
    %9 = vector.shape_cast %8 : vector<1x16x16x4xf32> to vector<256x4xf32>
    %10 = vector.extract_strided_slice %1 {offsets = [4, 0], sizes = [4, 8], strides = [1, 1]} : vector<36x8xf32> to vector<4x8xf32>
    %cst_6 = arith.constant dense<0.000000e+00> : vector<256x8xf32>
    %11 = tpu.matmul %9, %10, %cst_6 {dimension_numbers = #tpu.dot_dimension_numbers<[1], [0], [0], [1], [0, 0, 1, 1], [], []>} : vector<256x4xf32>, vector<4x8xf32>, vector<256x8xf32> -> vector<256x8xf32>
    %12 = arith.addf %7, %11 : vector<256x8xf32>
    %13 = vector.extract_strided_slice %0 {offsets = [0, 0, 2, 0], sizes = [1, 16, 16, 4], strides = [1, 1, 1, 1]} : vector<1x18x18x4xf32> to vector<1x16x16x4xf32>
    %14 = vector.shape_cast %13 : vector<1x16x16x4xf32> to vector<256x4xf32>
    %15 = vector.extract_strided_slice %1 {offsets = [8, 0], sizes = [4, 8], strides = [1, 1]} : vector<36x8xf32> to vector<4x8xf32>
    %cst_7 = arith.constant dense<0.000000e+00> : vector<256x8xf32>
    %16 = tpu.matmul %14, %15, %cst_7 {dimension_numbers = #tpu.dot_dimension_numbers<[1], [0], [0], [1], [0, 0, 1, 1], [], []>} : vector<256x4xf32>, vector<4x8xf32>, vector<256x8xf32> -> vector<256x8xf32>
    %17 = arith.addf %12, %16 : vector<256x8xf32>
    %18 = vector.extract_strided_slice %0 {offsets = [0, 1, 0, 0], sizes = [1, 16, 16, 4], strides = [1, 1, 1, 1]} : vector<1x18x18x4xf32> to vector<1x16x16x4xf32>
    %19 = vector.shape_cast %18 : vector<1x16x16x4xf32> to vector<256x4xf32>
    %20 = vector.extract_strided_slice %1 {offsets = [12, 0], sizes = [4, 8], strides = [1, 1]} : vector<36x8xf32> to vector<4x8xf32>
    %cst_8 = arith.constant dense<0.000000e+00> : vector<256x8xf32>
    %21 = tpu.matmul %19, %20, %cst_8 {dimension_numbers = #tpu.dot_dimension_numbers<[1], [0], [0], [1], [0, 0, 1, 1], [], []>} : vector<256x4xf32>, vector<4x8xf32>, vector<256x8xf32> -> vector<256x8xf32>
    %22 = arith.addf %17, %21 : vector<256x8xf32>
    %23 = vector.extract_strided_slice %0 {offsets = [0, 1, 1, 0], sizes = [1, 16, 16, 4], strides = [1, 1, 1, 1]} : vector<1x18x18x4xf32> to vector<1x16x16x4xf32>
    %24 = vector.shape_cast %23 : vector<1x16x16x4xf32> to vector<256x4xf32>
    %25 = vector.extract_strided_slice %1 {offsets = [16, 0], sizes = [4, 8], strides = [1, 1]} : vector<36x8xf32> to vector<4x8xf32>
    %cst_9 = arith.constant dense<0.000000e+00> : vector<256x8xf32>
    %26 = tpu.matmul %24, %25, %cst_9 {dimension_numbers = #tpu.dot_dimension_numbers<[1], [0], [0], [1], [0, 0, 1, 1], [], []>} : vector<256x4xf32>, vector<4x8xf32>, vector<256x8xf32> -> vector<256x8xf32>
    %27 = arith.addf %22, %26 : vector<256x8xf32>
    %28 = vector.extract_strided_slice %0 {offsets = [0, 1, 2, 0], sizes = [1, 16, 16, 4], strides = [1, 1, 1, 1]} : vector<1x18x18x4xf32> to vector<1x16x16x4xf32>
    %29 = vector.shape_cast %28 : vector<1x16x16x4xf32> to vector<256x4xf32>
    %30 = vector.extract_strided_slice %1 {offsets = [20, 0], sizes = [4, 8], strides = [1, 1]} : vector<36x8xf32> to vector<4x8xf32>
    %cst_10 = arith.constant dense<0.000000e+00> : vector<256x8xf32>
    %31 = tpu.matmul %29, %30, %cst_10 {dimension_numbers = #tpu.dot_dimension_numbers<[1], [0], [0], [1], [0, 0, 1, 1], [], []>} : vector<256x4xf32>, vector<4x8xf32>, vector<256x8xf32> -> vector<256x8xf32>
    %32 = arith.addf %27, %31 : vector<256x8xf32>
    %33 = vector.extract_strided_slice %0 {offsets = [0, 2, 0, 0], sizes = [1, 16, 16, 4], strides = [1, 1, 1, 1]} : vector<1x18x18x4xf32> to vector<1x16x16x4xf32>
    %34 = vector.shape_cast %33 : vector<1x16x16x4xf32> to vector<256x4xf32>
    %35 = vector.extract_strided_slice %1 {offsets = [24, 0], sizes = [4, 8], strides = [1, 1]} : vector<36x8xf32> to vector<4x8xf32>
    %cst_11 = arith.constant dense<0.000000e+00> : vector<256x8xf32>
    %36 = tpu.matmul %34, %35, %cst_11 {dimension_numbers = #tpu.dot_dimension_numbers<[1], [0], [0], [1], [0, 0, 1, 1], [], []>} : vector<256x4xf32>, vector<4x8xf32>, vector<256x8xf32> -> vector<256x8xf32>
    %37 = arith.addf %32, %36 : vector<256x8xf32>
    %38 = vector.extract_strided_slice %0 {offsets = [0, 2, 1, 0], sizes = [1, 16, 16, 4], strides = [1, 1, 1, 1]} : vector<1x18x18x4xf32> to vector<1x16x16x4xf32>
    %39 = vector.shape_cast %38 : vector<1x16x16x4xf32> to vector<256x4xf32>
    %40 = vector.extract_strided_slice %1 {offsets = [28, 0], sizes = [4, 8], strides = [1, 1]} : vector<36x8xf32> to vector<4x8xf32>
    %cst_12 = arith.constant dense<0.000000e+00> : vector<256x8xf32>
    %41 = tpu.matmul %39, %40, %cst_12 {dimension_numbers = #tpu.dot_dimension_numbers<[1], [0], [0], [1], [0, 0, 1, 1], [], []>} : vector<256x4xf32>, vector<4x8xf32>, vector<256x8xf32> -> vector<256x8xf32>
    %42 = arith.addf %37, %41 : vector<256x8xf32>
    %43 = vector.extract_strided_slice %0 {offsets = [0, 2, 2, 0], sizes = [1, 16, 16, 4], strides = [1, 1, 1, 1]} : vector<1x18x18x4xf32> to vector<1x16x16x4xf32>
    %44 = vector.shape_cast %43 : vector<1x16x16x4xf32> to vector<256x4xf32>
    %45 = vector.extract_strided_slice %1 {offsets = [32, 0], sizes = [4, 8], strides = [1, 1]} : vector<36x8xf32> to vector<4x8xf32>
    %cst_13 = arith.constant dense<0.000000e+00> : vector<256x8xf32>
    %46 = tpu.matmul %44, %45, %cst_13 {dimension_numbers = #tpu.dot_dimension_numbers<[1], [0], [0], [1], [0, 0, 1, 1], [], []>} : vector<256x4xf32>, vector<4x8xf32>, vector<256x8xf32> -> vector<256x8xf32>
    %47 = arith.addf %42, %46 : vector<256x8xf32>
    %c0_i32 = arith.constant 0 : i32
    %48 = arith.cmpi eq, %arg1, %c0_i32 : i32
    %49 = arith.extui %48 : i1 to i32
    %c0_i32_14 = arith.constant 0 : i32
    %50 = arith.cmpi ne, %49, %c0_i32_14 : i32
    scf.if %50 {
      %cst_48 = arith.constant 0.000000e+00 : f32
      %82 = vector.broadcast %cst_48 : f32 to vector<1x8xf32>
      %c0_49 = arith.constant 0 : index
      %c0_50 = arith.constant 0 : index
      %83 = vector.load %arg6[%c0_49, %c0_50] : memref<1x8xf32, #tpu.memory_space<vmem>>, vector<1x8xf32>
      tpu.vector_store %arg6[%c0_49, %c0_50], %82 {strides = array<i32>} : memref<1x8xf32, #tpu.memory_space<vmem>>, vector<1x8xf32>,
      %cst_51 = arith.constant 0.000000e+00 : f32
      %84 = vector.broadcast %cst_51 : f32 to vector<1x8xf32>
      %c0_52 = arith.constant 0 : index
      %c0_53 = arith.constant 0 : index
      %85 = vector.load %arg7[%c0_52, %c0_53] : memref<1x8xf32, #tpu.memory_space<vmem>>, vector<1x8xf32>
      tpu.vector_store %arg7[%c0_52, %c0_53], %84 {strides = array<i32>} : memref<1x8xf32, #tpu.memory_space<vmem>>, vector<1x8xf32>,
    } else {
    }
    %c0_15 = arith.constant 0 : index
    %c0_16 = arith.constant 0 : index
    %51 = vector.load %arg6[%c0_15, %c0_16] : memref<1x8xf32, #tpu.memory_space<vmem>>, vector<1x8xf32>
    %cst_17 = arith.constant dense<0.000000e+00> : vector<8xf32>
    %52 = vector.multi_reduction <add>, %47, %cst_17 [0] : vector<256x8xf32> to vector<8xf32>
    %53 = vector.shape_cast %52 : vector<8xf32> to vector<1x8xf32>
    %54 = arith.addf %51, %53 : vector<1x8xf32>
    %c0_18 = arith.constant 0 : index
    %c0_19 = arith.constant 0 : index
    %55 = vector.load %arg6[%c0_18, %c0_19] : memref<1x8xf32, #tpu.memory_space<vmem>>, vector<1x8xf32>
    tpu.vector_store %arg6[%c0_18, %c0_19], %54 {strides = array<i32>} : memref<1x8xf32, #tpu.memory_space<vmem>>, vector<1x8xf32>,
    %c0_20 = arith.constant 0 : index
    %c0_21 = arith.constant 0 : index
    %56 = vector.load %arg7[%c0_20, %c0_21] : memref<1x8xf32, #tpu.memory_space<vmem>>, vector<1x8xf32>
    %57 = arith.mulf %47, %47 : vector<256x8xf32>
    %cst_22 = arith.constant dense<0.000000e+00> : vector<8xf32>
    %58 = vector.multi_reduction <add>, %57, %cst_22 [0] : vector<256x8xf32> to vector<8xf32>
    %59 = vector.shape_cast %58 : vector<8xf32> to vector<1x8xf32>
    %60 = arith.addf %56, %59 : vector<1x8xf32>
    %c0_23 = arith.constant 0 : index
    %c0_24 = arith.constant 0 : index
    %61 = vector.load %arg7[%c0_23, %c0_24] : memref<1x8xf32, #tpu.memory_space<vmem>>, vector<1x8xf32>
    tpu.vector_store %arg7[%c0_23, %c0_24], %60 {strides = array<i32>} : memref<1x8xf32, #tpu.memory_space<vmem>>, vector<1x8xf32>,
    %62 = vector.shape_cast %47 : vector<256x8xf32> to vector<1x16x16x8xf32>
    %c0_25 = arith.constant 0 : index
    %c0_26 = arith.constant 0 : index
    %c0_27 = arith.constant 0 : index
    %c0_28 = arith.constant 0 : index
    %63 = vector.load %arg5[%c0_25, %c0_26, %c0_27, %c0_28] : memref<1x16x16x8xf32, #tpu.memory_space<vmem>>, vector<1x16x16x8xf32>
    tpu.vector_store %arg5[%c0_25, %c0_26, %c0_27, %c0_28], %62 {strides = array<i32>} : memref<1x16x16x8xf32, #tpu.memory_space<vmem>>, vector<1x16x16x8xf32>,
    %c0_29 = arith.constant 0 : index
    %c0_30 = arith.constant 0 : index
    %64 = vector.load %arg4[%c0_29, %c0_30] : memref<4x8xf32, #tpu.memory_space<vmem>>, vector<4x8xf32>
    %cst_31 = arith.constant dense<0.000000e+00> : vector<256x8xf32>
    %65 = tpu.matmul %24, %64, %cst_31 {dimension_numbers = #tpu.dot_dimension_numbers<[1], [0], [0], [1], [0, 0, 1, 1], [], []>} : vector<256x4xf32>, vector<4x8xf32>, vector<256x8xf32> -> vector<256x8xf32>
    %c0_i32_32 = arith.constant 0 : i32
    %66 = arith.cmpi eq, %arg1, %c0_i32_32 : i32
    %67 = arith.extui %66 : i1 to i32
    %c0_i32_33 = arith.constant 0 : i32
    %68 = arith.cmpi ne, %67, %c0_i32_33 : i32
    scf.if %68 {
      %cst_48 = arith.constant 0.000000e+00 : f32
      %82 = vector.broadcast %cst_48 : f32 to vector<1x8xf32>
      %c0_49 = arith.constant 0 : index
      %c0_50 = arith.constant 0 : index
      %83 = vector.load %arg9[%c0_49, %c0_50] : memref<1x8xf32, #tpu.memory_space<vmem>>, vector<1x8xf32>
      tpu.vector_store %arg9[%c0_49, %c0_50], %82 {strides = array<i32>} : memref<1x8xf32, #tpu.memory_space<vmem>>, vector<1x8xf32>,
      %cst_51 = arith.constant 0.000000e+00 : f32
      %84 = vector.broadcast %cst_51 : f32 to vector<1x8xf32>
      %c0_52 = arith.constant 0 : index
      %c0_53 = arith.constant 0 : index
      %85 = vector.load %arg10[%c0_52, %c0_53] : memref<1x8xf32, #tpu.memory_space<vmem>>, vector<1x8xf32>
      tpu.vector_store %arg10[%c0_52, %c0_53], %84 {strides = array<i32>} : memref<1x8xf32, #tpu.memory_space<vmem>>, vector<1x8xf32>,
    } else {
    }
    %c0_34 = arith.constant 0 : index
    %c0_35 = arith.constant 0 : index
    %69 = vector.load %arg9[%c0_34, %c0_35] : memref<1x8xf32, #tpu.memory_space<vmem>>, vector<1x8xf32>
    %cst_36 = arith.constant dense<0.000000e+00> : vector<8xf32>
    %70 = vector.multi_reduction <add>, %65, %cst_36 [0] : vector<256x8xf32> to vector<8xf32>
    %71 = vector.shape_cast %70 : vector<8xf32> to vector<1x8xf32>
    %72 = arith.addf %69, %71 : vector<1x8xf32>
    %c0_37 = arith.constant 0 : index
    %c0_38 = arith.constant 0 : index
    %73 = vector.load %arg9[%c0_37, %c0_38] : memref<1x8xf32, #tpu.memory_space<vmem>>, vector<1x8xf32>
    tpu.vector_store %arg9[%c0_37, %c0_38], %72 {strides = array<i32>} : memref<1x8xf32, #tpu.memory_space<vmem>>, vector<1x8xf32>,
    %c0_39 = arith.constant 0 : index
    %c0_40 = arith.constant 0 : index
    %74 = vector.load %arg10[%c0_39, %c0_40] : memref<1x8xf32, #tpu.memory_space<vmem>>, vector<1x8xf32>
    %75 = arith.mulf %65, %65 : vector<256x8xf32>
    %cst_41 = arith.constant dense<0.000000e+00> : vector<8xf32>
    %76 = vector.multi_reduction <add>, %75, %cst_41 [0] : vector<256x8xf32> to vector<8xf32>
    %77 = vector.shape_cast %76 : vector<8xf32> to vector<1x8xf32>
    %78 = arith.addf %74, %77 : vector<1x8xf32>
    %c0_42 = arith.constant 0 : index
    %c0_43 = arith.constant 0 : index
    %79 = vector.load %arg10[%c0_42, %c0_43] : memref<1x8xf32, #tpu.memory_space<vmem>>, vector<1x8xf32>
    tpu.vector_store %arg10[%c0_42, %c0_43], %78 {strides = array<i32>} : memref<1x8xf32, #tpu.memory_space<vmem>>, vector<1x8xf32>,
    %80 = vector.shape_cast %65 : vector<256x8xf32> to vector<1x16x16x8xf32>
    %c0_44 = arith.constant 0 : index
    %c0_45 = arith.constant 0 : index
    %c0_46 = arith.constant 0 : index
    %c0_47 = arith.constant 0 : index
    %81 = vector.load %arg8[%c0_44, %c0_45, %c0_46, %c0_47] : memref<1x16x16x8xf32, #tpu.memory_space<vmem>>, vector<1x16x16x8xf32>
    tpu.vector_store %arg8[%c0_44, %c0_45, %c0_46, %c0_47], %80 {strides = array<i32>} : memref<1x16x16x8xf32, #tpu.memory_space<vmem>>, vector<1x16x16x8xf32>,
    return
  }
  func.func @transform_0(%arg0: i32, %arg1: i32) -> (i32, i32, i32, i32) {
    %c0_i32 = arith.constant 0 : i32
    %c0_i32_0 = arith.constant 0 : i32
    %c0_i32_1 = arith.constant 0 : i32
    %c0_i32_2 = arith.constant 0 : i32
    return %arg1, %c0_i32, %c0_i32_0, %c0_i32_1 : i32, i32, i32, i32
  }
  func.func @transform_1(%arg0: i32, %arg1: i32) -> (i32, i32) {
    %c0_i32 = arith.constant 0 : i32
    %c0_i32_0 = arith.constant 0 : i32
    return %c0_i32, %arg0 : i32, i32
  }
  func.func @transform_2(%arg0: i32, %arg1: i32) -> (i32, i32) {
    %c0_i32 = arith.constant 0 : i32
    %c0_i32_0 = arith.constant 0 : i32
    return %c0_i32, %arg0 : i32, i32
  }
  func.func @transform_3(%arg0: i32, %arg1: i32) -> (i32, i32, i32, i32) {
    %c0_i32 = arith.constant 0 : i32
    %c0_i32_0 = arith.constant 0 : i32
    %c0_i32_1 = arith.constant 0 : i32
    return %arg1, %c0_i32, %c0_i32_0, %arg0 : i32, i32, i32, i32
  }
  func.func @transform_4(%arg0: i32, %arg1: i32) -> (i32, i32) {
    %c0_i32 = arith.constant 0 : i32
    %c0_i32_0 = arith.constant 0 : i32
    return %c0_i32, %arg0 : i32, i32
  }
  func.func @transform_5(%arg0: i32, %arg1: i32) -> (i32, i32) {
    %c0_i32 = arith.constant 0 : i32
    %c0_i32_0 = arith.constant 0 : i32
    return %c0_i32, %arg0 : i32, i32
  }
  func.func @transform_6(%arg0: i32, %arg1: i32) -> (i32, i32, i32, i32) {
    %c0_i32 = arith.constant 0 : i32
    %c0_i32_0 = arith.constant 0 : i32
    %c0_i32_1 = arith.constant 0 : i32
    return %arg1, %c0_i32, %c0_i32_0, %arg0 : i32, i32, i32, i32
  }
  func.func @transform_7(%arg0: i32, %arg1: i32) -> (i32, i32) {
    %c0_i32 = arith.constant 0 : i32
    %c0_i32_0 = arith.constant 0 : i32
    return %c0_i32, %arg0 : i32, i32
  }
  func.func @transform_8(%arg0: i32, %arg1: i32) -> (i32, i32) {
    %c0_i32 = arith.constant 0 : i32
    %c0_i32_0 = arith.constant 0 : i32
    return %c0_i32, %arg0 : i32, i32
  }
}

</mosaic_0001>

<bundles_post_ra>
// kernel: tpu_custom_call.1
= control target key start
LH: loop header
LB: loop body
LE: loop exit
PB: predicated region body
PF: predicated region fallthrough
CT: control target
= control target key end

     0   :  { %vm35_vm0 = vcmask 1040384   ;;  %vm43_vm1 = vcmask 1046528   ;;  %v65_v0 = vmov 0.0   ;;  %vm51_vm2 = vcmask 31744   ;;  %s140_s0 = inlined_call_operand.vmem [shape: f32[1,6,6,4], index: 0, kind: input, shape index: {}]   ;;  %s141_s1 = inlined_call_operand.vmem [shape: f32[1,8,8,4], index: 1, kind: output, shape index: {}]  }
   0x1   :  { %v21_v1 = vrot.slane %v65_v0, 7  ;;  %v8_v2 = vld [vmem:[%s140_s0] sm:$0x3f]  ;;  %v9_v3 = vld [vmem:[%s140_s0 + $0x8] sm:$0x3f] }
   0x2   :  { %v22_v4 = vrot.slane %v8_v2, 7  ;;  %v23_v5 = vrot.slane %v9_v3, 7  ;;  %v10_v6 = vld [vmem:[%s140_s0 + $0x10] sm:$0x3f]  ;;  %v11_v7 = vld [vmem:[%s140_s0 + $0x18] sm:$0x3f] }
   0x3   :  { %v36_v8 = vsel %vm35_vm0, 0.0, %v21_v1  ;;  %v24_v9 = vrot.slane %v10_v6, 7  ;;  %v25_v10 = vrot.slane %v11_v7, 7  ;;  %v12_v11 = vld [vmem:[%s140_s0 + $0x20] sm:$0x3f] }
   0x4   :  { %v44_v12 = vsel %vm43_vm1, %v36_v8, 0.0  ;;  %v37_v13 = vsel %vm35_vm0, 0.0, %v22_v4  ;;  %v38_v14 = vsel %vm35_vm0, 0.0, %v23_v5  ;;  %v26_v15 = vrot.slane %v12_v11, 7  ;;  %v13_v16 = vld [vmem:[%s140_s0 + $0x28] sm:$0x3f] }
   0x5   :  { %52 = vst.msk [vmem:[%s141_s1] sm:$0xff] %vm51_vm2, %v44_v12  ;;  %59 = vst.msk [vmem:[%s141_s1 + $0x38] sm:$0xff] %vm51_vm2, %v44_v12  ;;  %v45_v17 = vsel %vm43_vm1, %v37_v13, 0.0  ;;  %v46_v18 = vsel %vm43_vm1, %v38_v14, 0.0  ;;  %v39_v19 = vsel %vm35_vm0, 0.0, %v24_v9  ;;  %v40_v20 = vsel %vm35_vm0, 0.0, %v25_v10 }
   0x6   :  { %53 = vst.msk [vmem:[%s141_s1 + $0x8] sm:$0xff] %vm51_vm2, %v45_v17  ;;  %54 = vst.msk [vmem:[%s141_s1 + $0x10] sm:$0xff] %vm51_vm2, %v46_v18  ;;  %v47_v21 = vsel %vm43_vm1, %v39_v19, 0.0  ;;  %v48_v22 = vsel %vm43_vm1, %v40_v20, 0.0  ;;  %v41_v23 = vsel %vm35_vm0, 0.0, %v26_v15  ;;  %v27_v24 = vrot.slane %v13_v16, 7 }
   0x7   :  { %55 = vst.msk [vmem:[%s141_s1 + $0x18] sm:$0xff] %vm51_vm2, %v47_v21  ;;  %56 = vst.msk [vmem:[%s141_s1 + $0x20] sm:$0xff] %vm51_vm2, %v48_v22  ;;  %v49_v25 = vsel %vm43_vm1, %v41_v23, 0.0 }
   0x8   :  { %57 = vst.msk [vmem:[%s141_s1 + $0x28] sm:$0xff] %vm51_vm2, %v49_v25  ;;  %v42_v26 = vsel %vm35_vm0, 0.0, %v27_v24 }
   0x9   :  { %v50_v27 = vsel %vm43_vm1, %v42_v26, 0.0 }
   0xa   :  { %58 = vst.msk [vmem:[%s141_s1 + $0x30] sm:$0xff] %vm51_vm2, %v50_v27 }

// kernel: tpu_custom_call.1
= control target key start
LH: loop header
LB: loop body
LE: loop exit
PB: predicated region body
PF: predicated region fallthrough
CT: control target
= control target key end

     0   :  { %vm10_vm0 = vcmask 31744   ;;  %s70_s8 = smov 4   ;;  %s98_s0 = inlined_call_operand.vmem [shape: f32[8,4], index: 0, kind: input, shape index: {}]   ;;  %s99_s1 = inlined_call_operand.hbm [shape: f32[8,12], index: 1, kind: output, shape index: {}]  }
   0x1   :  { %v12_v0 = vld [vmem:[%s98_s0] sm:$0xff] }
   0x2   :  { %14 = vrot.lane.b32.xlu0 %v12_v0, %s70_s8  ;;  %11 = vst.msk [vmem:[#allocation2] sm:$0xff] %vm10_vm0, %v12_v0 }
   0x3   :  { %6 = vsyncpa [#allocation4], 0  ;;  %s71_s9 = smov 8   ;;  %vm17_vm1 = vcmask 64544   ;;  %vm24_vm2 = vcmask 97344   ;;  %s72_s10 = smov [#allocation3]  }
   0x4   :  { %s35_s11 = sshll.u32 %s72_s10, 4  ;;  %vm27_vm3 = vcmask 97280   ;;  %s36_s11 = int_to_ptr.vmem [resolvable:$true] %s35_s11 }
   0x5   :  { %s46_s0 = scalar_lea.vmem %s36_s11, 128  ;;  %p51_p1 = scmp.lt.s32.totalorder %s36_s11, %s36_s11 }
   0x6   :  { %21 = vrot.lane.b32.xlu0 %v12_v0, %s71_s9  ;;  %p47_p0 = scmp.ne.s32.totalorder %s36_s11, %s46_s0  ;;  %p52_p2 = scmp.lt.s32.totalorder %s46_s0, %s46_s0 }
   0x8   :  { %p53_p3 = por %p52_p2, %p51_p1 }
   0xa   :  { %p54_p4 = pnand %p53_p3, %p47_p0 }
  0x74   :  { %v15_v1 = vpop.permute.xlu0 %14 }
  0x75   :  { %18 = vst.msk [vmem:[#allocation2] sm:$0xff] %vm17_vm1, %v15_v1 }
  0x78   :  { %v22_v2 = vpop.permute.xlu0 %21 }
  0x79   :  { %25 = vst.msk [vmem:[#allocation2] sm:$0xff] %vm24_vm2, %v22_v2 }
  0x80   :  { %v26_v3 = vld [vmem:[#allocation2] sm:$0xff] }
  0x81   :  { %28 = vst.msk [vmem:[#allocation3] sm:$0xff] %vm27_vm3, %v26_v3 }
  0x82   :  { %57 = shalt.err (!%p54_p4)
}
  0x83   :  { %s58_s14 = scalar_lea.hbm %s99_s1, 128 }
  0x84   :  { %p59_p5 = scmp.ne.s32.totalorder %s99_s1, %s58_s14  ;;  %p62_p6 = scmp.lt.u32.totalorder %s58_s14, %s99_s1 }
  0x86   :  { %p64_p7 = pnand %p62_p6, %p59_p5 }
  0x88   :  { %67 = shalt.err (!%p64_p7)
}
  0x89   :  { %38 = dma.vmem_to_hbm [thread:$0]  %s36_s11, 128, %s99_s1, [#allocation4]  }
  0x8a   :  { %68 = dma.done.wait [#allocation4], 128  }
  0x8b   :  { %69 = vsyncadd [#allocation4], 4294967168 }
  0x8c   :  { %42 = vsyncpa [#allocation4], 1 }

// kernel: tpu_custom_call.1
= control target key start
LH: loop header
LB: loop body
LE: loop exit
PB: predicated region body
PF: predicated region fallthrough
CT: control target
= control target key end

     0   :  { %14 = vsyncpa [#allocation3], 0  ;;  %s7740_s0 = inlined_call_operand.vmem [shape: f32[2,18,18,4], index: 0, kind: input, shape index: {}]   ;;  %s7741_s1 = inlined_call_operand.vmem [shape: f32[36,8], index: 1, kind: input, shape index: {}]   ;;  %s7742_s2 = inlined_call_operand.vmem [shape: f32[4,8], index: 2, kind: input, shape index: {}]   ;;  %s7743_s3 = inlined_call_operand.vmem [shape: f32[2,16,16,8], index: 3, kind: output, shape index: {0}]   ;;  %s7744_s4 = inlined_call_operand.hbm [shape: f32[1,8], index: 4, kind: output, shape index: {1}]   ;;  %s7745_s5 = inlined_call_operand.hbm [shape: f32[1,8], index: 5, kind: output, shape index: {2}]   ;;  %s7746_s6 = inlined_call_operand.vmem [shape: f32[2,16,16,8], index: 6, kind: output, shape index: {3}]   ;;  %s7747_s7 = inlined_call_operand.hbm [shape: f32[1,8], index: 7, kind: output, shape index: {4}]   ;;  %s7748_s8 = inlined_call_operand.hbm [shape: f32[1,8], index: 8, kind: output, shape index: {5}]  }
   0x1   :  { %15 = vsyncpa [#allocation5], 0 }
   0x2   :  { %16 = vsyncpa [#allocation8], 0  ;;  %s5788_s27 = smov 0   ;;  %s5790_s28 = smov 0  }
   0x3   :  { %s5792_s29 = smov 0  }
   0x4 LB: > { %s4100_s30 = sadd.s32 4294967295, %s5735_s29   ;;  %s31_s9 = sadd.s32 1, %s5731_s28  ;;  %s5735_s29 = sphi %s5792_s29, %s22_s29   ;;  %s5731_s28 = sphi %s5790_s28, %s7946_s28   ;;  %s5727_s27 = sphi %s5788_s27, %s7945_s27  }
   0x5   : > { %p32_p0 = scmp.ge.s32.totalorder %s31_s9, 2  ;;  %p4106_p1 = scmp.ge.s32.totalorder %s5735_s29, 1 }
   0x6   : > { %p310_p2 = scmp.lt.s32.totalorder %s5735_s29, 3 }
   0x7   : > { %s7948_s9 = smov (%p32_p0, %s31_s9), 0 }
   0x8   : > { %p311_p3 = pnand %p4106_p1, %p310_p2 }
   0xa   : > { %314 = sbr.rel (%p311_p3) target bundleno = 1001 (0x3e9), region = 32 }
  0x11   : > { %v448_v0 = vld [vmem:[%s7741_s1 + $0x10] sm:$0xff]  ;;  %vm647_vm0 = vcmask 1043456   ;;  %v446_v1 = vld [vmem:[%s7741_s1] sm:$0xff]  ;;  %p363_p4 = scmp.lt.s32.totalorder %s5727_s27, 1  ;;  %vm499_vm1 = vcmask 1046528   ;;  %vm582_vm2 = vcmask 31744  }
  0x12   : > { %4986 = vmatprep.subr.msk.mxu0 %vm647_vm0, %v448_v0  ;;  %v2112_v2 = vrot.slane %v448_v0, 4  ;;  %v581_v3 = vrot.slane %v446_v1, 4  ;;  %v5906_v33 = vld [vmem:[%s7741_s1 + $0x18] sm:$0xff]  ;;  %v6006_v61 = vld [vmem:[%s7741_s1 + $0x8] sm:$0xff]  ;;  %vm1166_vm3 = vcmask 1045504   ;;  %p4409_p5 = scmp.ne.s32.totalorder %s5727_s27, 0 }
  0x13   : > { %4987 = vmatpush3.msk.msra.mxu0 %vm647_vm0, %v448_v0  ;;  %s364_s14 = scalar_select %p363_p4, %s5727_s27, 1 }
  0x14   : > { %4786 = vmatprep.subr.msk.mxu1 %vm647_vm0, %v581_v3  ;;  %5036 = vmatprep.subr.msk.mxu0 %vm647_vm0, %v2112_v2  ;;  %vm3185_vm4 = vcmask (!%p4409_p5), 57344  }
  0x15   : > { %4787 = vmatpush3.msk.msra.mxu1 %vm647_vm0, %v581_v3  ;;  %s5542_s15 = smul.u32 432, %s364_s14  ;;  %s4454_s16 = sshll.u32 %s364_s14, 8 }
  0x16   : > { %s5825_s19 = scalar_lea.vmem %s7743_s3, %s4454_s16  ;;  %s5830_s22 = scalar_lea.vmem %s7746_s6, %s4454_s16  ;;  %4836 = vmatprep.subr.msk.mxu1 %vm647_vm0, %v446_v1 }
  0x17   : > { %s5836_s25 = scalar_lea.vmem %s7740_s0, %s5542_s15 }
  0x18   : > { %v5839_v4 = vld [vmem:[%s5836_s25] sm:$0xff]  ;;  %v5842_v5 = vld [vmem:[%s5836_s25 + $0x8] sm:$0xff]  ;;  %v5845_v6 = vld [vmem:[%s5836_s25 + $0x18] sm:$0xff] }
  0x19   : > { %7811 = vst [vmem:[#allocation12_spill] sm:$0xff] %v5845_v6  ;;  %v500_v7 = vrot.slane %v5839_v4, 1  ;;  %v501_v8 = vrot.slane %v5842_v5, 1  ;;  %v5850_v9 = vld [vmem:[%s5836_s25 + $0x20] sm:$0xff]  ;;  %v505_v10 = vrot.slane %v5845_v6, 1  ;;  %v5862_v15 = vld [vmem:[%s5836_s25 + $0x30] sm:$0xff] }
  0x1a   : > { %7812 = vst [vmem:[#allocation13_spill] sm:$0xff] %v5850_v9  ;;  %v5854_v11 = vld [vmem:[%s5836_s25 + $0x10] sm:$0x3]  ;;  %v506_v12 = vrot.slane %v5850_v9, 1  ;;  %v5859_v14 = vld [vmem:[%s5836_s25 + $0x28] sm:$0x3] }
  0x1b   : > { %7813 = vst [vmem:[#allocation14_spill] sm:$0xff] %v5854_v11  ;;  %v503_v13 = vrot.slane %v5854_v11, 1  ;;  %v502_v16 = vsel %vm499_vm1, %v500_v7, %v501_v8  ;;  %v508_v17 = vrot.slane %v5859_v14, 1  ;;  %v5867_v18 = vld [vmem:[%s5836_s25 + $0x38] sm:$0xff]  ;;  %v510_v19 = vrot.slane %v5862_v15, 1  ;;  %v5881_v25 = vld [vmem:[%s5836_s25 + $0x48] sm:$0xff] }
  0x1c   : > { %v5871_v20 = vld [vmem:[%s5836_s25 + $0x40] sm:$0x3]  ;;  %4788 = vmatprep.mubr.msk.f32.mxu1 %vm582_vm2, %v502_v16  ;;  %v5875_v21 = vsel %vm499_vm1, %v505_v10, %v506_v12  ;;  %v511_v23 = vrot.slane %v5867_v18, 1  ;;  %v5884_v26 = vld [vmem:[%s5836_s25 + $0x50] sm:$0xff]  ;;  %v5887_v27 = vld [vmem:[%s5836_s25 + $0x58] sm:$0x3] }
  0x1d   : > { %7814 = vst [vmem:[#allocation15_spill] sm:$0xff] %v5875_v21  ;;  %v504_v22 = vsel %vm499_vm1, %v501_v8, %v503_v13  ;;  %v513_v24 = vrot.slane %v5871_v20, 1  ;;  %4988 = vmatprep.mubr.msk.f32.mxu0 %vm582_vm2, %v5875_v21  ;;  %v5893_v28 = vsel %vm499_vm1, %v506_v12, %v508_v17  ;;  %v515_v29 = vrot.slane %v5881_v25, 1  ;;  %v5898_v31 = vld [vmem:[%s5836_s25 + $0x60] sm:$0xff]  ;;  %v5901_v32 = vld [vmem:[%s5836_s25 + $0x68] sm:$0xff]  ;;  %v5936_v41 = vld [vmem:[%s5836_s25 + $0x78] sm:$0xff] }
  0x1e   : > { %4789 = vmatmul.mubr.msk.f32.vlgmr.msra.gmra.mrb[0].mxu1 %vm582_vm2, %v504_v22  ;;  %7815 = vst [vmem:[#allocation16_spill] sm:$0xff] %v5893_v28  ;;  %v516_v30 = vrot.slane %v5884_v26, 1  ;;  %4989 = vmatmul.mubr.msk.f32.vlgmr.msra.gmra.mrb[0].mxu0 %vm582_vm2, %v5893_v28  ;;  %v5913_v34 = vsel %vm499_vm1, %v510_v19, %v511_v23  ;;  %v518_v36 = vrot.slane %v5887_v27, 1  ;;  %v520_v38 = vrot.slane %v5898_v31, 1  ;;  %v5928_v40 = vld [vmem:[%s5836_s25 + $0x70] sm:$0x3] }
  0x1f   : > { %4791 = vmatprep.mubr.msk.f32.mxu1 %vm582_vm2, %v5875_v21  ;;  %7816 = vst [vmem:[#allocation17_spill] sm:$0xff] %v5913_v34  ;;  %5037 = vmatpush3.msk.msra.mxu0 %vm647_vm0, %v2112_v2  ;;  %v5919_v35 = vsel %vm499_vm1, %v511_v23, %v513_v24  ;;  %v521_v39 = vrot.slane %v5901_v32, 1  ;;  %v5939_v42 = vld [vmem:[%s5836_s25 + $0x80] sm:$0xff]  ;;  %v523_v44 = vrot.slane %v5928_v40, 1  ;;  %v525_v46 = vrot.slane %v5936_v41, 1  ;;  %v5962_v49 = vld [vmem:[%s5836_s25 + $0x90] sm:$0xff] }
  0x20   : > { %4991 = vmatprep.mubr.msk.f32.mxu0 %vm582_vm2, %v5913_v34  ;;  %7817 = vst [vmem:[#allocation18_spill] sm:$0xff] %v5919_v35  ;;  %v5923_v37 = vsel %vm499_vm1, %v515_v29, %v516_v30  ;;  %4837 = vmatpush3.msk.msra.mxu1 %vm647_vm0, %v446_v1  ;;  %v5948_v43 = vsel %vm499_vm1, %v516_v30, %v518_v36  ;;  %v526_v47 = vrot.slane %v5939_v42, 1  ;;  %v5957_v48 = vld [vmem:[%s5836_s25 + $0x88] sm:$0x3]  ;;  %v5965_v50 = vld [vmem:[%s5836_s25 + $0x98] sm:$0xff]  ;;  %v530_v54 = vrot.slane %v5962_v49, 1 }
  0x21   : > { %7818 = vst [vmem:[#allocation19_spill] sm:$0xff] %v5923_v37  ;;  %5086 = vmatprep.subr.msk.mxu0 %vm647_vm0, %v5906_v33  ;;  %7819 = vst [vmem:[#allocation20_spill] sm:$0xff] %v5948_v43  ;;  %v5952_v45 = vsel %vm499_vm1, %v520_v38, %v521_v39  ;;  %v5974_v51 = vsel %vm499_vm1, %v521_v39, %v523_v44  ;;  %v528_v52 = vrot.slane %v5957_v48, 1  ;;  %v531_v55 = vrot.slane %v5965_v50, 1  ;;  %v5983_v56 = vld [vmem:[%s5836_s25 + $0xa0] sm:$0x3] }
  0x22   : > { %4792 = vmatmul.mubr.msk.f32.gmra.mrb[2].mxu1 %vm582_vm2, %v5893_v28  ;;  %4992 = vmatmul.mubr.msk.f32.gmra.mrb[2].mxu0 %vm582_vm2, %v5919_v35  ;;  %7820 = vst [vmem:[#allocation21_spill] sm:$0xff] %v5952_v45  ;;  %7821 = vst [vmem:[#allocation22_spill] sm:$0xff] %v5974_v51  ;;  %v5978_v53 = vsel %vm499_vm1, %v525_v46, %v526_v47  ;;  %v5988_v57 = vld [vmem:[%s5836_s25 + $0xa8] sm:$0xff]  ;;  %v5991_v58 = vld [vmem:[%s5836_s25 + $0xb0] sm:$0xff]  ;;  %v533_v60 = vrot.slane %v5983_v56, 1 }
  0x23   : > { %4794 = vmatprep.mubr.msk.f32.mxu1 %vm582_vm2, %v5913_v34  ;;  %4994 = vmatprep.mubr.msk.f32.mxu0 %vm582_vm2, %v5923_v37  ;;  %7822 = vst [vmem:[#allocation23_spill] sm:$0xff] %v5978_v53  ;;  %v6000_v59 = vsel %vm499_vm1, %v526_v47, %v528_v52  ;;  %v6009_v62 = vsel %vm499_vm1, %v530_v54, %v531_v55  ;;  %v535_v63 = vrot.slane %v5988_v57, 1  ;;  %v536_v0 = vrot.slane %v5991_v58, 1  ;;  %v6014_v1 = vld [vmem:[%s5836_s25 + $0xb8] sm:$0x3]  ;;  %v6021_v2 = vld [vmem:[%s5836_s25 + $0xc0] sm:$0xff] }
  0x24   : > { %7823 = vst [vmem:[#allocation24_spill] sm:$0xff] %v6000_v59  ;;  %7824 = vst [vmem:[#allocation25_spill] sm:$0xff] %v6009_v62  ;;  %4886 = vmatprep.subr.msk.mxu1 %vm647_vm0, %v6006_v61  ;;  %v6024_v3 = vld [vmem:[%s5836_s25 + $0xc8] sm:$0xff]  ;;  %v6033_v7 = vsel %vm499_vm1, %v531_v55, %v533_v60  ;;  %v538_v8 = vrot.slane %v6014_v1, 1  ;;  %v540_v12 = vrot.slane %v6021_v2, 1  ;;  %v6047_v17 = vld [vmem:[%s5836_s25 + $0xd8] sm:$0xff] }
  0x25   : > { %7825 = vst [vmem:[#allocation26_spill] sm:$0xff] %v6033_v7  ;;  %v6037_v10 = vsel %vm499_vm1, %v535_v63, %v536_v0  ;;  %v541_v13 = vrot.slane %v6024_v3, 1  ;;  %v6042_v16 = vld [vmem:[%s5836_s25 + $0xd0] sm:$0x3]  ;;  %v6050_v19 = vld [vmem:[%s5836_s25 + $0xe0] sm:$0xff]  ;;  %v545_v29 = vrot.slane %v6047_v17, 1 }
  0x26   : > { %4795 = vmatmul.mubr.msk.f32.gmra.mrb[4].mxu1 %vm582_vm2, %v5919_v35  ;;  %4995 = vmatmul.mubr.msk.f32.gmra.mrb[4].mxu0 %vm582_vm2, %v5948_v43  ;;  %7826 = vst [vmem:[#allocation27_spill] sm:$0xff] %v6037_v10  ;;  %v6059_v22 = vsel %vm499_vm1, %v536_v0, %v538_v8  ;;  %v543_v23 = vrot.slane %v6042_v16, 1  ;;  %v546_v30 = vrot.slane %v6050_v19, 1  ;;  %v6068_v36 = vld [vmem:[%s5836_s25 + $0xe8] sm:$0x3]  ;;  %v6073_v38 = vld [vmem:[%s5836_s25 + $0xf0] sm:$0xff] }
  0x27   : > { %4797 = vmatprep.mubr.msk.f32.mxu1 %vm582_vm2, %v5923_v37  ;;  %4997 = vmatprep.mubr.msk.f32.mxu0 %vm582_vm2, %v5952_v45  ;;  %7827 = vst [vmem:[#allocation28_spill] sm:$0xff] %v6059_v22  ;;  %v6063_v24 = vsel %vm499_vm1, %v540_v12, %v541_v13  ;;  %v6076_v39 = vld [vmem:[%s5836_s25 + $0xf8] sm:$0xff]  ;;  %v548_v46 = vrot.slane %v6068_v36, 1  ;;  %v550_v52 = vrot.slane %v6073_v38, 1  ;;  %v6094_v55 = vld [vmem:[%s5836_s25 + $0x100] sm:$0x3] }
  0x28   : > { %7828 = vst [vmem:[#allocation29_spill] sm:$0xff] %v6063_v24  ;;  %v6085_v44 = vsel %vm499_vm1, %v541_v13, %v543_v23  ;;  %v6089_v47 = vsel %vm499_vm1, %v545_v29, %v546_v30  ;;  %v551_v54 = vrot.slane %v6076_v39, 1  ;;  %v6099_v60 = vld [vmem:[%s5836_s25 + $0x108] sm:$0xff]  ;;  %v6102_v63 = vld [vmem:[%s5836_s25 + $0x110] sm:$0xff]  ;;  %v553_v8 = vrot.slane %v6094_v55, 1  ;;  %v6125_v28 = vld [vmem:[%s5836_s25 + $0x120] sm:$0xff] }
  0x29   : > { %7829 = vst [vmem:[#allocation30_spill] sm:$0xff] %v6085_v44  ;;  %7830 = vst [vmem:[#allocation31_spill] sm:$0xff] %v6089_v47  ;;  %v6111_v0 = vsel %vm499_vm1, %v546_v30, %v548_v46  ;;  %v555_v13 = vrot.slane %v6099_v60, 1  ;;  %v556_v23 = vrot.slane %v6102_v63, 1  ;;  %v6120_v29 = vld [vmem:[%s5836_s25 + $0x118] sm:$0x3] }
  0x2a   : > { %4798 = vmatmul.mubr.msk.f32.gmra.mrb[6].mxu1 %vm582_vm2, %v5948_v43  ;;  %4998 = vmatmul.mubr.msk.f32.gmra.mrb[6].mxu0 %vm582_vm2, %v5974_v51  ;;  %7831 = vst [vmem:[#allocation32_spill] sm:$0xff] %v6111_v0  ;;  %v6115_v12 = vsel %vm499_vm1, %v550_v52, %v551_v54  ;;  %v6128_v30 = vld [vmem:[%s5836_s25 + $0x128] sm:$0xff]  ;;  %v6137_v46 = vsel %vm499_vm1, %v551_v54, %v553_v8  ;;  %v558_v52 = vrot.slane %v6120_v29, 1  ;;  %v6154_v54 = vld [vmem:[%s5836_s25 + $0x140] sm:$0xff]  ;;  %v6224_v37 = vld [vmem:[%s5836_s25 + $0x178] sm:$0x3] }
  0x2b   : > { %4800 = vmatprep.mubr.msk.f32.mxu1 %vm582_vm2, %v5952_v45  ;;  %5000 = vmatprep.mubr.msk.f32.mxu0 %vm582_vm2, %v5978_v53  ;;  %7832 = vst [vmem:[#allocation33_spill] sm:$0xff] %v6115_v12  ;;  %7833 = vst [vmem:[#allocation34_spill] sm:$0xff] %v6137_v46  ;;  %v6141_v21 = vsel %vm499_vm1, %v555_v13, %v556_v23  ;;  %v6232_v35 = vld [vmem:[%s5836_s25 + $0x188] sm:$0xff]  ;;  %v6250_v11 = vld [vmem:[%s5836_s25 + $0x190] sm:$0x3] }
  0x2c   : > { %7834 = vst [vmem:[#allocation35_spill] sm:$0xff] %v6141_v21  ;;  %v6163_v8 = vsel %vm499_vm1, %v556_v23, %v558_v52  ;;  %v6180_v23 = vld [vmem:[%s5836_s25 + $0x158] sm:$0xff]  ;;  %7842 = vst [vmem:[#allocation43_spill] sm:$0xff] %v6232_v35  ;;  %v1839_v34 = vrot.slane %v6232_v35, 1 }
  0x2d   : > { %7835 = vst [vmem:[#allocation36_spill] sm:$0xff] %v6163_v8 }
  0x2e   : > { %4801 = vmatmul.mubr.msk.f32.gmra.mrb[8].mxu1 %vm582_vm2, %v5974_v51  ;;  %5001 = vmatmul.mubr.msk.f32.gmra.mrb[8].mxu0 %vm582_vm2, %v6000_v59  ;;  %v6198_v51 = vld [vmem:[%s5836_s25 + $0x160] sm:$0x3] }
  0x2f   : > { %4803 = vmatprep.mubr.msk.f32.mxu1 %vm582_vm2, %v5978_v53  ;;  %5003 = vmatprep.mubr.msk.f32.mxu0 %vm582_vm2, %v6009_v62  ;;  %v571_v53 = vrot.slane %v6180_v23, 1 }
  0x32   : > { %4804 = vmatmul.mubr.msk.f32.gmra.mrb[10].mxu1 %vm582_vm2, %v6000_v59  ;;  %5004 = vmatmul.mubr.msk.f32.gmra.mrb[10].mxu0 %vm582_vm2, %v6033_v7 }
  0x33   : > { %4806 = vmatprep.mubr.msk.f32.mxu1 %vm582_vm2, %v6009_v62  ;;  %5006 = vmatprep.mubr.msk.f32.mxu0 %vm582_vm2, %v6037_v10  ;;  %v6172_v62 = vld [vmem:[%s5836_s25 + $0x148] sm:$0x3] }
  0x34   : > { %v568_v52 = vrot.slane %v6172_v62, 1 }
  0x36   : > { %4807 = vmatmul.mubr.msk.f32.gmra.mrb[12].mxu1 %vm582_vm2, %v6033_v7  ;;  %5007 = vmatmul.mubr.msk.f32.gmra.mrb[12].mxu0 %vm582_vm2, %v6059_v22  ;;  %v566_v7 = vrot.slane %v6154_v54, 1 }
  0x37   : > { %4809 = vmatprep.mubr.msk.f32.mxu1 %vm582_vm2, %v6037_v10  ;;  %5009 = vmatprep.mubr.msk.f32.mxu0 %vm582_vm2, %v6063_v24 }
  0x3a   : > { %4810 = vmatmul.mubr.msk.f32.gmra.mrb[14].mxu1 %vm582_vm2, %v6059_v22  ;;  %5010 = vmatmul.mubr.msk.f32.gmra.mrb[14].mxu0 %vm582_vm2, %v6085_v44  ;;  %v6146_v22 = vld [vmem:[%s5836_s25 + $0x130] sm:$0x3] }
  0x3b   : > { %4812 = vmatprep.mubr.msk.f32.mxu1 %vm582_vm2, %v6063_v24  ;;  %5012 = vmatprep.mubr.msk.f32.mxu0 %vm582_vm2, %v6089_v47  ;;  %v561_v24 = vrot.slane %v6128_v30, 1  ;;  %v563_v13 = vrot.slane %v6146_v22, 1 }
  0x3e   : > { %4813 = vmatmul.mubr.msk.f32.gmra.mrb[16].mxu1 %vm582_vm2, %v6085_v44  ;;  %5013 = vmatmul.mubr.msk.f32.gmra.mrb[16].mxu0 %vm582_vm2, %v6111_v0  ;;  %v560_v44 = vrot.slane %v6125_v28, 1 }
  0x3f   : > { %4815 = vmatprep.mubr.msk.f32.mxu1 %vm582_vm2, %v6089_v47  ;;  %5015 = vmatprep.mubr.msk.f32.mxu0 %vm582_vm2, %v6115_v12  ;;  %v6151_v47 = vld [vmem:[%s5836_s25 + $0x138] sm:$0xff] }
  0x40   : > { %v565_v10 = vrot.slane %v6151_v47, 1 }
  0x42   : > { %4816 = vmatmul.mubr.msk.f32.gmra.mrb[18].mxu1 %vm582_vm2, %v6111_v0  ;;  %5016 = vmatmul.mubr.msk.f32.gmra.mrb[18].mxu0 %vm582_vm2, %v6137_v46  ;;  %v6167_v0 = vsel %vm499_vm1, %v560_v44, %v561_v24  ;;  %v6189_v44 = vsel %vm499_vm1, %v561_v24, %v563_v13  ;;  %v6206_v24 = vld [vmem:[%s5836_s25 + $0x170] sm:$0xff]  ;;  %v573_v13 = vrot.slane %v6198_v51, 1 }
  0x43   : > { %4818 = vmatprep.mubr.msk.f32.mxu1 %vm582_vm2, %v6115_v12  ;;  %5018 = vmatprep.mubr.msk.f32.mxu0 %vm582_vm2, %v6141_v21  ;;  %7836 = vst [vmem:[#allocation37_spill] sm:$0xff] %v6167_v0  ;;  %v6177_v12 = vld [vmem:[%s5836_s25 + $0x150] sm:$0xff]  ;;  %7837 = vst [vmem:[#allocation38_spill] sm:$0xff] %v6189_v44  ;;  %v576_v43 = vrot.slane %v6206_v24, 1 }
  0x44   : > { %v570_v59 = vrot.slane %v6177_v12, 1 }
  0x46   : > { %4819 = vmatmul.mubr.msk.f32.gmra.mrb[20].mxu1 %vm582_vm2, %v6137_v46  ;;  %5019 = vmatmul.mubr.msk.f32.gmra.mrb[20].mxu0 %vm582_vm2, %v6163_v8  ;;  %v6193_v46 = vsel %vm499_vm1, %v565_v10, %v566_v7  ;;  %v6215_v10 = vsel %vm499_vm1, %v566_v7, %v568_v52  ;;  %v578_v7 = vrot.slane %v6224_v37, 1 }
  0x47   : > { %4821 = vmatprep.mubr.msk.f32.mxu1 %vm582_vm2, %v6141_v21  ;;  %5021 = vmatprep.mubr.msk.f32.mxu0 %vm582_vm2, %v6167_v0  ;;  %7838 = vst [vmem:[#allocation39_spill] sm:$0xff] %v6193_v46  ;;  %v6203_v21 = vld [vmem:[%s5836_s25 + $0x168] sm:$0xff]  ;;  %7839 = vst [vmem:[#allocation40_spill] sm:$0xff] %v6215_v10 }
  0x48   : > { %v575_v45 = vrot.slane %v6203_v21, 1 }
  0x4a   : > { %4822 = vmatmul.mubr.msk.f32.gmra.mrb[22].mxu1 %vm582_vm2, %v6163_v8  ;;  %5022 = vmatmul.mubr.msk.f32.gmra.mrb[22].mxu0 %vm582_vm2, %v6189_v44  ;;  %v6219_v8 = vsel %vm499_vm1, %v570_v59, %v571_v53  ;;  %v6241_v59 = vsel %vm499_vm1, %v571_v53, %v573_v13  ;;  %v6245_v52 = vsel %vm499_vm1, %v575_v45, %v576_v43  ;;  %v1841_v53 = vrot.slane %v6250_v11, 1 }
  0x4b   : > { %4824 = vmatprep.mubr.msk.f32.mxu1 %vm582_vm2, %v6167_v0  ;;  %5024 = vmatprep.mubr.msk.f32.mxu0 %vm582_vm2, %v6193_v46  ;;  %7840 = vst [vmem:[#allocation41_spill] sm:$0xff] %v6219_v8  ;;  %v6229_v0 = vld [vmem:[%s5836_s25 + $0x180] sm:$0xff]  ;;  %7843 = vst [vmem:[#allocation44_spill] sm:$0xff] %v6241_v59  ;;  %v6261_v45 = vsel %vm499_vm1, %v576_v43, %v578_v7  ;;  %v1175_v43 = vrot.slane %v5859_v14, 2 }
  0x4c   : > { %7841 = vst [vmem:[#allocation42_spill] sm:$0xff] %v6229_v0  ;;  %7844 = vst [vmem:[#allocation45_spill] sm:$0xff] %v6245_v52 }
  0x4d   : > { %7845 = vst [vmem:[#allocation46_spill] sm:$0xff] %v6261_v45 }
  0x4e   : > { %4825 = vmatmul.mubr.msk.f32.gmra.mrb[24].mxu1 %vm582_vm2, %v6189_v44  ;;  %5025 = vmatmul.mubr.msk.f32.gmra.mrb[24].mxu0 %vm582_vm2, %v6215_v10  ;;  %v1838_v44 = vrot.slane %v6229_v0, 1 }
  0x4f   : > { %4827 = vmatprep.mubr.msk.f32.mxu1 %vm582_vm2, %v6193_v46  ;;  %5027 = vmatprep.mubr.msk.f32.mxu0 %vm582_vm2, %v6219_v8  ;;  %v1172_v46 = vrot.slane %v5845_v6, 2 }
  0x50   : > { %v6265_v13 = vsel %vm499_vm1, %v1838_v44, %v1839_v34  ;;  %v6279_v44 = vsel %vm499_vm1, %v1839_v34, %v1841_v53  ;;  %v1180_v34 = vrot.slane %v5871_v20, 2 }
  0x51   : > { %7846 = vst [vmem:[#allocation47_spill] sm:$0xff] %v6265_v13  ;;  %7847 = vst [vmem:[#allocation48_spill] sm:$0xff] %v6279_v44 }
  0x52   : > { %4828 = vmatmul.mubr.msk.f32.gmra.mrb[26].mxu1 %vm582_vm2, %v6215_v10  ;;  %5028 = vmatmul.mubr.msk.f32.gmra.mrb[26].mxu0 %vm582_vm2, %v6241_v59  ;;  %v1173_v10 = vrot.slane %v5850_v9, 2 }
  0x53   : > { %4830 = vmatprep.mubr.msk.f32.mxu1 %vm582_vm2, %v6219_v8  ;;  %5030 = vmatprep.mubr.msk.f32.mxu0 %vm582_vm2, %v6245_v52  ;;  %v1178_v8 = vrot.slane %v5867_v18, 2 }
  0x54   : > { %v6282_v7 = vsel %vm1166_vm3, %v1172_v46, %v1173_v10  ;;  %v6295_v14 = vsel %vm1166_vm3, %v1173_v10, %v1175_v43  ;;  %v7781_v46 = vrot.slane %v5906_v33, 4  ;;  %v1185_v10 = vrot.slane %v5887_v27, 2 }
  0x55   : > { %v6316_v20 = vsel %vm1166_vm3, %v1178_v8, %v1180_v34  ;;  %v1187_v43 = vrot.slane %v5898_v31, 2 }
  0x56   : > { %4831 = vmatmul.mubr.msk.f32.gmra.mrb[28].mxu1 %vm582_vm2, %v6241_v59  ;;  %5031 = vmatmul.mubr.msk.f32.gmra.mrb[28].mxu0 %vm582_vm2, %v6261_v45  ;;  %v1177_v59 = vrot.slane %v5862_v15, 2 }
  0x57   : > { %4833 = vmatprep.mubr.msk.f32.mxu1 %vm582_vm2, %v6245_v52  ;;  %5033 = vmatprep.mubr.msk.f32.mxu0 %vm582_vm2, %v6265_v13  ;;  %v1182_v13 = vrot.slane %v5881_v25, 2  ;;  %v1198_v52 = vrot.slane %v5965_v50, 2 }
  0x58   : > { %v6300_v53 = vsel %vm1166_vm3, %v1177_v59, %v1178_v8  ;;  %v7848_v8 = vrot.slane %v6006_v61, 4 }
  0x5a   : > { %4834 = vmatmul.mubr.msk.f32.gmra.mrb[30].mxu1 %vm582_vm2, %v6261_v45  ;;  %5034 = vmatmul.mubr.msk.f32.gmra.mrb[30].mxu0 %vm582_vm2, %v6279_v44  ;;  %v1183_v44 = vrot.slane %v5884_v26, 2  ;;  %v1188_v45 = vrot.slane %v5901_v32, 2 }
  0x5b   : > { %4838 = vmatprep.mubr.msk.f32.mxu1 %vm582_vm2, %v5839_v4  ;;  %5038 = vmatprep.mubr.msk.f32.mxu0 %vm582_vm2, %v6282_v7 }
  0x5c   : > { %v6320_v59 = vsel %vm1166_vm3, %v1182_v13, %v1183_v44  ;;  %v6341_v27 = vsel %vm1166_vm3, %v1183_v44, %v1185_v10  ;;  %v1190_v13 = vrot.slane %v5928_v40, 2  ;;  %v6345_v34 = vsel %vm1166_vm3, %v1187_v43, %v1188_v45 }
  0x5d   : > { %v1195_v44 = vrot.slane %v5957_v48, 2  ;;  %v1197_v43 = vrot.slane %v5962_v49, 2 }
  0x5e   : > { %4839 = vmatmul.mubr.msk.f32.vlgmr.msra.gmra.mrb[0].mxu1 %vm582_vm2, %v5842_v5  ;;  %5039 = vmatmul.mubr.msk.f32.vlgmr.msra.gmra.mrb[0].mxu0 %vm582_vm2, %v6295_v14  ;;  %v6358_v40 = vsel %vm1166_vm3, %v1188_v45, %v1190_v13  ;;  %v1200_v45 = vrot.slane %v5983_v56, 2  ;;  %v1202_v13 = vrot.slane %v5988_v57, 2 }
  0x5f   : > { %4841 = vmatprep.mubr.msk.f32.mxu1 %vm582_vm2, %v5845_v6  ;;  %5087 = vmatpush3.msk.msra.mxu0 %vm647_vm0, %v5906_v33  ;;  %v1208_v6 = vrot.slane %v6024_v3, 2 }
  0x60   : > { %5041 = vmatprep.mubr.msk.f32.mxu0 %vm582_vm2, %v6300_v53  ;;  %4887 = vmatpush3.msk.msra.mxu1 %vm647_vm0, %v6006_v61  ;;  %v6392_v56 = vsel %vm1166_vm3, %v1198_v52, %v1200_v45 }
  0x61   : > { %5136 = vmatprep.subr.msk.mxu0 %vm647_vm0, %v7781_v46  ;;  %4936 = vmatprep.subr.msk.mxu1 %vm647_vm0, %v7848_v8  ;;  %v1192_v46 = vrot.slane %v5936_v41, 2  ;;  %v1193_v8 = vrot.slane %v5939_v42, 2 }
  0x62   : > { %4842 = vmatmul.mubr.msk.f32.gmra.mrb[2].mxu1 %vm582_vm2, %v5850_v9  ;;  %5042 = vmatmul.mubr.msk.f32.gmra.mrb[2].mxu0 %vm582_vm2, %v6316_v20  ;;  %v1203_v9 = vrot.slane %v5991_v58, 2 }
  0x63   : > { %4844 = vmatprep.mubr.msk.f32.mxu1 %vm582_vm2, %v5862_v15  ;;  %5044 = vmatprep.mubr.msk.f32.mxu0 %vm582_vm2, %v6320_v59  ;;  %v6362_v10 = vsel %vm1166_vm3, %v1192_v46, %v1193_v8  ;;  %v6375_v48 = vsel %vm1166_vm3, %v1193_v8, %v1195_v44  ;;  %v6379_v46 = vsel %vm1166_vm3, %v1197_v43, %v1198_v52  ;;  %v1205_v8 = vrot.slane %v6014_v1, 2 }
  0x64   : > { %7849 = vst [vmem:[#allocation49_spill] sm:$0xff] %v6379_v46  ;;  %v6396_v44 = vsel %vm1166_vm3, %v1202_v13, %v1203_v9  ;;  %v1207_v43 = vrot.slane %v6021_v2, 2  ;;  %v1210_v52 = vrot.slane %v6042_v16, 2  ;;  %v1212_v13 = vrot.slane %v6047_v17, 2 }
  0x65   : > { %7850 = vst [vmem:[#allocation50_spill] sm:$0xff] %v6396_v44  ;;  %v6409_v1 = vsel %vm1166_vm3, %v1203_v9, %v1205_v8  ;;  %v1215_v16 = vrot.slane %v6068_v36, 2  ;;  %v1220_v36 = vrot.slane %v6094_v55, 2 }
  0x66   : > { %4845 = vmatmul.mubr.msk.f32.gmra.mrb[4].mxu1 %vm582_vm2, %v5867_v18  ;;  %5045 = vmatmul.mubr.msk.f32.gmra.mrb[4].mxu0 %vm582_vm2, %v6341_v27  ;;  %v6413_v45 = vsel %vm1166_vm3, %v1207_v43, %v1208_v6  ;;  %v6426_v9 = vsel %vm1166_vm3, %v1208_v6, %v1210_v52  ;;  %v1217_v43 = vrot.slane %v6073_v38, 2 }
  0x67   : > { %4847 = vmatprep.mubr.msk.f32.mxu1 %vm582_vm2, %v5881_v25  ;;  %5047 = vmatprep.mubr.msk.f32.mxu0 %vm582_vm2, %v6345_v34  ;;  %7851 = vst [vmem:[#allocation51_spill] sm:$0xff] %v6413_v45 }
  0x6a   : > { %4848 = vmatmul.mubr.msk.f32.gmra.mrb[6].mxu1 %vm582_vm2, %v5884_v26  ;;  %5048 = vmatmul.mubr.msk.f32.gmra.mrb[6].mxu0 %vm582_vm2, %v6358_v40 }
  0x6b   : > { %4850 = vmatprep.mubr.msk.f32.mxu1 %vm582_vm2, %v5898_v31  ;;  %5050 = vmatprep.mubr.msk.f32.mxu0 %vm582_vm2, %v6362_v10 }
  0x6e   : > { %4851 = vmatmul.mubr.msk.f32.gmra.mrb[8].mxu1 %vm582_vm2, %v5901_v32  ;;  %5051 = vmatmul.mubr.msk.f32.gmra.mrb[8].mxu0 %vm582_vm2, %v6375_v48 }
  0x6f   : > { %4853 = vmatprep.mubr.msk.f32.mxu1 %vm582_vm2, %v5936_v41  ;;  %5053 = vmatprep.mubr.msk.f32.mxu0 %vm582_vm2, %v6379_v46  ;;  %v1213_v46 = vrot.slane %v6050_v19, 2 }
  0x71   : > { %v6430_v8 = vsel %vm1166_vm3, %v1212_v13, %v1213_v46  ;;  %v6443_v6 = vsel %vm1166_vm3, %v1213_v46, %v1215_v16  ;;  %v1222_v13 = vrot.slane %v6099_v60, 2  ;;  %v1225_v46 = vrot.slane %v6120_v29, 2 }
  0x72   : > { %4854 = vmatmul.mubr.msk.f32.gmra.mrb[10].mxu1 %vm582_vm2, %v5939_v42  ;;  %5054 = vmatmul.mubr.msk.f32.gmra.mrb[10].mxu0 %vm582_vm2, %v6392_v56  ;;  %7852 = vst [vmem:[#allocation52_spill] sm:$0xff] %v6430_v8 }
  0x73   : > { %4856 = vmatprep.mubr.msk.f32.mxu1 %vm582_vm2, %v5962_v49  ;;  %5056 = vmatprep.mubr.msk.f32.mxu0 %vm582_vm2, %v6396_v44  ;;  %v1218_v44 = vrot.slane %v6076_v39, 2 }
  0x75   : > { %v6447_v52 = vsel %vm1166_vm3, %v1217_v43, %v1218_v44  ;;  %v6460_v55 = vsel %vm1166_vm3, %v1218_v44, %v1220_v36  ;;  %v1227_v43 = vrot.slane %v6125_v28, 2  ;;  %v1230_v44 = vrot.slane %v6146_v22, 2 }
  0x76   : > { %4857 = vmatmul.mubr.msk.f32.gmra.mrb[12].mxu1 %vm582_vm2, %v5965_v50  ;;  %5057 = vmatmul.mubr.msk.f32.gmra.mrb[12].mxu0 %vm582_vm2, %v6409_v1  ;;  %7853 = vst [vmem:[#allocation53_spill] sm:$0xff] %v6447_v52 }
  0x77   : > { %4859 = vmatprep.mubr.msk.f32.mxu1 %vm582_vm2, %v5988_v57  ;;  %5059 = vmatprep.mubr.msk.f32.mxu0 %vm582_vm2, %v6413_v45  ;;  %v1223_v45 = vrot.slane %v6102_v63, 2 }
  0x79   : > { %v6464_v16 = vsel %vm1166_vm3, %v1222_v13, %v1223_v45  ;;  %v6477_v29 = vsel %vm1166_vm3, %v1223_v45, %v1225_v46  ;;  %v1232_v13 = vrot.slane %v6151_v47, 2  ;;  %v1235_v45 = vrot.slane %v6172_v62, 2 }
  0x7a   : > { %4860 = vmatmul.mubr.msk.f32.gmra.mrb[14].mxu1 %vm582_vm2, %v5991_v58  ;;  %5060 = vmatmul.mubr.msk.f32.gmra.mrb[14].mxu0 %vm582_vm2, %v6426_v9  ;;  %7854 = vst [vmem:[#allocation54_spill] sm:$0xff] %v6464_v16 }
  0x7b   : > { %4862 = vmatprep.mubr.msk.f32.mxu1 %vm582_vm2, %v6021_v2  ;;  %5062 = vmatprep.mubr.msk.f32.mxu0 %vm582_vm2, %v6430_v8  ;;  %v1228_v8 = vrot.slane %v6128_v30, 2 }
  0x7d   : > { %v6481_v36 = vsel %vm1166_vm3, %v1227_v43, %v1228_v8  ;;  %v6494_v22 = vsel %vm1166_vm3, %v1228_v8, %v1230_v44  ;;  %v1237_v43 = vrot.slane %v6177_v12, 2  ;;  %v1240_v8 = vrot.slane %v6198_v51, 2 }
  0x7e   : > { %4863 = vmatmul.mubr.msk.f32.gmra.mrb[16].mxu1 %vm582_vm2, %v6024_v3  ;;  %5063 = vmatmul.mubr.msk.f32.gmra.mrb[16].mxu0 %vm582_vm2, %v6443_v6  ;;  %7855 = vst [vmem:[#allocation55_spill] sm:$0xff] %v6481_v36 }
  0x7f   : > { %4865 = vmatprep.mubr.msk.f32.mxu1 %vm582_vm2, %v6047_v17  ;;  %5065 = vmatprep.mubr.msk.f32.mxu0 %vm582_vm2, %v6447_v52  ;;  %v1233_v52 = vrot.slane %v6154_v54, 2 }
  0x81   : > { %v6498_v46 = vsel %vm1166_vm3, %v1232_v13, %v1233_v52  ;;  %v6511_v62 = vsel %vm1166_vm3, %v1233_v52, %v1235_v45  ;;  %v1242_v13 = vrot.slane %v6203_v21, 2  ;;  %v1245_v52 = vrot.slane %v6224_v37, 2 }
  0x82   : > { %4866 = vmatmul.mubr.msk.f32.gmra.mrb[18].mxu1 %vm582_vm2, %v6050_v19  ;;  %5066 = vmatmul.mubr.msk.f32.gmra.mrb[18].mxu0 %vm582_vm2, %v6460_v55  ;;  %7856 = vst [vmem:[#allocation56_spill] sm:$0xff] %v6498_v46 }
  0x83   : > { %4868 = vmatprep.mubr.msk.f32.mxu1 %vm582_vm2, %v6073_v38  ;;  %5068 = vmatprep.mubr.msk.f32.mxu0 %vm582_vm2, %v6464_v16  ;;  %v1238_v16 = vrot.slane %v6180_v23, 2 }
  0x85   : > { %v6515_v44 = vsel %vm1166_vm3, %v1237_v43, %v1238_v16  ;;  %v6528_v51 = vsel %vm1166_vm3, %v1238_v16, %v1240_v8  ;;  %v2107_v43 = vrot.slane %v6229_v0, 2  ;;  %v2110_v16 = vrot.slane %v6250_v11, 2 }
  0x86   : > { %4869 = vmatmul.mubr.msk.f32.gmra.mrb[20].mxu1 %vm582_vm2, %v6076_v39  ;;  %5069 = vmatmul.mubr.msk.f32.gmra.mrb[20].mxu0 %vm582_vm2, %v6477_v29  ;;  %7857 = vst [vmem:[#allocation57_spill] sm:$0xff] %v6528_v51  ;;  %v1167_v8 = vrot.slane %v5839_v4, 2 }
  0x87   : > { %4871 = vmatprep.mubr.msk.f32.mxu1 %vm582_vm2, %v6099_v60  ;;  %5071 = vmatprep.mubr.msk.f32.mxu0 %vm582_vm2, %v6481_v36  ;;  %v1243_v36 = vrot.slane %v6206_v24, 2 }
  0x89   : > { %v6532_v45 = vsel %vm1166_vm3, %v1242_v13, %v1243_v36  ;;  %v6545_v37 = vsel %vm1166_vm3, %v1243_v36, %v1245_v52  ;;  %v1168_v13 = vrot.slane %v5842_v5, 2  ;;  %v6578_v36 = vld [vmem:[%s7741_s1 + $0x20] sm:$0xf]  ;;  %v7870_v52 = vld [vmem:[#allocation54_spill] sm:$0xff] }
  0x8a   : > { %4872 = vmatmul.mubr.msk.f32.gmra.mrb[22].mxu1 %vm582_vm2, %v6102_v63  ;;  %5072 = vmatmul.mubr.msk.f32.gmra.mrb[22].mxu0 %vm582_vm2, %v6494_v22  ;;  %7858 = vst [vmem:[#allocation58_spill] sm:$0xff] %v6532_v45  ;;  %7859 = vst [vmem:[#allocation59_spill] sm:$0xff] %v6545_v37 }
  0x8b   : > { %4874 = vmatprep.mubr.msk.f32.mxu1 %vm582_vm2, %v6125_v28  ;;  %5074 = vmatprep.mubr.msk.f32.mxu0 %vm582_vm2, %v6498_v46  ;;  %v2108_v46 = vrot.slane %v6232_v35, 2  ;;  %v1169_v5 = vsel %vm1166_vm3, %v1167_v8, %v1168_v13  ;;  %v7873_v8 = vld [vmem:[#allocation42_spill] sm:$0xff] }
  0x8d   : > { %v6551_v35 = vsel %vm1166_vm3, %v2107_v43, %v2108_v46  ;;  %v6563_v4 = vsel %vm1166_vm3, %v2108_v46, %v2110_v16  ;;  %v7863_v46 = vrot.slane %v5906_v33, 4  ;;  %v7865_v33 = vld [vmem:[#allocation49_spill] sm:$0xff]  ;;  %v7871_v43 = vld [vmem:[#allocation55_spill] sm:$0xff]  ;;  %v7872_v16 = vld [vmem:[#allocation56_spill] sm:$0xff] }
  0x8e   : > { %4875 = vmatmul.mubr.msk.f32.gmra.mrb[24].mxu1 %vm582_vm2, %v6128_v30  ;;  %5075 = vmatmul.mubr.msk.f32.gmra.mrb[24].mxu0 %vm582_vm2, %v6511_v62  ;;  %7860 = vst [vmem:[#allocation60_spill] sm:$0xff] %v6551_v35 }
  0x8f   : > { %4877 = vmatprep.mubr.msk.f32.mxu1 %vm582_vm2, %v6151_v47  ;;  %5077 = vmatprep.mubr.msk.f32.mxu0 %vm582_vm2, %v6515_v44 }
  0x92   : > { %4878 = vmatmul.mubr.msk.f32.gmra.mrb[26].mxu1 %vm582_vm2, %v6154_v54  ;;  %5078 = vmatmul.mubr.msk.f32.gmra.mrb[26].mxu0 %vm582_vm2, %v6528_v51  ;;  %v7861_v51 = vld [vmem:[#allocation14_spill] sm:$0xff] }
  0x93   : > { %4880 = vmatprep.mubr.msk.f32.mxu1 %vm582_vm2, %v6177_v12  ;;  %5080 = vmatprep.mubr.msk.f32.mxu0 %vm582_vm2, %v6532_v45  ;;  %v1170_v0 = vrot.slane %v7861_v51, 2  ;;  %7862 = vst [vmem:[#allocation14_spill] sm:$0xff] %v6563_v4  ;;  %v7869_v51 = vld [vmem:[#allocation53_spill] sm:$0xff] }
  0x95   : > { %v1171_v11 = vsel %vm1166_vm3, %v1168_v13, %v1170_v0  ;;  %v7864_v0 = vrot.slane %v6006_v61, 4  ;;  %v7866_v61 = vld [vmem:[#allocation50_spill] sm:$0xff] }
  0x96   : > { %4881 = vmatmul.mubr.msk.f32.gmra.mrb[28].mxu1 %vm582_vm2, %v6180_v23  ;;  %5081 = vmatmul.mubr.msk.f32.gmra.mrb[28].mxu0 %vm582_vm2, %v6545_v37  ;;  %v6699_v13 = vld [vmem:[%s5836_s25 + $0x198] sm:$0xff] }
  0x97   : > { %4883 = vmatprep.mubr.msk.f32.mxu1 %vm582_vm2, %v6203_v21  ;;  %5083 = vmatprep.mubr.msk.f32.mxu0 %vm582_vm2, %v6551_v35  ;;  %v7878_v35 = vld [vmem:[#allocation13_spill] sm:$0xff] }
  0x9a   : > { %4884 = vmatmul.mubr.msk.f32.gmra.mrb[30].mxu1 %vm582_vm2, %v6206_v24  ;;  %5084 = vmatmul.mubr.msk.f32.gmra.mrb[30].mxu0 %vm582_vm2, %v6563_v4  ;;  %v7877_v4 = vld [vmem:[#allocation17_spill] sm:$0xff] }
  0x9b   : > { %4888 = vmatprep.mubr.msk.f32.mxu1 %vm582_vm2, %v1169_v5  ;;  %5088 = vmatprep.mubr.msk.f32.mxu0 %vm582_vm2, %v5862_v15  ;;  %v7874_v5 = vld [vmem:[#allocation57_spill] sm:$0xff] }
  0x9e   : > { %4889 = vmatmul.mubr.msk.f32.vlgmr.msra.gmra.mrb[0].mxu1 %vm582_vm2, %v1171_v11  ;;  %5089 = vmatmul.mubr.msk.f32.vlgmr.msra.gmra.mrb[0].mxu0 %vm582_vm2, %v5867_v18  ;;  %v7875_v11 = vld [vmem:[#allocation43_spill] sm:$0xff] }
  0x9f   : > { %4891 = vmatprep.mubr.msk.f32.mxu1 %vm582_vm2, %v6282_v7  ;;  %5137 = vmatpush3.msk.msra.mxu0 %vm647_vm0, %v7863_v46  ;;  %v7867_v7 = vld [vmem:[#allocation51_spill] sm:$0xff] }
  0xa0   : > { %5091 = vmatprep.mubr.msk.f32.mxu0 %vm582_vm2, %v5881_v25  ;;  %4937 = vmatpush3.msk.msra.mxu1 %vm647_vm0, %v7864_v0  ;;  %v6710_v46 = vld [vmem:[%s5836_s25 + $0x1a0] sm:$0xff]  ;;  %v7876_v0 = vld [vmem:[#allocation12_spill] sm:$0xff] }
  0xa1   : > { %5186 = vmatprep.subr.msk.mxu0 %vm647_vm0, %v6578_v36 }
  0xa2   : > { %4892 = vmatmul.mubr.msk.f32.gmra.mrb[2].mxu1 %vm582_vm2, %v6295_v14  ;;  %5092 = vmatmul.mubr.msk.f32.gmra.mrb[2].mxu0 %vm582_vm2, %v5884_v26  ;;  %v7868_v14 = vld [vmem:[#allocation52_spill] sm:$0xff] }
  0xa3   : > { %4894 = vmatprep.mubr.msk.f32.mxu1 %vm582_vm2, %v6300_v53  ;;  %5094 = vmatprep.mubr.msk.f32.mxu0 %vm582_vm2, %v5898_v31 }
  0xa6   : > { %4895 = vmatmul.mubr.msk.f32.gmra.mrb[4].mxu1 %vm582_vm2, %v6316_v20  ;;  %5095 = vmatmul.mubr.msk.f32.gmra.mrb[4].mxu0 %vm582_vm2, %v5901_v32 }
  0xa7   : > { %4897 = vmatprep.mubr.msk.f32.mxu1 %vm582_vm2, %v6320_v59  ;;  %5097 = vmatprep.mubr.msk.f32.mxu0 %vm582_vm2, %v5936_v41 }
  0xaa   : > { %4898 = vmatmul.mubr.msk.f32.gmra.mrb[6].mxu1 %vm582_vm2, %v6341_v27  ;;  %5098 = vmatmul.mubr.msk.f32.gmra.mrb[6].mxu0 %vm582_vm2, %v5939_v42 }
  0xab   : > { %4900 = vmatprep.mubr.msk.f32.mxu1 %vm582_vm2, %v6345_v34  ;;  %5100 = vmatprep.mubr.msk.f32.mxu0 %vm582_vm2, %v5962_v49 }
  0xae   : > { %4901 = vmatmul.mubr.msk.f32.gmra.mrb[8].mxu1 %vm582_vm2, %v6358_v40  ;;  %5101 = vmatmul.mubr.msk.f32.gmra.mrb[8].mxu0 %vm582_vm2, %v5965_v50 }
  0xaf   : > { %4903 = vmatprep.mubr.msk.f32.mxu1 %vm582_vm2, %v6362_v10  ;;  %5103 = vmatprep.mubr.msk.f32.mxu0 %vm582_vm2, %v5988_v57 }
  0xb2   : > { %4904 = vmatmul.mubr.msk.f32.gmra.mrb[10].mxu1 %vm582_vm2, %v6375_v48  ;;  %5104 = vmatmul.mubr.msk.f32.gmra.mrb[10].mxu0 %vm582_vm2, %v5991_v58 }
  0xb3   : > { %4906 = vmatprep.mubr.msk.f32.mxu1 %vm582_vm2, %v7865_v33  ;;  %5106 = vmatprep.mubr.msk.f32.mxu0 %vm582_vm2, %v6021_v2 }
  0xb6   : > { %4907 = vmatmul.mubr.msk.f32.gmra.mrb[12].mxu1 %vm582_vm2, %v6392_v56  ;;  %5107 = vmatmul.mubr.msk.f32.gmra.mrb[12].mxu0 %vm582_vm2, %v6024_v3 }
  0xb7   : > { %4909 = vmatprep.mubr.msk.f32.mxu1 %vm582_vm2, %v7866_v61  ;;  %5109 = vmatprep.mubr.msk.f32.mxu0 %vm582_vm2, %v6047_v17 }
  0xba   : > { %4910 = vmatmul.mubr.msk.f32.gmra.mrb[14].mxu1 %vm582_vm2, %v6409_v1  ;;  %5110 = vmatmul.mubr.msk.f32.gmra.mrb[14].mxu0 %vm582_vm2, %v6050_v19 }
  0xbb   : > { %4912 = vmatprep.mubr.msk.f32.mxu1 %vm582_vm2, %v7867_v7  ;;  %5112 = vmatprep.mubr.msk.f32.mxu0 %vm582_vm2, %v6073_v38 }
  0xbe   : > { %4913 = vmatmul.mubr.msk.f32.gmra.mrb[16].mxu1 %vm582_vm2, %v6426_v9  ;;  %5113 = vmatmul.mubr.msk.f32.gmra.mrb[16].mxu0 %vm582_vm2, %v6076_v39 }
  0xbf   : > { %4915 = vmatprep.mubr.msk.f32.mxu1 %vm582_vm2, %v7868_v14  ;;  %5115 = vmatprep.mubr.msk.f32.mxu0 %vm582_vm2, %v6099_v60 }
  0xc2   : > { %4916 = vmatmul.mubr.msk.f32.gmra.mrb[18].mxu1 %vm582_vm2, %v6443_v6  ;;  %5116 = vmatmul.mubr.msk.f32.gmra.mrb[18].mxu0 %vm582_vm2, %v6102_v63 }
  0xc3   : > { %4918 = vmatprep.mubr.msk.f32.mxu1 %vm582_vm2, %v7869_v51  ;;  %5118 = vmatprep.mubr.msk.f32.mxu0 %vm582_vm2, %v6125_v28 }
  0xc6   : > { %4919 = vmatmul.mubr.msk.f32.gmra.mrb[20].mxu1 %vm582_vm2, %v6460_v55  ;;  %5119 = vmatmul.mubr.msk.f32.gmra.mrb[20].mxu0 %vm582_vm2, %v6128_v30 }
  0xc7   : > { %4921 = vmatprep.mubr.msk.f32.mxu1 %vm582_vm2, %v7870_v52  ;;  %5121 = vmatprep.mubr.msk.f32.mxu0 %vm582_vm2, %v6151_v47 }
  0xca   : > { %4922 = vmatmul.mubr.msk.f32.gmra.mrb[22].mxu1 %vm582_vm2, %v6477_v29  ;;  %5122 = vmatmul.mubr.msk.f32.gmra.mrb[22].mxu0 %vm582_vm2, %v6154_v54 }
  0xcb   : > { %4924 = vmatprep.mubr.msk.f32.mxu1 %vm582_vm2, %v7871_v43  ;;  %5124 = vmatprep.mubr.msk.f32.mxu0 %vm582_vm2, %v6177_v12 }
  0xce   : > { %4925 = vmatmul.mubr.msk.f32.gmra.mrb[24].mxu1 %vm582_vm2, %v6494_v22  ;;  %5125 = vmatmul.mubr.msk.f32.gmra.mrb[24].mxu0 %vm582_vm2, %v6180_v23 }
  0xcf   : > { %4927 = vmatprep.mubr.msk.f32.mxu1 %vm582_vm2, %v7872_v16  ;;  %5127 = vmatprep.mubr.msk.f32.mxu0 %vm582_vm2, %v6203_v21 }
  0xd2   : > { %4928 = vmatmul.mubr.msk.f32.gmra.mrb[26].mxu1 %vm582_vm2, %v6511_v62  ;;  %5128 = vmatmul.mubr.msk.f32.gmra.mrb[26].mxu0 %vm582_vm2, %v6206_v24 }
  0xd3   : > { %4930 = vmatprep.mubr.msk.f32.mxu1 %vm582_vm2, %v6515_v44  ;;  %5130 = vmatprep.mubr.msk.f32.mxu0 %vm582_vm2, %v7873_v8 }
  0xd6   : > { %4931 = vmatmul.mubr.msk.f32.gmra.mrb[28].mxu1 %vm582_vm2, %v7874_v5  ;;  %5131 = vmatmul.mubr.msk.f32.gmra.mrb[28].mxu0 %vm582_vm2, %v7875_v11 }
  0xd7   : > { %4933 = vmatprep.mubr.msk.f32.mxu1 %vm582_vm2, %v6532_v45  ;;  %5133 = vmatprep.mubr.msk.f32.mxu0 %vm582_vm2, %v6699_v13  ;;  %v7879_v45 = vld [vmem:[#allocation18_spill] sm:$0xff] }
  0xda   : > { %4934 = vmatmul.mubr.msk.f32.gmra.mrb[30].mxu1 %vm582_vm2, %v6545_v37  ;;  %5134 = vmatmul.mubr.msk.f32.gmra.mrb[30].mxu0 %vm582_vm2, %v6710_v46  ;;  %v7880_v37 = vld [vmem:[#allocation19_spill] sm:$0xff] }
  0xdb   : > { %4938 = vmatprep.mubr.msk.f32.mxu1 %vm582_vm2, %v7876_v0  ;;  %5138 = vmatprep.mubr.msk.f32.mxu0 %vm582_vm2, %v7877_v4  ;;  %v7881_v0 = vld [vmem:[#allocation20_spill] sm:$0xff]  ;;  %v7905_v4 = vld [vmem:[#allocation46_spill] sm:$0xff] }
  0xde   : > { %4939 = vmatmul.mubr.msk.f32.vlgmr.msra.gmra.mrb[0].mxu1 %vm582_vm2, %v7878_v35  ;;  %5139 = vmatmul.mubr.msk.f32.vlgmr.msra.gmra.mrb[0].mxu0 %vm582_vm2, %v7879_v45  ;;  %v7882_v35 = vld [vmem:[#allocation21_spill] sm:$0xff]  ;;  %v7884_v45 = vld [vmem:[#allocation23_spill] sm:$0xff] }
  0xdf   : > { %4941 = vmatprep.mubr.msk.f32.mxu1 %vm582_vm2, %v5862_v15  ;;  %5187 = vmatpush3.msk.msra.mxu0 %vm647_vm0, %v6578_v36  ;;  %v7883_v15 = vld [vmem:[#allocation22_spill] sm:$0xff] }
  0xe0   : > { %5141 = vmatprep.mubr.msk.f32.mxu0 %vm582_vm2, %v7880_v37  ;;  %v2644_v37 = vrot.slane %v6710_v46, 1 }
  0xe2   : > { %4942 = vmatmul.mubr.msk.f32.gmra.mrb[2].mxu1 %vm582_vm2, %v5867_v18  ;;  %5142 = vmatmul.mubr.msk.f32.gmra.mrb[2].mxu0 %vm582_vm2, %v7881_v0  ;;  %v7885_v18 = vld [vmem:[#allocation24_spill] sm:$0xff] }
  0xe3   : > { %4944 = vmatprep.mubr.msk.f32.mxu1 %vm582_vm2, %v5881_v25  ;;  %5144 = vmatprep.mubr.msk.f32.mxu0 %vm582_vm2, %v7882_v35  ;;  %v7886_v25 = vld [vmem:[#allocation25_spill] sm:$0xff]  ;;  %v7907_v0 = vld [vmem:[#allocation48_spill] sm:$0xff] }
  0xe6   : > { %4945 = vmatmul.mubr.msk.f32.gmra.mrb[4].mxu1 %vm582_vm2, %v5884_v26  ;;  %5145 = vmatmul.mubr.msk.f32.gmra.mrb[4].mxu0 %vm582_vm2, %v7883_v15  ;;  %v7887_v26 = vld [vmem:[#allocation26_spill] sm:$0xff] }
  0xe7   : > { %4947 = vmatprep.mubr.msk.f32.mxu1 %vm582_vm2, %v5898_v31  ;;  %5147 = vmatprep.mubr.msk.f32.mxu0 %vm582_vm2, %v7884_v45  ;;  %v7888_v31 = vld [vmem:[#allocation27_spill] sm:$0xff] }
  0xea   : > { %4948 = vmatmul.mubr.msk.f32.gmra.mrb[6].mxu1 %vm582_vm2, %v5901_v32  ;;  %5148 = vmatmul.mubr.msk.f32.gmra.mrb[6].mxu0 %vm582_vm2, %v7885_v18  ;;  %v7889_v32 = vld [vmem:[#allocation28_spill] sm:$0xff] }
  0xeb   : > { %4950 = vmatprep.mubr.msk.f32.mxu1 %vm582_vm2, %v5936_v41  ;;  %5150 = vmatprep.mubr.msk.f32.mxu0 %vm582_vm2, %v7886_v25  ;;  %v7890_v41 = vld [vmem:[#allocation29_spill] sm:$0xff] }
  0xee   : > { %4951 = vmatmul.mubr.msk.f32.gmra.mrb[8].mxu1 %vm582_vm2, %v5939_v42  ;;  %5151 = vmatmul.mubr.msk.f32.gmra.mrb[8].mxu0 %vm582_vm2, %v7887_v26  ;;  %v7891_v42 = vld [vmem:[#allocation30_spill] sm:$0xff] }
  0xef   : > { %4953 = vmatprep.mubr.msk.f32.mxu1 %vm582_vm2, %v5962_v49  ;;  %5153 = vmatprep.mubr.msk.f32.mxu0 %vm582_vm2, %v7888_v31  ;;  %v7892_v49 = vld [vmem:[#allocation31_spill] sm:$0xff] }
  0xf2   : > { %4954 = vmatmul.mubr.msk.f32.gmra.mrb[10].mxu1 %vm582_vm2, %v5965_v50  ;;  %5154 = vmatmul.mubr.msk.f32.gmra.mrb[10].mxu0 %vm582_vm2, %v7889_v32  ;;  %v7893_v50 = vld [vmem:[#allocation32_spill] sm:$0xff] }
  0xf3   : > { %4956 = vmatprep.mubr.msk.f32.mxu1 %vm582_vm2, %v5988_v57  ;;  %5156 = vmatprep.mubr.msk.f32.mxu0 %vm582_vm2, %v7890_v41  ;;  %v7894_v57 = vld [vmem:[#allocation33_spill] sm:$0xff] }
  0xf6   : > { %4957 = vmatmul.mubr.msk.f32.gmra.mrb[12].mxu1 %vm582_vm2, %v5991_v58  ;;  %5157 = vmatmul.mubr.msk.f32.gmra.mrb[12].mxu0 %vm582_vm2, %v7891_v42  ;;  %v7895_v58 = vld [vmem:[#allocation34_spill] sm:$0xff] }
  0xf7   : > { %4959 = vmatprep.mubr.msk.f32.mxu1 %vm582_vm2, %v6021_v2  ;;  %5159 = vmatprep.mubr.msk.f32.mxu0 %vm582_vm2, %v7892_v49  ;;  %v7896_v2 = vld [vmem:[#allocation35_spill] sm:$0xff] }
  0xfa   : > { %4960 = vmatmul.mubr.msk.f32.gmra.mrb[14].mxu1 %vm582_vm2, %v6024_v3  ;;  %5160 = vmatmul.mubr.msk.f32.gmra.mrb[14].mxu0 %vm582_vm2, %v7893_v50  ;;  %v7897_v3 = vld [vmem:[#allocation36_spill] sm:$0xff] }
  0xfb   : > { %4962 = vmatprep.mubr.msk.f32.mxu1 %vm582_vm2, %v6047_v17  ;;  %5162 = vmatprep.mubr.msk.f32.mxu0 %vm582_vm2, %v7894_v57  ;;  %v7898_v17 = vld [vmem:[#allocation37_spill] sm:$0xff] }
  0xfe   : > { %4963 = vmatmul.mubr.msk.f32.gmra.mrb[16].mxu1 %vm582_vm2, %v6050_v19  ;;  %5163 = vmatmul.mubr.msk.f32.gmra.mrb[16].mxu0 %vm582_vm2, %v7895_v58  ;;  %v7899_v19 = vld [vmem:[#allocation38_spill] sm:$0xff] }
  0xff   : > { %4965 = vmatprep.mubr.msk.f32.mxu1 %vm582_vm2, %v6073_v38  ;;  %5165 = vmatprep.mubr.msk.f32.mxu0 %vm582_vm2, %v7896_v2  ;;  %v7900_v38 = vld [vmem:[#allocation39_spill] sm:$0xff] }
 0x102   : > { %4966 = vmatmul.mubr.msk.f32.gmra.mrb[18].mxu1 %vm582_vm2, %v6076_v39  ;;  %5166 = vmatmul.mubr.msk.f32.gmra.mrb[18].mxu0 %vm582_vm2, %v7897_v3  ;;  %v7901_v39 = vld [vmem:[#allocation40_spill] sm:$0xff] }
 0x103   : > { %4968 = vmatprep.mubr.msk.f32.mxu1 %vm582_vm2, %v6099_v60  ;;  %5168 = vmatprep.mubr.msk.f32.mxu0 %vm582_vm2, %v7898_v17  ;;  %v7902_v60 = vld [vmem:[#allocation41_spill] sm:$0xff] }
 0x106   : > { %4969 = vmatmul.mubr.msk.f32.gmra.mrb[20].mxu1 %vm582_vm2, %v6102_v63  ;;  %5169 = vmatmul.mubr.msk.f32.gmra.mrb[20].mxu0 %vm582_vm2, %v7899_v19  ;;  %v7903_v63 = vld [vmem:[#allocation44_spill] sm:$0xff] }
 0x107   : > { %4971 = vmatprep.mubr.msk.f32.mxu1 %vm582_vm2, %v6125_v28  ;;  %5171 = vmatprep.mubr.msk.f32.mxu0 %vm582_vm2, %v7900_v38  ;;  %v7904_v28 = vld [vmem:[#allocation45_spill] sm:$0xff] }
 0x10a   : > { %4972 = vmatmul.mubr.msk.f32.gmra.mrb[22].mxu1 %vm582_vm2, %v6128_v30  ;;  %5172 = vmatmul.mubr.msk.f32.gmra.mrb[22].mxu0 %vm582_vm2, %v7901_v39  ;;  %v2643_v30 = vrot.slane %v6699_v13, 1 }
 0x10b   : > { %4974 = vmatprep.mubr.msk.f32.mxu1 %vm582_vm2, %v6151_v47  ;;  %5174 = vmatprep.mubr.msk.f32.mxu0 %vm582_vm2, %v7902_v60  ;;  %v445_v47 = vld [vmem:[%s5836_s25 + $0x1a8] sm:$0x3] }
 0x10c   : > { %v2645_v36 = vsel %vm499_vm1, %v2643_v30, %v2644_v37 }
 0x10e   : > { %4975 = vmatmul.mubr.msk.f32.gmra.mrb[24].mxu1 %vm582_vm2, %v6154_v54  ;;  %5175 = vmatmul.mubr.msk.f32.gmra.mrb[24].mxu0 %vm582_vm2, %v7903_v63  ;;  %v7906_v54 = vld [vmem:[#allocation47_spill] sm:$0xff] }
 0x10f   : > { %4977 = vmatprep.mubr.msk.f32.mxu1 %vm582_vm2, %v6177_v12  ;;  %5177 = vmatprep.mubr.msk.f32.mxu0 %vm582_vm2, %v7904_v28  ;;  %v2646_v12 = vrot.slane %v445_v47, 1 }
 0x112   : > { %4978 = vmatmul.mubr.msk.f32.gmra.mrb[26].mxu1 %vm582_vm2, %v6180_v23  ;;  %5178 = vmatmul.mubr.msk.f32.gmra.mrb[26].mxu0 %vm582_vm2, %v7905_v4  ;;  %v2647_v23 = vsel %vm499_vm1, %v2644_v37, %v2646_v12 }
 0x113   : > { %4980 = vmatprep.mubr.msk.f32.mxu1 %vm582_vm2, %v6203_v21  ;;  %5180 = vmatprep.mubr.msk.f32.mxu0 %vm582_vm2, %v7906_v54  ;;  %v7908_v21 = vld [vmem:[#allocation58_spill] sm:$0xff] }
 0x116   : > { %4981 = vmatmul.mubr.msk.f32.gmra.mrb[28].mxu1 %vm582_vm2, %v6206_v24  ;;  %5181 = vmatmul.mubr.msk.f32.gmra.mrb[28].mxu0 %vm582_vm2, %v7907_v0  ;;  %v2912_v24 = vrot.slane %v6699_v13, 2 }
 0x117   : > { %4983 = vmatprep.mubr.msk.f32.mxu1 %vm582_vm2, %v7873_v8  ;;  %5183 = vmatprep.mubr.msk.f32.mxu0 %vm582_vm2, %v2645_v36 }
 0x11a   : > { %4984 = vmatmul.mubr.msk.f32.gmra.mrb[30].mxu1 %vm582_vm2, %v7875_v11  ;;  %5184 = vmatmul.mubr.msk.f32.gmra.mrb[30].mxu0 %vm582_vm2, %v2647_v23 }
 0x11b   : > { %5188 = vmatprep.mubr.msk.f32.mxu0 %vm582_vm2, %v6300_v53  ;;  %v2913_v53 = vrot.slane %v6710_v46, 2 }
 0x11e   : > { %5189 = vmatmul.mubr.msk.f32.vlgmr.msra.gmra.mrb[0].mxu0 %vm582_vm2, %v6316_v20  ;;  %v7909_v20 = vld [vmem:[#allocation59_spill] sm:$0xff] }
 0x11f   : > { %5191 = vmatprep.mubr.msk.f32.mxu0 %vm582_vm2, %v6320_v59  ;;  %v7910_v59 = vld [vmem:[#allocation60_spill] sm:$0xff] }
 0x122   : > { %5192 = vmatmul.mubr.msk.f32.gmra.mrb[2].mxu0 %vm582_vm2, %v6341_v27  ;;  %v2915_v27 = vrot.slane %v445_v47, 2 }
 0x123   : > { %5194 = vmatprep.mubr.msk.f32.mxu0 %vm582_vm2, %v6345_v34  ;;  %v2914_v34 = vsel %vm1166_vm3, %v2912_v24, %v2913_v53 }
 0x126   : > { %5195 = vmatmul.mubr.msk.f32.gmra.mrb[4].mxu0 %vm582_vm2, %v6358_v40  ;;  %v7911_v40 = vld [vmem:[#allocation14_spill] sm:$0xff] }
 0x127   : > { %5197 = vmatprep.mubr.msk.f32.mxu0 %vm582_vm2, %v6362_v10  ;;  %v2916_v10 = vsel %vm1166_vm3, %v2913_v53, %v2915_v27 }
 0x12a   : > { %5198 = vmatmul.mubr.msk.f32.gmra.mrb[6].mxu0 %vm582_vm2, %v6375_v48 }
 0x12b   : > { %5200 = vmatprep.mubr.msk.f32.mxu0 %vm582_vm2, %v7865_v33 }
 0x12e   : > { %5201 = vmatmul.mubr.msk.f32.gmra.mrb[8].mxu0 %vm582_vm2, %v6392_v56 }
 0x12f   : > { %5203 = vmatprep.mubr.msk.f32.mxu0 %vm582_vm2, %v7866_v61 }
 0x132   : > { %5204 = vmatmul.mubr.msk.f32.gmra.mrb[10].mxu0 %vm582_vm2, %v6409_v1 }
 0x133   : > { %5206 = vmatprep.mubr.msk.f32.mxu0 %vm582_vm2, %v7867_v7 }
 0x136   : > { %5207 = vmatmul.mubr.msk.f32.gmra.mrb[12].mxu0 %vm582_vm2, %v6426_v9 }
 0x137   : > { %5209 = vmatprep.mubr.msk.f32.mxu0 %vm582_vm2, %v7868_v14 }
 0x13a   : > { %5210 = vmatmul.mubr.msk.f32.gmra.mrb[14].mxu0 %vm582_vm2, %v6443_v6 }
 0x13b   : > { %5212 = vmatprep.mubr.msk.f32.mxu0 %vm582_vm2, %v7869_v51 }
 0x13e   : > { %5213 = vmatmul.mubr.msk.f32.gmra.mrb[16].mxu0 %vm582_vm2, %v6460_v55 }
 0x13f   : > { %5215 = vmatprep.mubr.msk.f32.mxu0 %vm582_vm2, %v7870_v52 }
 0x142   : > { %5216 = vmatmul.mubr.msk.f32.gmra.mrb[18].mxu0 %vm582_vm2, %v6477_v29 }
 0x143   : > { %5218 = vmatprep.mubr.msk.f32.mxu0 %vm582_vm2, %v7871_v43 }
 0x146   : > { %5219 = vmatmul.mubr.msk.f32.gmra.mrb[20].mxu0 %vm582_vm2, %v6494_v22 }
 0x147   : > { %5221 = vmatprep.mubr.msk.f32.mxu0 %vm582_vm2, %v7872_v16 }
 0x14a   : > { %5222 = vmatmul.mubr.msk.f32.gmra.mrb[22].mxu0 %vm582_vm2, %v6511_v62 }
 0x14b   : > { %5224 = vmatprep.mubr.msk.f32.mxu0 %vm582_vm2, %v6515_v44 }
 0x14e   : > { %5225 = vmatmul.mubr.msk.f32.gmra.mrb[24].mxu0 %vm582_vm2, %v7874_v5 }
 0x14f   : > { %5227 = vmatprep.mubr.msk.f32.mxu0 %vm582_vm2, %v7908_v21 }
 0x152   : > { %5228 = vmatmul.mubr.msk.f32.gmra.mrb[26].mxu0 %vm582_vm2, %v7909_v20 }
 0x153   : > { %5230 = vmatprep.mubr.msk.f32.mxu0 %vm582_vm2, %v7910_v59 }
 0x156   : > { %5231 = vmatmul.mubr.msk.f32.gmra.mrb[28].mxu0 %vm582_vm2, %v7911_v40 }
 0x157   : > { %5233 = vmatprep.mubr.msk.f32.mxu0 %vm582_vm2, %v2914_v34 }
 0x15a   : > { %5234 = vmatmul.mubr.msk.f32.gmra.mrb[30].mxu0 %vm582_vm2, %v2916_v10 }
 0x1b1   : > { %v4940_v48 = vpop.f32.mrb[0].mxu1 }
 0x1b2   : > { %v1646_v56 = vpop.f32.mrb[1].mxu1 }
 0x1b5   : > { %v4943_v1 = vpop.f32.mrb[2].mxu1 }
 0x1b6   : > { %v1656_v9 = vpop.f32.mrb[3].mxu1 }
 0x1b9   : > { %v4946_v6 = vpop.f32.mrb[4].mxu1 }
 0x1ba   : > { %v1666_v55 = vpop.f32.mrb[5].mxu1 }
 0x1bd   : > { %v4949_v29 = vpop.f32.mrb[6].mxu1 }
 0x1be   : > { %v1676_v22 = vpop.f32.mrb[7].mxu1 }
 0x1c1   : > { %v4952_v62 = vpop.f32.mrb[8].mxu1 }
 0x1c2   : > { %v1686_v44 = vpop.f32.mrb[9].mxu1 }
 0x1c5   : > { %v4955_v33 = vpop.f32.mrb[10].mxu1 }
 0x1c6   : > { %v1696_v61 = vpop.f32.mrb[11].mxu1 }
 0x1c9   : > { %v4958_v7 = vpop.f32.mrb[12].mxu1 }
 0x1ca   : > { %v1706_v14 = vpop.f32.mrb[13].mxu1 }
 0x1cd   : > { %v4961_v51 = vpop.f32.mrb[14].mxu1 }
 0x1ce   : > { %v1716_v52 = vpop.f32.mrb[15].mxu1 }
 0x1d1   : > { %v4964_v43 = vpop.f32.mrb[16].mxu1 }
 0x1d2   : > { %v1726_v16 = vpop.f32.mrb[17].mxu1 }
 0x1d5   : > { %v4967_v8 = vpop.f32.mrb[18].mxu1 }
 0x1d6   : > { %v1736_v13 = vpop.f32.mrb[19].mxu1 }
 0x1d9   : > { %v4970_v5 = vpop.f32.mrb[20].mxu1 }
 0x1da   : > { %v1746_v11 = vpop.f32.mrb[21].mxu1 }
 0x1dd   : > { %v4973_v46 = vpop.f32.mrb[22].mxu1 }
 0x1de   : > { %v1756_v35 = vpop.f32.mrb[23].mxu1 }
 0x1e1   : > { %v4976_v15 = vpop.f32.mrb[24].mxu1 }
 0x1e2   : > { %v1766_v45 = vpop.f32.mrb[25].mxu1 }
 0x1e5   : > { %v4979_v18 = vpop.f32.mrb[26].mxu1 }
 0x1e6   : > { %v1776_v25 = vpop.f32.mrb[27].mxu1 }
 0x1e9   : > { %v4982_v26 = vpop.f32.mrb[28].mxu1 }
 0x1ea   : > { %v1786_v31 = vpop.f32.mrb[29].mxu1 }
 0x1ed   : > { %v6915_v32 = vpop.f32.mrb[30].mxu1 }
 0x1ee   : > { %v6917_v41 = vpop.f32.mrb[31].mxu1 }
 0x1f1   : > { %v5190_v42 = vpop.f32.mrb[0].mxu0 }
 0x1f2   : > { %v6919_v49 = vadd.f32 %v5190_v42, %v4940_v48  ;;  %v2990_v50 = vpop.f32.mrb[1].mxu0 }
 0x1f3   : > { %v6921_v57 = vadd.f32 %v2990_v50, %v1646_v56 }
 0x1f5   : > { %v5193_v58 = vpop.f32.mrb[2].mxu0 }
 0x1f6   : > { %v6923_v2 = vadd.f32 %v5193_v58, %v4943_v1  ;;  %v3000_v3 = vpop.f32.mrb[3].mxu0 }
 0x1f7   : > { %v6925_v17 = vadd.f32 %v3000_v3, %v1656_v9 }
 0x1f9   : > { %v5196_v19 = vpop.f32.mrb[4].mxu0 }
 0x1fa   : > { %v6927_v38 = vadd.f32 %v5196_v19, %v4946_v6  ;;  %v3010_v39 = vpop.f32.mrb[5].mxu0 }
 0x1fb   : > { %v6929_v60 = vadd.f32 %v3010_v39, %v1666_v55 }
 0x1fd   : > { %v5199_v63 = vpop.f32.mrb[6].mxu0 }
 0x1fe   : > { %v6931_v28 = vadd.f32 %v5199_v63, %v4949_v29  ;;  %v3020_v30 = vpop.f32.mrb[7].mxu0 }
 0x1ff   : > { %v6933_v37 = vadd.f32 %v3020_v30, %v1676_v22 }
 0x201   : > { %v5202_v47 = vpop.f32.mrb[8].mxu0 }
 0x202   : > { %v6935_v4 = vadd.f32 %v5202_v47, %v4952_v62  ;;  %v3030_v54 = vpop.f32.mrb[9].mxu0 }
 0x203   : > { %v6937_v12 = vadd.f32 %v3030_v54, %v1686_v44 }
 0x205   : > { %v5205_v36 = vpop.f32.mrb[10].mxu0 }
 0x206   : > { %v6939_v0 = vadd.f32 %v5205_v36, %v4955_v33  ;;  %v3040_v23 = vpop.f32.mrb[11].mxu0 }
 0x207   : > { %v6941_v21 = vadd.f32 %v3040_v23, %v1696_v61 }
 0x209   : > { %v5208_v24 = vpop.f32.mrb[12].mxu0 }
 0x20a   : > { %v6943_v53 = vadd.f32 %v5208_v24, %v4958_v7  ;;  %v3050_v20 = vpop.f32.mrb[13].mxu0 }
 0x20b   : > { %v6945_v59 = vadd.f32 %v3050_v20, %v1706_v14 }
 0x20d   : > { %v5211_v27 = vpop.f32.mrb[14].mxu0 }
 0x20e   : > { %v6947_v34 = vadd.f32 %v5211_v27, %v4961_v51  ;;  %v3060_v40 = vpop.f32.mrb[15].mxu0 }
 0x20f   : > { %v6949_v10 = vadd.f32 %v3060_v40, %v1716_v52 }
 0x211   : > { %v5214_v48 = vpop.f32.mrb[16].mxu0 }
 0x212   : > { %v6951_v56 = vadd.f32 %v5214_v48, %v4964_v43  ;;  %v3070_v1 = vpop.f32.mrb[17].mxu0 }
 0x213   : > { %v6953_v9 = vadd.f32 %v3070_v1, %v1726_v16 }
 0x215   : > { %v5217_v6 = vpop.f32.mrb[18].mxu0 }
 0x216   : > { %v6955_v55 = vadd.f32 %v5217_v6, %v4967_v8  ;;  %v3080_v29 = vpop.f32.mrb[19].mxu0 }
 0x217   : > { %v6957_v22 = vadd.f32 %v3080_v29, %v1736_v13 }
 0x219   : > { %v5220_v62 = vpop.f32.mrb[20].mxu0 }
 0x21a   : > { %v6959_v44 = vadd.f32 %v5220_v62, %v4970_v5  ;;  %v3090_v33 = vpop.f32.mrb[21].mxu0 }
 0x21b   : > { %v6961_v61 = vadd.f32 %v3090_v33, %v1746_v11 }
 0x21d   : > { %v5223_v7 = vpop.f32.mrb[22].mxu0 }
 0x21e   : > { %v6963_v14 = vadd.f32 %v5223_v7, %v4973_v46  ;;  %v3100_v51 = vpop.f32.mrb[23].mxu0 }
 0x21f   : > { %v6965_v52 = vadd.f32 %v3100_v51, %v1756_v35 }
 0x221   : > { %v5226_v43 = vpop.f32.mrb[24].mxu0 }
 0x222   : > { %v6967_v16 = vadd.f32 %v5226_v43, %v4976_v15  ;;  %v3110_v8 = vpop.f32.mrb[25].mxu0 }
 0x223   : > { %v6969_v42 = vadd.f32 %v3110_v8, %v1766_v45 }
 0x225   : > { %v5229_v13 = vpop.f32.mrb[26].mxu0 }
 0x226   : > { %v6971_v50 = vadd.f32 %v5229_v13, %v4979_v18  ;;  %v3120_v5 = vpop.f32.mrb[27].mxu0  ;;  %v5737_v18 = vmov (!%p4409_p5), 0.0  }
 0x227   : > { %v6973_v58 = vadd.f32 %v3120_v5, %v1776_v25  ;;  %3186 = vst.msk [vmem:[#allocation2] sm:$0x1] (!%p4409_p5), %vm3185_vm4, %v5737_v18  ;;  %3187 = vst.msk [vmem:[#allocation4] sm:$0x1] (!%p4409_p5), %vm3185_vm4, %v5737_v18 }
 0x229   : > { %v5232_v11 = vpop.f32.mrb[28].mxu0  ;;  %3184 = sbr.rel (%p4409_p5) target bundleno = 560 (0x230), region = 36 }
 0x22a   : > { %v6975_v3 = vadd.f32 %v5232_v11, %v4982_v26  ;;  %v3130_v46 = vpop.f32.mrb[29].mxu0 }
 0x22b   : > { %v6977_v19 = vadd.f32 %v3130_v46, %v1786_v31 }
 0x22d   : > { %v5235_v35 = vpop.f32.mrb[30].mxu0 }
 0x22e   : > { %v6980_v39 = vadd.f32 %v5235_v35, %v6915_v32  ;;  %v3140_v15 = vpop.f32.mrb[31].mxu0 }
 0x22f   : > { %v6983_v45 = vadd.f32 %v3140_v15, %v6917_v41 }
 0x230 PF: > { %vm3189_vm5 = vcmask 64512   ;;  %v7912_v25 = vld [vmem:[#allocation15_spill] sm:$0xff]  ;;  %v7913_v54 = vld [vmem:[#allocation16_spill] sm:$0xff]  ;;  %v7914_v23 = vld [vmem:[#allocation17_spill] sm:$0xff]  ;;  %v3263_v8 = vmul.f32 %v6921_v57, %v6921_v57  ;;  %v3264_v5 = vmul.f32 %v6919_v49, %v6919_v49  ;;  %v3265_v11 = vmul.f32 %v6925_v17, %v6925_v17 }
 0x231   : > { %5238 = vmatprep.mubr.msk.f32.mxu1 %vm582_vm2, %v7912_v25  ;;  %v3190_v26 = vsel %vm3189_vm5, %v6921_v57, 0.0  ;;  %v3191_v31 = vsel %vm3189_vm5, %v6919_v49, 0.0  ;;  %v3193_v32 = vsel %vm3189_vm5, %v6925_v17, 0.0  ;;  %3366 = vst.msk [vmem:[%s5825_s19] sm:$0xff] %vm3189_vm5, %v6921_v57  ;;  %3367 = vst.msk [vmem:[%s5825_s19 + $0x8] sm:$0xff] %vm3189_vm5, %v6919_v49  ;;  %v3195_v30 = vsel %vm3189_vm5, %v6923_v2, 0.0 }
 0x232   : > { %3368 = vst.msk [vmem:[%s5825_s19 + $0x10] sm:$0xff] %vm3189_vm5, %v6925_v17  ;;  %3369 = vst.msk [vmem:[%s5825_s19 + $0x18] sm:$0xff] %vm3189_vm5, %v6923_v2  ;;  %v3398_v41 = vld [vmem:[%s7742_s2] sm:$0xf]  ;;  %v3192_v63 = vadd.f32 %v3191_v31, %v3190_v26  ;;  %v3197_v36 = vsel %vm3189_vm5, %v6929_v60, 0.0  ;;  %v3199_v20 = vsel %vm3189_vm5, %v6927_v38, 0.0  ;;  %v3266_v18 = vmul.f32 %v6923_v2, %v6923_v2 }
 0x233   : > { %3370 = vst.msk [vmem:[%s5825_s19 + $0x20] sm:$0xff] %vm3189_vm5, %v6929_v60  ;;  %3371 = vst.msk [vmem:[%s5825_s19 + $0x28] sm:$0xff] %vm3189_vm5, %v6927_v38  ;;  %5236 = vmatprep.subr.msk.mxu1 %vm647_vm0, %v3398_v41  ;;  %v7915_v40 = vld [vmem:[#allocation18_spill] sm:$0xff]  ;;  %v3201_v48 = vsel %vm3189_vm5, %v6933_v37, 0.0  ;;  %v7916_v1 = vld [vmem:[#allocation19_spill] sm:$0xff]  ;;  %v3203_v29 = vsel %vm3189_vm5, %v6931_v28, 0.0  ;;  %v3267_v17 = vmul.f32 %v6929_v60, %v6929_v60 }
 0x234   : > { %3372 = vst.msk [vmem:[%s5825_s19 + $0x30] sm:$0xff] %vm3189_vm5, %v6933_v37  ;;  %3373 = vst.msk [vmem:[%s5825_s19 + $0x38] sm:$0xff] %vm3189_vm5, %v6931_v28  ;;  %5237 = vmatpush3.msk.msra.mxu1 %vm647_vm0, %v3398_v41  ;;  %v3194_v47 = vadd.f32 %v3193_v32, %v3192_v63  ;;  %v7917_v33 = vld [vmem:[#allocation20_spill] sm:$0xff]  ;;  %v3205_v7 = vsel %vm3189_vm5, %v6937_v12, 0.0  ;;  %v7918_v51 = vld [vmem:[#allocation21_spill] sm:$0xff]  ;;  %v3207_v13 = vsel %vm3189_vm5, %v6935_v4, 0.0 }
 0x235   : > { %3374 = vst.msk [vmem:[%s5825_s19 + $0x40] sm:$0xff] %vm3189_vm5, %v6937_v12  ;;  %3375 = vst.msk [vmem:[%s5825_s19 + $0x48] sm:$0xff] %vm3189_vm5, %v6935_v4  ;;  %5239 = vmatmul.mubr.msk.f32.vlgmr.msra.gmra.mrb[32].mxu1 %vm582_vm2, %v7913_v54  ;;  %v7919_v35 = vld [vmem:[#allocation22_spill] sm:$0xff]  ;;  %v3209_v15 = vsel %vm3189_vm5, %v6941_v21, 0.0  ;;  %v7920_v57 = vld [vmem:[#allocation23_spill] sm:$0xff]  ;;  %v3295_v26 = vsel %vm3189_vm5, %v3263_v8, 0.0 }
 0x236   : > { %3376 = vst.msk [vmem:[%s5825_s19 + $0x50] sm:$0xff] %vm3189_vm5, %v6941_v21  ;;  %3377 = vst.msk [vmem:[%s5825_s19 + $0x58] sm:$0xff] %vm3189_vm5, %v6939_v0  ;;  %5241 = vmatprep.mubr.msk.f32.mxu1 %vm582_vm2, %v7914_v23  ;;  %v3196_v24 = vadd.f32 %v3195_v30, %v3194_v47  ;;  %v3211_v49 = vsel %vm3189_vm5, %v6939_v0, 0.0  ;;  %v3296_v31 = vsel %vm3189_vm5, %v3264_v5, 0.0  ;;  %v3298_v32 = vsel %vm3189_vm5, %v3265_v11, 0.0  ;;  %v7921_v30 = vld [vmem:[#allocation24_spill] sm:$0xff] }
 0x237   : > { %3378 = vst.msk [vmem:[%s5825_s19 + $0x60] sm:$0xff] %vm3189_vm5, %v6945_v59  ;;  %3379 = vst.msk [vmem:[%s5825_s19 + $0x68] sm:$0xff] %vm3189_vm5, %v6943_v53  ;;  %v3297_v63 = vadd.f32 %v3296_v31, %v3295_v26  ;;  %v3213_v2 = vsel %vm3189_vm5, %v6945_v59, 0.0  ;;  %v3268_v47 = vmul.f32 %v6927_v38, %v6927_v38  ;;  %v3300_v54 = vsel %vm3189_vm5, %v3266_v18, 0.0  ;;  %v7925_v5 = vld [vmem:[#allocation28_spill] sm:$0xff] }
 0x238   : > { %3380 = vst.msk [vmem:[%s5825_s19 + $0x70] sm:$0xff] %vm3189_vm5, %v6949_v10  ;;  %3381 = vst.msk [vmem:[%s5825_s19 + $0x78] sm:$0xff] %vm3189_vm5, %v6947_v34  ;;  %v3198_v27 = vadd.f32 %v3197_v36, %v3196_v24  ;;  %v7922_v36 = vld [vmem:[#allocation25_spill] sm:$0xff]  ;;  %v3215_v24 = vsel %vm3189_vm5, %v6943_v53, 0.0  ;;  %v3217_v38 = vsel %vm3189_vm5, %v6949_v10, 0.0  ;;  %v3272_v11 = vmul.f32 %v6935_v4, %v6935_v4 }
 0x239   : > { %3382 = vst.msk [vmem:[%s5825_s19 + $0x80] sm:$0xff] %vm3189_vm5, %v6953_v9  ;;  %3383 = vst.msk [vmem:[%s5825_s19 + $0x88] sm:$0xff] %vm3189_vm5, %v6951_v56  ;;  %5242 = vmatmul.mubr.msk.f32.gmra.mrb[34].mxu1 %vm582_vm2, %v7915_v40  ;;  %v3299_v23 = vadd.f32 %v3298_v32, %v3297_v63  ;;  %v3223_v18 = vsel %vm3189_vm5, %v6951_v56, 0.0  ;;  %v3225_v4 = vsel %vm3189_vm5, %v6957_v22, 0.0  ;;  %v3274_v31 = vmul.f32 %v6939_v0, %v6939_v0 }
 0x23a   : > { %3384 = vst.msk [vmem:[%s5825_s19 + $0x90] sm:$0xff] %vm3189_vm5, %v6957_v22  ;;  %3385 = vst.msk [vmem:[%s5825_s19 + $0x98] sm:$0xff] %vm3189_vm5, %v6955_v55  ;;  %5244 = vmatprep.mubr.msk.f32.mxu1 %vm582_vm2, %v7916_v1  ;;  %v3200_v6 = vadd.f32 %v3199_v20, %v3198_v27  ;;  %v3269_v20 = vmul.f32 %v6933_v37, %v6933_v37  ;;  %v3302_v27 = vsel %vm3189_vm5, %v3267_v17, 0.0  ;;  %v7923_v1 = vld [vmem:[#allocation26_spill] sm:$0xff]  ;;  %v3312_v32 = vsel %vm3189_vm5, %v3272_v11, 0.0 }
 0x23b   : > { %3386 = vst.msk [vmem:[%s5825_s19 + $0xa0] sm:$0xff] %vm3189_vm5, %v6961_v61  ;;  %3387 = vst.msk [vmem:[%s5825_s19 + $0xa8] sm:$0xff] %vm3189_vm5, %v6959_v44  ;;  %v7927_v17 = vld [vmem:[#allocation30_spill] sm:$0xff]  ;;  %v3229_v0 = vsel %vm3189_vm5, %v6961_v61, 0.0  ;;  %v3280_v11 = vmul.f32 %v6951_v56, %v6951_v56  ;;  %v3241_v56 = vsel %vm3189_vm5, %v6973_v58, 0.0  ;;  %vm3260_vm6 = vcmask 57344  }
 0x23c   : > { %3388 = vst.msk [vmem:[%s5825_s19 + $0xb0] sm:$0xff] %vm3189_vm5, %v6965_v52  ;;  %3389 = vst.msk [vmem:[%s5825_s19 + $0xb8] sm:$0xff] %vm3189_vm5, %v6963_v14  ;;  %v3202_v62 = vadd.f32 %v3201_v48, %v3200_v6  ;;  %v3301_v48 = vadd.f32 %v3300_v54, %v3299_v23  ;;  %v3270_v6 = vmul.f32 %v6931_v28, %v6931_v28  ;;  %v3221_v28 = vsel %vm3189_vm5, %v6953_v9, 0.0 }
 0x23d   : > { %3390 = vst.msk [vmem:[%s5825_s19 + $0xc0] sm:$0xff] %vm3189_vm5, %v6969_v42  ;;  %3391 = vst.msk [vmem:[%s5825_s19 + $0xc8] sm:$0xff] %vm3189_vm5, %v6967_v16  ;;  %5245 = vmatmul.mubr.msk.f32.gmra.mrb[36].mxu1 %vm582_vm2, %v7917_v33  ;;  %v3276_v23 = vmul.f32 %v6943_v53, %v6943_v53  ;;  %v3233_v53 = vsel %vm3189_vm5, %v6965_v52, 0.0 }
 0x23e   : > { %3392 = vst.msk [vmem:[%s5825_s19 + $0xd0] sm:$0xff] %vm3189_vm5, %v6973_v58  ;;  %3393 = vst.msk [vmem:[%s5825_s19 + $0xd8] sm:$0xff] %vm3189_vm5, %v6971_v50  ;;  %5247 = vmatprep.mubr.msk.f32.mxu1 %vm582_vm2, %v7918_v51  ;;  %v3204_v43 = vadd.f32 %v3203_v29, %v3202_v62  ;;  %v3304_v29 = vsel %vm3189_vm5, %v3268_v47, 0.0  ;;  %v7924_v62 = vld [vmem:[#allocation27_spill] sm:$0xff]  ;;  %v3303_v37 = vadd.f32 %v3302_v27, %v3301_v48 }
 0x23f   : > { %3394 = vst.msk [vmem:[%s5825_s19 + $0xe0] sm:$0xff] %vm3189_vm5, %v6977_v19  ;;  %3395 = vst.msk [vmem:[%s5825_s19 + $0xe8] sm:$0xff] %vm3189_vm5, %v6975_v3  ;;  %v3271_v51 = vmul.f32 %v6937_v12, %v6937_v12  ;;  %v3277_v48 = vmul.f32 %v6949_v10, %v6949_v10 }
 0x240   : > { %3396 = vst.msk [vmem:[%s5825_s19 + $0xf0] sm:$0xff] %vm3189_vm5, %v6983_v45  ;;  %3397 = vst.msk [vmem:[%s5825_s19 + $0xf8] sm:$0xff] %vm3189_vm5, %v6980_v39  ;;  %v3206_v46 = vadd.f32 %v3205_v7, %v3204_v43  ;;  %v3219_v7 = vsel %vm3189_vm5, %v6947_v34, 0.0  ;;  %v3306_v43 = vsel %vm3189_vm5, %v3269_v20, 0.0  ;;  %v7930_v20 = vld [vmem:[#allocation33_spill] sm:$0xff] }
 0x241   : > { %5248 = vmatmul.mubr.msk.f32.gmra.mrb[38].mxu1 %vm582_vm2, %v7919_v35  ;;  %v7926_v35 = vld [vmem:[#allocation29_spill] sm:$0xff] }
 0x242   : > { %5250 = vmatprep.mubr.msk.f32.mxu1 %vm582_vm2, %v7920_v57  ;;  %v3208_v25 = vadd.f32 %v3207_v13, %v3206_v46  ;;  %v3305_v13 = vadd.f32 %v3304_v29, %v3303_v37  ;;  %v3308_v46 = vsel %vm3189_vm5, %v3270_v6, 0.0  ;;  %v3273_v57 = vmul.f32 %v6941_v21, %v6941_v21  ;;  %v7931_v29 = vld [vmem:[#allocation34_spill] sm:$0xff]  ;;  %v7932_v37 = vld [vmem:[#allocation35_spill] sm:$0xff] }
 0x244   : > { %v3210_v41 = vadd.f32 %v3209_v15, %v3208_v25  ;;  %v3307_v12 = vadd.f32 %v3306_v43, %v3305_v13  ;;  %v3310_v25 = vsel %vm3189_vm5, %v3271_v51, 0.0  ;;  %v3314_v47 = vsel %vm3189_vm5, %v3273_v57, 0.0 }
 0x245   : > { %5251 = vmatmul.mubr.msk.f32.gmra.mrb[40].mxu1 %vm582_vm2, %v7921_v30  ;;  %v3227_v30 = vsel %vm3189_vm5, %v6955_v55, 0.0  ;;  %v3235_v51 = vsel %vm3189_vm5, %v6963_v14, 0.0  ;;  %v3279_v43 = vmul.f32 %v6953_v9, %v6953_v9 }
 0x246   : > { %5253 = vmatprep.mubr.msk.f32.mxu1 %vm582_vm2, %v7922_v36  ;;  %v3212_v60 = vadd.f32 %v3211_v49, %v3210_v41  ;;  %v3309_v49 = vadd.f32 %v3308_v46, %v3307_v12  ;;  %v7928_v41 = vld [vmem:[#allocation31_spill] sm:$0xff]  ;;  %v3239_v12 = vsel %vm3189_vm5, %v6967_v16, 0.0 }
 0x247   : > { %v3326_v57 = vsel %vm3189_vm5, %v3279_v43, 0.0 }
 0x248   : > { %v3214_v40 = vadd.f32 %v3213_v2, %v3212_v60  ;;  %v3311_v21 = vadd.f32 %v3310_v25, %v3309_v49  ;;  %v3275_v2 = vmul.f32 %v6945_v59, %v6945_v59  ;;  %v7929_v60 = vld [vmem:[#allocation32_spill] sm:$0xff]  ;;  %v7935_v49 = vld [vmem:[#allocation38_spill] sm:$0xff] }
 0x249   : > { %5254 = vmatmul.mubr.msk.f32.gmra.mrb[42].mxu1 %vm582_vm2, %v7923_v1 }
 0x24a   : > { %5256 = vmatprep.mubr.msk.f32.mxu1 %vm582_vm2, %v7924_v62  ;;  %v3216_v33 = vadd.f32 %v3215_v24, %v3214_v40  ;;  %v3313_v36 = vadd.f32 %v3312_v32, %v3311_v21  ;;  %v3316_v24 = vsel %vm3189_vm5, %v3274_v31, 0.0  ;;  %v3231_v40 = vsel %vm3189_vm5, %v6959_v44, 0.0  ;;  %v7936_v31 = vld [vmem:[#allocation39_spill] sm:$0xff] }
 0x24b   : > { %v3318_v1 = vsel %vm3189_vm5, %v3275_v2, 0.0  ;;  %v3278_v62 = vmul.f32 %v6947_v34, %v6947_v34  ;;  %v3237_v34 = vsel %vm3189_vm5, %v6969_v42, 0.0 }
 0x24c   : > { %v3218_v8 = vadd.f32 %v3217_v38, %v3216_v33  ;;  %v3315_v59 = vadd.f32 %v3314_v47, %v3313_v36  ;;  %v3320_v33 = vsel %vm3189_vm5, %v3276_v23, 0.0  ;;  %v7937_v47 = vld [vmem:[#allocation40_spill] sm:$0xff]  ;;  %v3247_v23 = vsel %vm3189_vm5, %v6975_v3, 0.0 }
 0x24d   : > { %5257 = vmatmul.mubr.msk.f32.gmra.mrb[44].mxu1 %vm582_vm2, %v7925_v5  ;;  %v3324_v46 = vsel %vm3189_vm5, %v3278_v62, 0.0 }
 0x24e   : > { %5259 = vmatprep.mubr.msk.f32.mxu1 %vm582_vm2, %v7926_v35  ;;  %v3220_v15 = vadd.f32 %v3219_v7, %v3218_v8  ;;  %v3317_v6 = vadd.f32 %v3316_v24, %v3315_v59  ;;  %v3322_v8 = vsel %vm3189_vm5, %v3277_v48, 0.0  ;;  %v7934_v35 = vld [vmem:[#allocation37_spill] sm:$0xff]  ;;  %v3285_v24 = vmul.f32 %v6965_v52, %v6965_v52 }
 0x24f   : > { %v3286_v48 = vmul.f32 %v6963_v14, %v6963_v14  ;;  %v3288_v14 = vmul.f32 %v6967_v16, %v6967_v16  ;;  %v3290_v16 = vmul.f32 %v6971_v50, %v6971_v50 }
 0x250   : > { %v3222_v26 = vadd.f32 %v3221_v28, %v3220_v15  ;;  %v3319_v10 = vadd.f32 %v3318_v1, %v3317_v6  ;;  %v7933_v28 = vld [vmem:[#allocation36_spill] sm:$0xff]  ;;  %v3338_v62 = vsel %vm3189_vm5, %v3285_v24, 0.0 }
 0x251   : > { %5260 = vmatmul.mubr.msk.f32.gmra.mrb[46].mxu1 %vm582_vm2, %v7927_v17  ;;  %v3282_v17 = vmul.f32 %v6955_v55, %v6955_v55  ;;  %v3245_v55 = vsel %vm3189_vm5, %v6977_v19, 0.0 }
 0x252   : > { %5262 = vmatprep.mubr.msk.f32.mxu1 %vm582_vm2, %v7928_v41  ;;  %v3224_v63 = vadd.f32 %v3223_v18, %v3222_v26  ;;  %v3321_v5 = vadd.f32 %v3320_v33, %v3319_v10  ;;  %v3281_v18 = vmul.f32 %v6957_v22, %v6957_v22  ;;  %v3243_v41 = vsel %vm3189_vm5, %v6971_v50, 0.0 }
 0x253   : > { %v3332_v36 = vsel %vm3189_vm5, %v3282_v17, 0.0  ;;  %v3340_v10 = vsel %vm3189_vm5, %v3286_v48, 0.0  ;;  %v3293_v50 = vmul.f32 %v6983_v45, %v6983_v45 }
 0x254   : > { %v3226_v54 = vadd.f32 %v3225_v4, %v3224_v63  ;;  %v3323_v9 = vadd.f32 %v3322_v8, %v3321_v5  ;;  %v3328_v4 = vsel %vm3189_vm5, %v3280_v11, 0.0  ;;  %v3283_v63 = vmul.f32 %v6961_v61, %v6961_v61 }
 0x255   : > { %5263 = vmatmul.mubr.msk.f32.gmra.mrb[48].mxu1 %vm582_vm2, %v7929_v60  ;;  %v3330_v21 = vsel %vm3189_vm5, %v3281_v18, 0.0  ;;  %v7938_v60 = vld [vmem:[#allocation41_spill] sm:$0xff]  ;;  %v3344_v11 = vsel %vm3189_vm5, %v3288_v14, 0.0  ;;  %v3292_v18 = vmul.f32 %v6975_v3, %v6975_v3  ;;  %v3354_v3 = vsel %vm3189_vm5, %v3293_v50, 0.0 }
 0x256   : > { %5265 = vmatprep.mubr.msk.f32.mxu1 %vm582_vm2, %v7930_v20  ;;  %v3228_v27 = vadd.f32 %v3227_v30, %v3226_v54  ;;  %v3325_v26 = vadd.f32 %v3324_v46, %v3323_v9  ;;  %v3284_v54 = vmul.f32 %v6959_v44, %v6959_v44  ;;  %v3334_v20 = vsel %vm3189_vm5, %v3283_v63, 0.0 }
 0x257   : > { %v3249_v44 = vsel %vm3189_vm5, %v6983_v45, 0.0 }
 0x258   : > { %v3230_v38 = vadd.f32 %v3229_v0, %v3228_v27  ;;  %v3327_v22 = vadd.f32 %v3326_v57, %v3325_v26  ;;  %v3336_v1 = vsel %vm3189_vm5, %v3284_v54, 0.0  ;;  %v3348_v57 = vsel %vm3189_vm5, %v3290_v16, 0.0 }
 0x259   : > { %5266 = vmatmul.mubr.msk.f32.gmra.mrb[50].mxu1 %vm582_vm2, %v7931_v29  ;;  %v3251_v29 = vsel %vm3189_vm5, %v6980_v39, 0.0 }
 0x25a   : > { %5268 = vmatprep.mubr.msk.f32.mxu1 %vm582_vm2, %v7932_v37  ;;  %v3232_v7 = vadd.f32 %v3231_v40, %v3230_v38  ;;  %v3329_v2 = vadd.f32 %v3328_v4, %v3327_v22  ;;  %v7939_v40 = vld [vmem:[#allocation44_spill] sm:$0xff]  ;;  %v7940_v38 = vld [vmem:[#allocation45_spill] sm:$0xff]  ;;  %v3188_v4 = vld [vmem:[#allocation2] sm:$0x1] }
 0x25c   : > { %v3234_v13 = vadd.f32 %v3233_v53, %v3232_v7  ;;  %v3331_v61 = vadd.f32 %v3330_v21, %v3329_v2  ;;  %v3287_v53 = vmul.f32 %v6969_v42, %v6969_v42  ;;  %v7941_v7 = vld [vmem:[#allocation46_spill] sm:$0xff]  ;;  %v3289_v42 = vmul.f32 %v6973_v58, %v6973_v58 }
 0x25d   : > { %5269 = vmatmul.mubr.msk.f32.gmra.mrb[52].mxu1 %vm582_vm2, %v7933_v28 }
 0x25e   : > { %5271 = vmatprep.mubr.msk.f32.mxu1 %vm582_vm2, %v7934_v35  ;;  %v3236_v15 = vadd.f32 %v3235_v51, %v3234_v13  ;;  %v3333_v59 = vadd.f32 %v3332_v36, %v3331_v61  ;;  %v7942_v51 = vld [vmem:[#allocation47_spill] sm:$0xff]  ;;  %v3342_v13 = vsel %vm3189_vm5, %v3287_v53, 0.0  ;;  %v3346_v9 = vsel %vm3189_vm5, %v3289_v42, 0.0 }
 0x25f   : > { %v3262_v36 = vld [vmem:[#allocation4] sm:$0x1] }
 0x260   : > { %v3238_v25 = vadd.f32 %v3237_v34, %v3236_v15  ;;  %v3335_v52 = vadd.f32 %v3334_v20, %v3333_v59  ;;  %v7943_v34 = vld [vmem:[#allocation48_spill] sm:$0xff]  ;;  %v3291_v15 = vmul.f32 %v6977_v19, %v6977_v19  ;;  %v3294_v19 = vmul.f32 %v6980_v39, %v6980_v39 }
 0x261   : > { %5272 = vmatmul.mubr.msk.f32.gmra.mrb[54].mxu1 %vm582_vm2, %v7935_v49 }
 0x262   : > { %5274 = vmatprep.mubr.msk.f32.mxu1 %vm582_vm2, %v7936_v31  ;;  %v3240_v32 = vadd.f32 %v3239_v12, %v3238_v25  ;;  %v3337_v37 = vadd.f32 %v3336_v1, %v3335_v52  ;;  %v3350_v49 = vsel %vm3189_vm5, %v3291_v15, 0.0  ;;  %v3352_v31 = vsel %vm3189_vm5, %v3292_v18, 0.0 }
 0x263   : > { %v3356_v21 = vsel %vm3189_vm5, %v3294_v19, 0.0 }
 0x264   : > { %v3242_v30 = vadd.f32 %v3241_v56, %v3240_v32  ;;  %v3339_v8 = vadd.f32 %v3338_v62, %v3337_v37 }
 0x265   : > { %5275 = vmatmul.mubr.msk.f32.gmra.mrb[56].mxu1 %vm582_vm2, %v7937_v47 }
 0x266   : > { %5277 = vmatprep.mubr.msk.f32.mxu1 %vm582_vm2, %v7938_v60  ;;  %v3244_v0 = vadd.f32 %v3243_v41, %v3242_v30  ;;  %v3341_v28 = vadd.f32 %v3340_v10, %v3339_v8 }
 0x268   : > { %v3246_v27 = vadd.f32 %v3245_v55, %v3244_v0  ;;  %v3343_v35 = vadd.f32 %v3342_v13, %v3341_v28 }
 0x269   : > { %5278 = vmatmul.mubr.msk.f32.gmra.mrb[58].mxu1 %vm582_vm2, %v7939_v40 }
 0x26a   : > { %5280 = vmatprep.mubr.msk.f32.mxu1 %vm582_vm2, %v7940_v38  ;;  %v3248_v6 = vadd.f32 %v3247_v23, %v3246_v27  ;;  %v3345_v12 = vadd.f32 %v3344_v11, %v3343_v35  ;;  %v5738_v35 = vmov (!%p4409_p5), 0.0  }
 0x26b   : > { %3630 = vst.msk [vmem:[#allocation6] sm:$0x1] (!%p4409_p5), %vm3260_vm6, %v5738_v35  ;;  %3631 = vst.msk [vmem:[#allocation7] sm:$0x1] (!%p4409_p5), %vm3260_vm6, %v5738_v35 }
 0x26c   : > { %v3250_v33 = vadd.f32 %v3249_v44, %v3248_v6  ;;  %v3347_v26 = vadd.f32 %v3346_v9, %v3345_v12 }
 0x26d   : > { %5281 = vmatmul.mubr.msk.f32.gmra.mrb[60].mxu1 %vm582_vm2, %v7941_v7 }
 0x26e   : > { %5283 = vmatprep.mubr.msk.f32.mxu1 %vm582_vm2, %v7942_v51  ;;  %v3252_v43 = vadd.f32 %v3251_v29, %v3250_v33  ;;  %v3349_v17 = vadd.f32 %v3348_v57, %v3347_v26 }
 0x270   : > { %v3253_v5 = vrot.slane %v3252_v43, 4  ;;  %v3351_v22 = vadd.f32 %v3350_v49, %v3349_v17 }
 0x271   : > { %5284 = vmatmul.mubr.msk.f32.gmra.mrb[62].mxu1 %vm582_vm2, %v7943_v34 }
 0x272   : > { %v3254_v46 = vadd.f32 %v3253_v5, %v3252_v43  ;;  %v3353_v63 = vadd.f32 %v3352_v31, %v3351_v22 }
 0x274   : > { %v3255_v58 = vrot.slane %v3254_v46, 2  ;;  %v3355_v45 = vadd.f32 %v3354_v3, %v3353_v63 }
 0x276   : > { %v3256_v25 = vadd.f32 %v3255_v58, %v3254_v46  ;;  %v3357_v30 = vadd.f32 %v3356_v21, %v3355_v45 }
 0x278   : > { %v3257_v56 = vrot.slane %v3256_v25, 1  ;;  %v3358_v2 = vrot.slane %v3357_v30, 4 }
 0x27a   : > { %v3258_v32 = vadd.f32 %v3257_v56, %v3256_v25  ;;  %v3359_v47 = vadd.f32 %v3358_v2, %v3357_v30 }
 0x27c   : > { %v3259_v41 = vadd.f32 %v3258_v32, %v3188_v4  ;;  %v3360_v55 = vrot.slane %v3359_v47, 2 }
 0x27e   : > { %3261 = vst.msk [vmem:[#allocation2] sm:$0x1] %vm3260_vm6, %v3259_v41  ;;  %v3361_v54 = vadd.f32 %v3360_v55, %v3359_v47 }
 0x280   : > { %v3362_v39 = vrot.slane %v3361_v54, 1 }
 0x282   : > { %v3363_v60 = vadd.f32 %v3362_v39, %v3361_v54 }
 0x284   : > { %v3364_v0 = vadd.f32 %v3363_v60, %v3262_v36 }
 0x286   : > { %3365 = vst.msk [vmem:[#allocation4] sm:$0x1] %vm3260_vm6, %v3364_v0 }
 0x308   : > { %v7315_v61 = vpop.f32.mrb[32].mxu1 }
 0x309   : > { %v7317_v23 = vpop.f32.mrb[33].mxu1 }
 0x30c   : > { %v7319_v24 = vpop.f32.mrb[34].mxu1 }
 0x30d   : > { %v7321_v20 = vpop.f32.mrb[35].mxu1 }
 0x310   : > { %v7323_v27 = vpop.f32.mrb[36].mxu1 }
 0x311   : > { %v7325_v59 = vpop.f32.mrb[37].mxu1 }
 0x314   : > { %v7327_v40 = vpop.f32.mrb[38].mxu1 }
 0x315   : > { %v7329_v44 = vpop.f32.mrb[39].mxu1 }
 0x318   : > { %v7331_v48 = vpop.f32.mrb[40].mxu1 }
 0x319   : > { %v7333_v1 = vpop.f32.mrb[41].mxu1 }
 0x31c   : > { %v7335_v38 = vpop.f32.mrb[42].mxu1 }
 0x31d   : > { %v7337_v6 = vpop.f32.mrb[43].mxu1 }
 0x320   : > { %v7339_v52 = vpop.f32.mrb[44].mxu1 }
 0x321   : > { %v7341_v29 = vpop.f32.mrb[45].mxu1 }
 0x324   : > { %v7343_v53 = vpop.f32.mrb[46].mxu1 }
 0x325   : > { %v7345_v62 = vpop.f32.mrb[47].mxu1 }
 0x328   : > { %v7347_v33 = vpop.f32.mrb[48].mxu1 }
 0x329   : > { %v7349_v37 = vpop.f32.mrb[49].mxu1 }
 0x32c   : > { %v7351_v7 = vpop.f32.mrb[50].mxu1 }
 0x32d   : > { %v7353_v14 = vpop.f32.mrb[51].mxu1 }
 0x330   : > { %v7355_v10 = vpop.f32.mrb[52].mxu1 }
 0x331   : > { %v7357_v51 = vpop.f32.mrb[53].mxu1 }
 0x334   : > { %v7359_v43 = vpop.f32.mrb[54].mxu1 }
 0x335   : > { %v7361_v8 = vpop.f32.mrb[55].mxu1 }
 0x338   : > { %v7363_v42 = vpop.f32.mrb[56].mxu1 }
 0x339   : > { %v7365_v13 = vpop.f32.mrb[57].mxu1 }
 0x33c   : > { %v7367_v5 = vpop.f32.mrb[58].mxu1 }
 0x33d   : > { %v7369_v28 = vpop.f32.mrb[59].mxu1 }
 0x33f   : > { %3629 = sbr.rel (%p4409_p5) target bundleno = 838 (0x346), region = 40 }
 0x340   : > { %v7371_v34 = vpop.f32.mrb[60].mxu1 }
 0x341   : > { %v7373_v16 = vpop.f32.mrb[61].mxu1 }
 0x344   : > { %v7375_v11 = vpop.f32.mrb[62].mxu1 }
 0x345   : > { %v7377_v46 = vpop.f32.mrb[63].mxu1 }
 0x346 PF: > { %v3633_v15 = vsel %vm3189_vm5, %v7317_v23, 0.0  ;;  %v3634_v9 = vsel %vm3189_vm5, %v7315_v61, 0.0  ;;  %v3636_v58 = vsel %vm3189_vm5, %v7321_v20, 0.0  ;;  %3808 = vst.msk [vmem:[%s5830_s22] sm:$0xff] %vm3189_vm5, %v7317_v23  ;;  %3809 = vst.msk [vmem:[%s5830_s22 + $0x8] sm:$0xff] %vm3189_vm5, %v7315_v61  ;;  %p7487_p6 = scmp.eq.s32.totalorder %s4100_s30, 1 }
 0x347   : > { %3810 = vst.msk [vmem:[%s5830_s22 + $0x10] sm:$0xff] %vm3189_vm5, %v7321_v20  ;;  %3811 = vst.msk [vmem:[%s5830_s22 + $0x18] sm:$0xff] %vm3189_vm5, %v7319_v24  ;;  %v3635_v12 = vadd.f32 %v3634_v9, %v3633_v15  ;;  %v3638_v18 = vsel %vm3189_vm5, %v7319_v24, 0.0  ;;  %s5739_s17 = smov [#allocation4]   ;;  %v3640_v25 = vsel %vm3189_vm5, %v7325_v59, 0.0  ;;  %s5740_s19 = smov [#allocation2]  }
 0x348   : > { %3812 = vst.msk [vmem:[%s5830_s22 + $0x20] sm:$0xff] %vm3189_vm5, %v7325_v59  ;;  %3813 = vst.msk [vmem:[%s5830_s22 + $0x28] sm:$0xff] %vm3189_vm5, %v7323_v27  ;;  %s3881_s18 = sshll.u32 %s5739_s17, 4  ;;  %s3868_s20 = sshll.u32 %s5740_s19, 4  ;;  %s3882_s18 = int_to_ptr.vmem [resolvable:$true] %s3881_s18  ;;  %s3869_s20 = int_to_ptr.vmem [resolvable:$true] %s3868_s20 }
 0x349   : > { %3814 = vst.msk [vmem:[%s5830_s22 + $0x30] sm:$0xff] %vm3189_vm5, %v7329_v44  ;;  %3815 = vst.msk [vmem:[%s5830_s22 + $0x38] sm:$0xff] %vm3189_vm5, %v7327_v40  ;;  %v3637_v57 = vadd.f32 %v3636_v58, %v3635_v12  ;;  %s5597_s21 = scalar_lea.vmem %s3882_s18, 16  ;;  %s5603_s30 = scalar_lea.vmem %s3882_s18, 32 }
 0x34a   : > { %3816 = vst.msk [vmem:[%s5830_s22 + $0x40] sm:$0xff] %vm3189_vm5, %v7333_v1  ;;  %3817 = vst.msk [vmem:[%s5830_s22 + $0x48] sm:$0xff] %vm3189_vm5, %v7331_v48  ;;  %p5598_p7 = scmp.ne.s32.totalorder %s3882_s18, %s5597_s21  ;;  %p5604_p10 = scmp.lt.s32.totalorder %s3882_s18, %s3882_s18 }
 0x34b   : > { %3818 = vst.msk [vmem:[%s5830_s22 + $0x50] sm:$0xff] %vm3189_vm5, %v7337_v6  ;;  %3819 = vst.msk [vmem:[%s5830_s22 + $0x58] sm:$0xff] %vm3189_vm5, %v7335_v38  ;;  %v3639_v26 = vadd.f32 %v3638_v18, %v3637_v57  ;;  %p5605_p11 = scmp.lt.s32.totalorder %s5603_s30, %s5597_s21 }
 0x34c   : > { %3820 = vst.msk [vmem:[%s5830_s22 + $0x60] sm:$0xff] %vm3189_vm5, %v7341_v29  ;;  %3821 = vst.msk [vmem:[%s5830_s22 + $0x68] sm:$0xff] %vm3189_vm5, %v7339_v52  ;;  %p5599_p8 = pnand %p5598_p7, %p7487_p6 }
 0x34d   : > { %3822 = vst.msk [vmem:[%s5830_s22 + $0x70] sm:$0xff] %vm3189_vm5, %v7345_v62  ;;  %3823 = vst.msk [vmem:[%s5830_s22 + $0x78] sm:$0xff] %vm3189_vm5, %v7343_v53  ;;  %p5606_p12 = por %p5605_p11, %p5604_p10 }
 0x34e   : > { %3824 = vst.msk [vmem:[%s5830_s22 + $0x80] sm:$0xff] %vm3189_vm5, %v7349_v37  ;;  %3825 = vst.msk [vmem:[%s5830_s22 + $0x88] sm:$0xff] %vm3189_vm5, %v7347_v33  ;;  %p5600_p9 = pneg %p5599_p8 }
 0x34f   : > { %3826 = vst.msk [vmem:[%s5830_s22 + $0x90] sm:$0xff] %vm3189_vm5, %v7353_v14  ;;  %3827 = vst.msk [vmem:[%s5830_s22 + $0x98] sm:$0xff] %vm3189_vm5, %v7351_v7 }
 0x350   : > { %3828 = vst.msk [vmem:[%s5830_s22 + $0xa0] sm:$0xff] %vm3189_vm5, %v7357_v51  ;;  %3829 = vst.msk [vmem:[%s5830_s22 + $0xa8] sm:$0xff] %vm3189_vm5, %v7355_v10  ;;  %p5607_p13 = pnand %p5606_p12, %p5600_p9 }
 0x351   : > { %3830 = vst.msk [vmem:[%s5830_s22 + $0xb0] sm:$0xff] %vm3189_vm5, %v7361_v8  ;;  %3831 = vst.msk [vmem:[%s5830_s22 + $0xb8] sm:$0xff] %vm3189_vm5, %v7359_v43 }
 0x352   : > { %3832 = vst.msk [vmem:[%s5830_s22 + $0xc0] sm:$0xff] %vm3189_vm5, %v7365_v13  ;;  %3833 = vst.msk [vmem:[%s5830_s22 + $0xc8] sm:$0xff] %vm3189_vm5, %v7363_v42 }
 0x353   : > { %3834 = vst.msk [vmem:[%s5830_s22 + $0xd0] sm:$0xff] %vm3189_vm5, %v7369_v28  ;;  %3835 = vst.msk [vmem:[%s5830_s22 + $0xd8] sm:$0xff] %vm3189_vm5, %v7367_v5 }
 0x354   : > { %3836 = vst.msk [vmem:[%s5830_s22 + $0xe0] sm:$0xff] %vm3189_vm5, %v7373_v16  ;;  %3837 = vst.msk [vmem:[%s5830_s22 + $0xe8] sm:$0xff] %vm3189_vm5, %v7371_v34 }
 0x355   : > { %3838 = vst.msk [vmem:[%s5830_s22 + $0xf0] sm:$0xff] %vm3189_vm5, %v7377_v46  ;;  %3839 = vst.msk [vmem:[%s5830_s22 + $0xf8] sm:$0xff] %vm3189_vm5, %v7375_v11 }
 0x356   : > { %5610 = shalt.err (!%p5607_p13)
}
 0x357   : > { %s5611_s24 = scalar_lea.hbm %s7745_s5, 16 }
 0x358   : > { %p5612_p0 = scmp.ne.s32.totalorder %s7745_s5, %s5611_s24  ;;  %p5617_p3 = scmp.lt.u32.totalorder %s5611_s24, %s7745_s5 }
 0x35a   : > { %p5613_p1 = pnand %p5612_p0, %p7487_p6 }
 0x35c   : > { %p5614_p2 = pneg %p5613_p1 }
 0x35e   : > { %p5619_p4 = pnand %p5617_p3, %p5614_p2 }
 0x360   : > { %5622 = shalt.err (!%p5619_p4)
}
 0x361   : > { %5546 = dma.vmem_to_hbm [thread:$0]  (%p7487_p6), %s3882_s18, 16, %s7745_s5, [#allocation5]   ;;  %v3642_v50 = vsel %vm3189_vm5, %v7323_v27, 0.0  ;;  %v3641_v49 = vadd.f32 %v3640_v25, %v3639_v26 }
 0x362   : > { %s5623_s14 = scalar_lea.vmem %s3869_s20, 16  ;;  %s5629_s15 = scalar_lea.vmem %s3869_s20, 32 }
 0x363   : > { %p5624_p5 = scmp.ne.s32.totalorder %s3869_s20, %s5623_s14  ;;  %p5630_p9 = scmp.lt.s32.totalorder %s3869_s20, %s3869_s20 }
 0x364   : > { %p5631_p10 = scmp.lt.s32.totalorder %s5629_s15, %s5623_s14 }
 0x365   : > { %p5625_p7 = pnand %p5624_p5, %p7487_p6 }
 0x366   : > { %p5632_p11 = por %p5631_p10, %p5630_p9 }
 0x367   : > { %p5626_p8 = pneg %p5625_p7 }
 0x369   : > { %p5633_p12 = pnand %p5632_p11, %p5626_p8 }
 0x36b   : > { %5636 = shalt.err (!%p5633_p12)
}
 0x36c   : > { %s5637_s18 = scalar_lea.hbm %s7744_s4, 16 }
 0x36d   : > { %p5638_p13 = scmp.ne.s32.totalorder %s7744_s4, %s5637_s18  ;;  %p5643_p2 = scmp.lt.u32.totalorder %s5637_s18, %s7744_s4 }
 0x36f   : > { %p5639_p0 = pnand %p5638_p13, %p7487_p6 }
 0x371   : > { %p5640_p1 = pneg %p5639_p0 }
 0x373   : > { %p5645_p3 = pnand %p5643_p2, %p5640_p1 }
 0x375   : > { %5648 = shalt.err (!%p5645_p3)
}
 0x376   : > { %5544 = dma.vmem_to_hbm [thread:$0]  (%p7487_p6), %s3869_s20, 16, %s7744_s4, [#allocation3]   ;;  %v3644_v56 = vsel %vm3189_vm5, %v7329_v44, 0.0  ;;  %v3643_v17 = vadd.f32 %v3642_v50, %v3641_v49  ;;  %v3646_v4 = vsel %vm3189_vm5, %v7327_v40, 0.0  ;;  %v3648_v31 = vsel %vm3189_vm5, %v7333_v1, 0.0 }
 0x377   : > { %v3650_v22 = vsel %vm3189_vm5, %v7331_v48, 0.0  ;;  %v3705_v3 = vmul.f32 %v7317_v23, %v7317_v23  ;;  %v3706_v41 = vmul.f32 %v7315_v61, %v7315_v61  ;;  %v3707_v63 = vmul.f32 %v7321_v20, %v7321_v20  ;;  %s5741_s20 = smov [#allocation6]  }
 0x378   : > { %v3645_v19 = vadd.f32 %v3644_v56, %v3643_v17  ;;  %v3652_v45 = vsel %vm3189_vm5, %v7337_v6, 0.0  ;;  %v3708_v30 = vmul.f32 %v7319_v24, %v7319_v24  ;;  %v3654_v47 = vsel %vm3189_vm5, %v7335_v38, 0.0  ;;  %s3897_s25 = sshll.u32 %s5741_s20, 4  ;;  %s3898_s25 = int_to_ptr.vmem [resolvable:$true] %s3897_s25 }
 0x379   : > { %v3709_v55 = vmul.f32 %v7325_v59, %v7325_v59  ;;  %v3737_v54 = vsel %vm3189_vm5, %v3705_v3, 0.0  ;;  %v3738_v39 = vsel %vm3189_vm5, %v3706_v41, 0.0  ;;  %v3740_v36 = vsel %vm3189_vm5, %v3707_v63, 0.0  ;;  %s5649_s26 = scalar_lea.vmem %s3898_s25, 16  ;;  %s5655_s10 = scalar_lea.vmem %s3898_s25, 32 }
 0x37a   : > { %v3647_v32 = vadd.f32 %v3646_v4, %v3645_v19  ;;  %v3739_v0 = vadd.f32 %v3738_v39, %v3737_v54  ;;  %v3656_v61 = vsel %vm3189_vm5, %v7341_v29, 0.0  ;;  %v3710_v23 = vmul.f32 %v7323_v27, %v7323_v27  ;;  %p5650_p4 = scmp.ne.s32.totalorder %s3898_s25, %s5649_s26  ;;  %p5656_p8 = scmp.lt.s32.totalorder %s3898_s25, %s3898_s25 }
 0x37b   : > { %v3742_v24 = vsel %vm3189_vm5, %v3708_v30, 0.0  ;;  %v3658_v59 = vsel %vm3189_vm5, %v7339_v52, 0.0  ;;  %v3711_v15 = vmul.f32 %v7329_v44, %v7329_v44  ;;  %v3744_v9 = vsel %vm3189_vm5, %v3709_v55, 0.0  ;;  %p5657_p9 = scmp.lt.s32.totalorder %s5655_s10, %s5649_s26 }
 0x37c   : > { %v3649_v21 = vadd.f32 %v3648_v31, %v3647_v32  ;;  %v3741_v35 = vadd.f32 %v3740_v36, %v3739_v0  ;;  %v3660_v18 = vsel %vm3189_vm5, %v7345_v62, 0.0  ;;  %v3712_v27 = vmul.f32 %v7327_v40, %v7327_v40  ;;  %p5651_p5 = pnand %p5650_p4, %p7487_p6 }
 0x37d   : > { %v3746_v57 = vsel %vm3189_vm5, %v3710_v23, 0.0  ;;  %v3662_v50 = vsel %vm3189_vm5, %v7343_v53, 0.0  ;;  %v3713_v44 = vmul.f32 %v7333_v1, %v7333_v1  ;;  %v3748_v49 = vsel %vm3189_vm5, %v3711_v15, 0.0  ;;  %p5658_p10 = por %p5657_p9, %p5656_p8 }
 0x37e   : > { %v3651_v2 = vadd.f32 %v3650_v22, %v3649_v21  ;;  %v3743_v12 = vadd.f32 %v3742_v24, %v3741_v35  ;;  %v3664_v4 = vsel %vm3189_vm5, %v7349_v37, 0.0  ;;  %v3714_v40 = vmul.f32 %v7331_v48, %v7331_v48  ;;  %p5652_p7 = pneg %p5651_p5 }
 0x37f   : > { %v3750_v19 = vsel %vm3189_vm5, %v3712_v27, 0.0  ;;  %v3666_v22 = vsel %vm3189_vm5, %v7347_v33, 0.0  ;;  %v3715_v1 = vmul.f32 %v7337_v6, %v7337_v6  ;;  %v3752_v3 = vsel %vm3189_vm5, %v3713_v44, 0.0 }
 0x380   : > { %v3653_v60 = vadd.f32 %v3652_v45, %v3651_v2  ;;  %v3745_v26 = vadd.f32 %v3744_v9, %v3743_v12  ;;  %v3668_v21 = vsel %vm3189_vm5, %v7353_v14, 0.0  ;;  %v3716_v48 = vmul.f32 %v7335_v38, %v7335_v38  ;;  %p5659_p11 = pnand %p5658_p10, %p5652_p7 }
 0x381   : > { %v3754_v45 = vsel %vm3189_vm5, %v3714_v40, 0.0  ;;  %v3717_v6 = vmul.f32 %v7341_v29, %v7341_v29  ;;  %v3756_v55 = vsel %vm3189_vm5, %v3715_v1, 0.0  ;;  %v3672_v36 = vsel %vm3189_vm5, %v7357_v51, 0.0 }
 0x382   : > { %v3655_v20 = vadd.f32 %v3654_v47, %v3653_v60  ;;  %v3747_v17 = vadd.f32 %v3746_v57, %v3745_v26  ;;  %v3670_v47 = vsel %vm3189_vm5, %v7351_v7, 0.0  ;;  %v3718_v38 = vmul.f32 %v7339_v52, %v7339_v52 }
 0x383   : > { %v3758_v60 = vsel %vm3189_vm5, %v3716_v48, 0.0  ;;  %v3674_v23 = vsel %vm3189_vm5, %v7355_v10, 0.0  ;;  %v3719_v29 = vmul.f32 %v7345_v62, %v7345_v62  ;;  %v3760_v24 = vsel %vm3189_vm5, %v3717_v6, 0.0 }
 0x384   : > { %v3657_v58 = vadd.f32 %v3656_v61, %v3655_v20  ;;  %v3749_v32 = vadd.f32 %v3748_v49, %v3747_v17  ;;  %v3720_v52 = vmul.f32 %v7343_v53, %v7343_v53  ;;  %v3762_v15 = vsel %vm3189_vm5, %v3718_v38, 0.0 }
 0x385   : > { %v3678_v12 = vsel %vm3189_vm5, %v7359_v43, 0.0  ;;  %v3721_v62 = vmul.f32 %v7349_v37, %v7349_v37  ;;  %v3722_v53 = vmul.f32 %v7347_v33, %v7347_v33  ;;  %v3682_v49 = vsel %vm3189_vm5, %v7363_v42, 0.0 }
 0x386   : > { %v3659_v25 = vadd.f32 %v3658_v59, %v3657_v58  ;;  %v3751_v63 = vadd.f32 %v3750_v19, %v3749_v32  ;;  %v3676_v59 = vsel %vm3189_vm5, %v7361_v8, 0.0  ;;  %v3766_v26 = vsel %vm3189_vm5, %v3720_v52, 0.0 }
 0x387   : > { %v3723_v37 = vmul.f32 %v7353_v14, %v7353_v14  ;;  %v3684_v40 = vsel %vm3189_vm5, %v7369_v28, 0.0  ;;  %v3724_v33 = vmul.f32 %v7351_v7, %v7351_v7  ;;  %v3770_v19 = vsel %vm3189_vm5, %v3722_v53, 0.0 }
 0x388   : > { %v3661_v56 = vadd.f32 %v3660_v18, %v3659_v25  ;;  %v3753_v2 = vadd.f32 %v3752_v3, %v3751_v63  ;;  %v3764_v18 = vsel %vm3189_vm5, %v3719_v29, 0.0  ;;  %v3680_v25 = vsel %vm3189_vm5, %v7365_v13, 0.0 }
 0x389   : > { %v3725_v14 = vmul.f32 %v7357_v51, %v7357_v51  ;;  %v3772_v1 = vsel %vm3189_vm5, %v3723_v37, 0.0  ;;  %v3688_v63 = vsel %vm3189_vm5, %v7373_v16, 0.0  ;;  %v3726_v7 = vmul.f32 %v7355_v10, %v7355_v10 }
 0x38a   : > { %v3663_v31 = vadd.f32 %v3662_v50, %v3661_v56  ;;  %v3755_v39 = vadd.f32 %v3754_v45, %v3753_v2  ;;  %v3768_v56 = vsel %vm3189_vm5, %v3721_v62, 0.0  ;;  %v3727_v51 = vmul.f32 %v7361_v8, %v7361_v8 }
 0x38b   : > { %v3776_v2 = vsel %vm3189_vm5, %v3725_v14, 0.0  ;;  %v3728_v10 = vmul.f32 %v7359_v43, %v7359_v43  ;;  %v3694_v38 = vsel %vm3189_vm5, %v7375_v11, 0.0  ;;  %v3729_v8 = vmul.f32 %v7365_v13, %v7365_v13 }
 0x38c   : > { %v3665_v41 = vadd.f32 %v3664_v4, %v3663_v31  ;;  %v3757_v61 = vadd.f32 %v3756_v55, %v3755_v39  ;;  %v3692_v55 = vsel %vm3189_vm5, %v7377_v46, 0.0  ;;  %v3732_v13 = vmul.f32 %v7367_v5, %v7367_v5 }
 0x38d   : > { %v3782_v29 = vsel %vm3189_vm5, %v3728_v10, 0.0 }
 0x38e   : > { %v3667_v30 = vadd.f32 %v3666_v22, %v3665_v41  ;;  %v3759_v35 = vadd.f32 %v3758_v60, %v3757_v61  ;;  %v3686_v22 = vsel %vm3189_vm5, %v7367_v5, 0.0  ;;  %v3780_v60 = vsel %vm3189_vm5, %v3727_v51, 0.0 }
 0x38f   : > { %v3735_v5 = vmul.f32 %v7377_v46, %v7377_v46 }
 0x390   : > { %v3669_v54 = vadd.f32 %v3668_v21, %v3667_v30  ;;  %v3761_v58 = vadd.f32 %v3760_v24, %v3759_v35  ;;  %v3774_v21 = vsel %vm3189_vm5, %v3724_v33, 0.0  ;;  %v3690_v30 = vsel %vm3189_vm5, %v7371_v34, 0.0 }
 0x391   : > { %v3784_v35 = vsel %vm3189_vm5, %v3729_v8, 0.0 }
 0x392   : > { %v3671_v0 = vadd.f32 %v3670_v47, %v3669_v54  ;;  %v3763_v57 = vadd.f32 %v3762_v15, %v3761_v58  ;;  %v3778_v54 = vsel %vm3189_vm5, %v3726_v7, 0.0 }
 0x394   : > { %v3673_v20 = vadd.f32 %v3672_v36, %v3671_v0  ;;  %v3765_v44 = vadd.f32 %v3764_v18, %v3763_v57 }
 0x396   : > { %v3675_v9 = vadd.f32 %v3674_v23, %v3673_v20  ;;  %v3767_v4 = vadd.f32 %v3766_v26, %v3765_v44  ;;  %v3730_v23 = vmul.f32 %v7363_v42, %v7363_v42  ;;  %v3731_v20 = vmul.f32 %v7369_v28, %v7369_v28  ;;  %v3632_v44 = vld [vmem:[#allocation6] sm:$0x1] }
 0x397   : > { %v3733_v42 = vmul.f32 %v7373_v16, %v7373_v16  ;;  %v3734_v28 = vmul.f32 %v7371_v34, %v7371_v34  ;;  %v3736_v16 = vmul.f32 %v7375_v11, %v7375_v11 }
 0x398   : > { %v3677_v27 = vadd.f32 %v3676_v59, %v3675_v9  ;;  %v3769_v32 = vadd.f32 %v3768_v56, %v3767_v4  ;;  %v3786_v15 = vsel %vm3189_vm5, %v3730_v23, 0.0  ;;  %v3796_v56 = vsel %vm3189_vm5, %v3735_v5, 0.0 }
 0x399   : > { %v3792_v53 = vsel %vm3189_vm5, %v3733_v42, 0.0  ;;  %v3798_v46 = vsel %vm3189_vm5, %v3736_v16, 0.0 }
 0x39a   : > { %v3679_v50 = vadd.f32 %v3678_v12, %v3677_v27  ;;  %v3771_v41 = vadd.f32 %v3770_v19, %v3769_v32  ;;  %v3788_v12 = vsel %vm3189_vm5, %v3731_v20, 0.0  ;;  %v3790_v27 = vsel %vm3189_vm5, %v3732_v13, 0.0 }
 0x39c   : > { %v3681_v17 = vadd.f32 %v3680_v25, %v3679_v50  ;;  %v3773_v45 = vadd.f32 %v3772_v1, %v3771_v41 }
 0x39e   : > { %v3683_v31 = vadd.f32 %v3682_v49, %v3681_v17  ;;  %v3775_v6 = vadd.f32 %v3774_v21, %v3773_v45  ;;  %v3794_v49 = vsel %vm3189_vm5, %v3734_v28, 0.0 }
 0x3a0   : > { %v3685_v3 = vadd.f32 %v3684_v40, %v3683_v31  ;;  %v3777_v36 = vadd.f32 %v3776_v2, %v3775_v6 }
 0x3a2   : > { %v3687_v48 = vadd.f32 %v3686_v22, %v3685_v3  ;;  %v3779_v61 = vadd.f32 %v3778_v54, %v3777_v36 }
 0x3a4   : > { %v3689_v47 = vadd.f32 %v3688_v63, %v3687_v48  ;;  %v3781_v24 = vadd.f32 %v3780_v60, %v3779_v61 }
 0x3a6   : > { %v3691_v39 = vadd.f32 %v3690_v30, %v3689_v47  ;;  %v3783_v52 = vadd.f32 %v3782_v29, %v3781_v24 }
 0x3a8   : > { %v3693_v0 = vadd.f32 %v3692_v55, %v3691_v39  ;;  %v3785_v58 = vadd.f32 %v3784_v35, %v3783_v52 }
 0x3aa   : > { %v3695_v43 = vadd.f32 %v3694_v38, %v3693_v0  ;;  %v3787_v18 = vadd.f32 %v3786_v15, %v3785_v58 }
 0x3ac   : > { %v3696_v59 = vrot.slane %v3695_v43, 4  ;;  %v3789_v25 = vadd.f32 %v3788_v12, %v3787_v18 }
 0x3ae   : > { %v3697_v9 = vadd.f32 %v3696_v59, %v3695_v43  ;;  %v3791_v50 = vadd.f32 %v3790_v27, %v3789_v25 }
 0x3b0   : > { %v3698_v62 = vrot.slane %v3697_v9, 2  ;;  %v3793_v37 = vadd.f32 %v3792_v53, %v3791_v50 }
 0x3b2   : > { %v3699_v57 = vadd.f32 %v3698_v62, %v3697_v9  ;;  %v3795_v4 = vadd.f32 %v3794_v49, %v3793_v37 }
 0x3b4   : > { %v3700_v26 = vrot.slane %v3699_v57, 1  ;;  %v3797_v40 = vadd.f32 %v3796_v56, %v3795_v4 }
 0x3b6   : > { %v3701_v34 = vadd.f32 %v3700_v26, %v3699_v57 }
 0x3b8   : > { %v3702_v17 = vadd.f32 %v3701_v34, %v3632_v44 }
 0x3ba   : > { %3703 = vst.msk [vmem:[#allocation6] sm:$0x1] %vm3260_vm6, %v3702_v17 }
 0x3bb   : > { %5662 = shalt.err (!%p5659_p11)
}
 0x3bc   : > { %s5663_s13 = scalar_lea.hbm %s7747_s7, 16 }
 0x3bd   : > { %p5664_p12 = scmp.ne.s32.totalorder %s7747_s7, %s5663_s13  ;;  %p5669_p1 = scmp.lt.u32.totalorder %s5663_s13, %s7747_s7 }
 0x3bf   : > { %p5665_p13 = pnand %p5664_p12, %p7487_p6 }
 0x3c1   : > { %p5666_p0 = pneg %p5665_p13 }
 0x3c3   : > { %p5671_p2 = pnand %p5669_p1, %p5666_p0 }
 0x3c5   : > { %5674 = shalt.err (!%p5671_p2)
}
 0x3c6   : > { %5548 = dma.vmem_to_hbm [thread:$0]  (%p7487_p6), %s3898_s25, 16, %s7747_s7, [#allocation5]   ;;  %v3799_v11 = vadd.f32 %v3798_v46, %v3797_v40  ;;  %v3704_v14 = vld [vmem:[#allocation7] sm:$0x1] }
 0x3c7   : > { %s5742_s21 = smov [#allocation7]  }
 0x3c8   : > { %v3800_v33 = vrot.slane %v3799_v11, 4  ;;  %s3910_s30 = sshll.u32 %s5742_s21, 4  ;;  %s3911_s30 = int_to_ptr.vmem [resolvable:$true] %s3910_s30 }
 0x3c9   : > { %s5675_s22 = scalar_lea.vmem %s3911_s30, 16  ;;  %s5681_s23 = scalar_lea.vmem %s3911_s30, 32 }
 0x3ca   : > { %v3801_v19 = vadd.f32 %v3800_v33, %v3799_v11  ;;  %p5676_p3 = scmp.ne.s32.totalorder %s3911_s30, %s5675_s22  ;;  %p5682_p7 = scmp.lt.s32.totalorder %s3911_s30, %s3911_s30 }
 0x3cb   : > { %p5683_p8 = scmp.lt.s32.totalorder %s5681_s23, %s5675_s22 }
 0x3cc   : > { %v3802_v31 = vrot.slane %v3801_v19, 2  ;;  %p5677_p4 = pnand %p5676_p3, %p7487_p6 }
 0x3cd   : > { %p5684_p9 = por %p5683_p8, %p5682_p7 }
 0x3ce   : > { %v3803_v32 = vadd.f32 %v3802_v31, %v3801_v19  ;;  %p5678_p5 = pneg %p5677_p4 }
 0x3d0   : > { %v3804_v22 = vrot.slane %v3803_v32, 1  ;;  %p5685_p10 = pnand %p5684_p9, %p5678_p5 }
 0x3d2   : > { %v3805_v1 = vadd.f32 %v3804_v22, %v3803_v32 }
 0x3d4   : > { %v3806_v3 = vadd.f32 %v3805_v1, %v3704_v14 }
 0x3d6   : > { %3807 = vst.msk [vmem:[#allocation7] sm:$0x1] %vm3260_vm6, %v3806_v3 }
 0x3d7   : > { %5688 = shalt.err (!%p5685_p10)
}
 0x3d8   : > { %s5689_s25 = scalar_lea.hbm %s7748_s8, 16 }
 0x3d9   : > { %p5690_p11 = scmp.ne.s32.totalorder %s7748_s8, %s5689_s25  ;;  %p5695_p0 = scmp.lt.u32.totalorder %s5689_s25, %s7748_s8 }
 0x3db   : > { %p5691_p12 = pnand %p5690_p11, %p7487_p6 }
 0x3dd   : > { %p5692_p13 = pneg %p5691_p12 }
 0x3df   : > { %p5697_p1 = pnand %p5695_p0, %p5692_p13 }
 0x3e1   : > { %5700 = shalt.err (!%p5697_p1)
}
 0x3e2   : > { %5550 = dma.vmem_to_hbm [thread:$0]  (%p7487_p6), %s3911_s30, 16, %s7748_s8, [#allocation8]  }
 0x3e3   : > { %5714 = dma.done.wait (%p7487_p6), [#allocation3], 16  }
 0x3e4   : > { %5716 = vsyncadd (%p7487_p6), [#allocation3], 4294967280 }
 0x3e5   : > { %5718 = dma.done.wait (%p7487_p6), [#allocation5], 32  }
 0x3e6   : > { %5720 = vsyncadd (%p7487_p6), [#allocation5], 4294967264 }
 0x3e7   : > { %5722 = dma.done.wait (%p7487_p6), [#allocation8], 16  }
 0x3e8   : > { %5724 = vsyncadd (%p7487_p6), [#allocation8], 4294967280 }
 0x3e9 PF: > { %s22_s29 = sadd.s32 1, %s5735_s29   ;;  %s7945_s27 = smov %s5731_s28 }
 0x3ea   : > { %p19_p2 = scmp.ge.s32.totalorder %s22_s29, 4   ;;  %s7946_s28 = smov %s7948_s9 }
 0x3ec   :  { %21 = sbr.rel (!%p19_p2) target bundleno = 4 (0x4), region = 125 }
 0x3f3   :  { %3957 = vsyncpa [#allocation3], 1 }
 0x3f4   :  { %3959 = vsyncpa [#allocation3 + $0x1], 1 }
 0x3f5   :  { %3960 = vsyncpa [#allocation5], 1 }
 0x3f6   :  { %3961 = vsyncpa [#allocation8], 1 }

</bundles_post_ra>
